<compile_context>
chip_gen: v6e
topology: v6e:2x2x1
jax: 0.10.0
libtpu: 0.0.40
codegen_flags: <defaults>
</compile_context>

<pallas_src>
import functools

import jax
import jax.numpy as jnp
from jax.experimental import pallas as pl
from jax.experimental.pallas import tpu as pltpu


# ---------------------------------------------------------------------------
# Kernels
# ---------------------------------------------------------------------------

def _kv_proj_kernel(kv_ref, w_ref, b_ref, kvp_ref, kmax_ref, *, hidden):
    """kvp = kv @ [Wk|Wv] + [bk|bv]; also folds a running per-channel max of
    the k half (exp stabilizer) so the wrapper never re-reads kvp from HBM."""
    x = kv_ref[0].astype(w_ref.dtype)                          # (tk, dim) bf16
    y = jnp.dot(x, w_ref[...], preferred_element_type=jnp.float32) + b_ref[...]
    kvp_ref[0] = y

    tile_max = jnp.max(y[:, :hidden], axis=0, keepdims=True)   # (1, H)
    ki = pl.program_id(1)

    @pl.when(ki == 0)
    def _init():
        kmax_ref[0] = tile_max

    @pl.when(ki != 0)
    def _update():
        kmax_ref[0] = jnp.maximum(kmax_ref[0], tile_max)


def _prep_kernel(kvp_ref, kmax_ref, ekkv_ref, *, hidden):
    """ekkv = [exp(k - kmax) * v | exp(k - kmax)]  (f32 math, bf16 output).

    The two halves are stored directly (no concatenate) to avoid an extra
    (tk, 2H) temporary; both stores are lane-aligned when hidden % 128 == 0.
    """
    kvp = kvp_ref[0]                                           # (tk, 2H) f32
    k = kvp[:, :hidden]
    v = kvp[:, hidden:]
    ek = jnp.exp(k - kmax_ref[0])                              # <=1: no overflow
    ekkv_ref[0, :, :hidden] = (ek * v).astype(ekkv_ref.dtype)
    ekkv_ref[0, :, hidden:] = ek.astype(ekkv_ref.dtype)


def _aft_agg_kernel(ew_ref, ekkv_ref, q_ref, wq_ref, bq_ref, o_ref, acc_ref,
                    *, hidden):
    """acc += exp(w) @ [ekv | ek]; finalize fuses the q projection:
       out = sigmoid(q @ Wq + bq) * num / den."""
    ki = pl.program_id(2)

    @pl.when(ki == 0)
    def _init():
        acc_ref[...] = jnp.zeros_like(acc_ref)

    # Single fused num|den matmul: (tq, tk) @ (tk, 2H) -> (tq, 2H), f32 acc.
    acc_ref[...] += jnp.dot(ew_ref[...], ekkv_ref[0],
                            preferred_element_type=jnp.float32)

    @pl.when(ki == pl.num_programs(2) - 1)
    def _finalize():
        # q-projection + sigmoid, once per (b, q-tile).  The stage is HBM
        # bound, so this matmul rides in MXU slack and removes the separate
        # qs pallas_call + its (B, q_T, H) intermediate entirely.
        qp = jnp.dot(q_ref[0].astype(wq_ref.dtype), wq_ref[...],
                     preferred_element_type=jnp.float32) + bq_ref[...]
        gate = jax.nn.sigmoid(qp)
        num = acc_ref[:, :hidden]
        den = acc_ref[:, hidden:]
        # Exact reciprocal: finalize runs once per tile, so it is free.
        o_ref[0] = (gate * num * pl.reciprocal(den, approx=False)
                    ).astype(o_ref.dtype)


# ---------------------------------------------------------------------------
# Tile / VMEM sizing helpers
# ---------------------------------------------------------------------------

def _pick_tile(n, target, align):
    """Largest divisor of n that is <= target and a multiple of `align`;
    falls back to the largest divisor <= target, then n itself."""
    if n <= target:
        return n
    best_any = None
    for t in range(target, 0, -1):
        if n % t == 0:
            if t % align == 0:
                return t
            if best_any is None:
                best_any = t
    # TODO(synk): pad ragged sequence lengths to a tile multiple instead of
    # falling back to an unaligned divisor / the full axis.
    return best_any if best_any is not None else n


def _agg_vmem_bytes(tq, tk, dim, hidden, q_bytes, out_bytes):
    """Per-step VMEM footprint of the aggregation call (double-buffered)."""
    mm = 2                                          # bf16 MXU operands
    return (2 * tq * tk * mm                        # exp(w_bias) tile
            + 2 * tk * 2 * hidden * mm              # ekkv tile
            + 2 * tq * dim * q_bytes                # raw q tile
            + 2 * dim * hidden * mm                 # resident Wq
            + 2 * hidden * 4                        # bq
            + 2 * tq * hidden * out_bytes           # output tile
            + tq * 2 * hidden * 4)                  # f32 num|den accumulator


# ---------------------------------------------------------------------------
# Wrapper
# ---------------------------------------------------------------------------

@functools.partial(jax.jit, static_argnames=("tq", "tk"))
def aft_full(q, kv, params, *, tq=None, tk=None):
    """q: (B, q_T, dim), kv: (B, kv_T, dim) -> (B, q_T, hidden)."""
    B, q_T, dim = q.shape
    Bk, kv_T, dim_k = kv.shape
    assert B == Bk and dim == dim_k
    hidden = params["wq"].shape[1]
    out_dtype = q.dtype
    mm_dtype = jnp.bfloat16          # MXU operand dtype; accumulation stays f32.

    # 48 MiB scoped VMEM is safe on every generation (v7x: 64 MiB physical);
    # raise it on 128 MiB chips (v5e / v6e) when detectable.
    vmem_limit = 48 * 1024 * 1024
    try:
        phys = getattr(pltpu.get_tpu_info(), "vmem_capacity_bytes", None)
        if phys is not None and phys >= 128 * 1024 * 1024:
            vmem_limit = 96 * 1024 * 1024
    except Exception:
        pass
    budget = vmem_limit - 8 * 1024 * 1024     # headroom for internal scratch

    # ---- tile selection -----------------------------------------------
    q_bytes = q.dtype.itemsize
    o_bytes = jnp.dtype(out_dtype).itemsize
    auto_tq, auto_tk = tq is None, tk is None

    if auto_tq:
        tq_target = 1024 if hidden >= 512 else 512
        tq = _pick_tile(q_T, tq_target, 128)
        # v7x megacore: keep >= 2 'parallel' grid steps so both TCs are busy.
        if B == 1 and q_T // tq < 2 and q_T > 128:
            tq = _pick_tile(q_T, max(q_T // 2, 128), 128)

    if auto_tk:
        # Prefer keeping the whole per-batch ekkv resident in VMEM (then it is
        # DMA'd once per batch instead of once per q tile); otherwise stream
        # 512-wide kv tiles.
        tk = kv_T
        if _agg_vmem_bytes(tq, tk, dim, hidden, q_bytes, o_bytes) > budget:
            tk = _pick_tile(kv_T, 512, 128)

    # Shrink auto-picked tiles until the per-step footprint fits the budget.
    while _agg_vmem_bytes(tq, tk, dim, hidden, q_bytes, o_bytes) > budget:
        if auto_tk and tk % 256 == 0:
            tk //= 2
        elif auto_tq and tq % 256 == 0:
            tq //= 2
        else:
            break

    n_q, n_k = q_T // tq, kv_T // tk

    # Projection / prep use their own kv tile (kvp stream is f32, i.e. 2x the
    # aggregation's bf16 ekkv stream, so keep it at 512).
    tkp = _pick_tile(kv_T, 512, 128)
    n_kp = kv_T // tkp

    cparams_proj = pltpu.CompilerParams(
        dimension_semantics=("parallel", "arbitrary"),
        vmem_limit_bytes=vmem_limit)
    cparams_prep = pltpu.CompilerParams(
        dimension_semantics=("parallel", "parallel"),
        vmem_limit_bytes=vmem_limit)
    cparams_agg = pltpu.CompilerParams(
        dimension_semantics=("parallel", "parallel", "arbitrary"),
        vmem_limit_bytes=vmem_limit)

    # ---- 1) fused k|v projection + running k-max (exp stabilizer) -------
    wkv = jnp.concatenate([params["wk"], params["wv"]], axis=1).astype(mm_dtype)
    bkv = jnp.concatenate([params["bk"], params["bv"]], axis=1)
    kvp, kmax = pl.pallas_call(
        functools.partial(_kv_proj_kernel, hidden=hidden),
        out_shape=(jax.ShapeDtypeStruct((B, kv_T, 2 * hidden), jnp.float32),
                   jax.ShapeDtypeStruct((B, 1, hidden), jnp.float32)),
        grid=(B, n_kp),
        in_specs=[
            pl.BlockSpec((1, tkp, dim), lambda b, i: (b, i, 0)),
            pl.BlockSpec((dim, 2 * hidden), lambda b, i: (0, 0)),   # resident
            pl.BlockSpec((1, 2 * hidden), lambda b, i: (0, 0)),
        ],
        out_specs=(
            pl.BlockSpec((1, tkp, 2 * hidden), lambda b, i: (b, i, 0)),
            pl.BlockSpec((1, 1, hidden), lambda b, i: (b, 0, 0)),   # running max
        ),
        compiler_params=cparams_proj,
    )(kv, wkv, bkv)

    # ---- 2) stabilized exp(w_bias): tiny, computed ONCE (plain XLA) -----
    # The row-max / channel-max shifts cancel exactly in num/den.
    ew = jnp.exp(params["w_bias"]
                 - jnp.max(params["w_bias"], axis=-1, keepdims=True))
    ew = ew.astype(mm_dtype)                                        # (qT, kvT)

    # ---- 3) ekkv = [exp(k-kmax)*v | exp(k-kmax)], bf16, once per batch --
    ekkv = pl.pallas_call(
        functools.partial(_prep_kernel, hidden=hidden),
        out_shape=jax.ShapeDtypeStruct((B, kv_T, 2 * hidden), mm_dtype),
        grid=(B, n_kp),
        in_specs=[
            pl.BlockSpec((1, tkp, 2 * hidden), lambda b, i: (b, i, 0)),
            pl.BlockSpec((1, 1, hidden), lambda b, i: (b, 0, 0)),
        ],
        out_specs=pl.BlockSpec((1, tkp, 2 * hidden), lambda b, i: (b, i, 0)),
        compiler_params=cparams_prep,
    )(kvp, kmax)

    # ---- 4) AFT aggregation with fused q-projection + sigmoid gate ------
    # kv axis last ("arbitrary"); when tk == kv_T the ekkv block index is
    # constant across q tiles, so it is DMA'd once per batch.
    wq = params["wq"].astype(mm_dtype)
    out = pl.pallas_call(
        functools.partial(_aft_agg_kernel, hidden=hidden),
        out_shape=jax.ShapeDtypeStruct((B, q_T, hidden), out_dtype),
        grid=(B, n_q, n_k),
        in_specs=[
            pl.BlockSpec((tq, tk), lambda b, i, j: (i, j)),                # exp(w)
            pl.BlockSpec((1, tk, 2 * hidden), lambda b, i, j: (b, j, 0)),  # ekkv
            pl.BlockSpec((1, tq, dim), lambda b, i, j: (b, i, 0)),         # raw q
            pl.BlockSpec((dim, hidden), lambda b, i, j: (0, 0)),           # Wq
            pl.BlockSpec((1, hidden), lambda b, i, j: (0, 0)),             # bq
        ],
        out_specs=pl.BlockSpec((1, tq, hidden), lambda b, i, j: (b, i, 0)),
        scratch_shapes=[pltpu.VMEM((tq, 2 * hidden), jnp.float32)],        # num|den
        compiler_params=cparams_agg,
    )(ew, ekkv, q, wq, params["bq"])

    return out


# ---------------------------------------------------------------------------
# Pure-JAX reference (transliteration of the PyTorch forward) and demo
# ---------------------------------------------------------------------------

def aft_full_ref(q, kv, p):
    qp = q @ p["wq"] + p["bq"]
    k = kv @ p["wk"] + p["bk"]
    v = kv @ p["wv"] + p["bv"]
    A = jnp.exp(k[:, None, :, :] + p["w_bias"][None, :, :, None])   # (B,qT,kvT,H)
    b = (A * v[:, None, :, :]).sum(-2) / A.sum(-2)
    return jax.nn.sigmoid(qp) * b


def init_params(key, dim, hidden_dim, q_T, kv_T):
    ks = jax.random.split(key, 7)
    scale = 1.0 / jnp.sqrt(dim)
    return {
        "wq": jax.random.uniform(ks[0], (dim, hidden_dim), jnp.float32, -scale, scale),
        "bq": jax.random.uniform(ks[1], (1, hidden_dim), jnp.float32, -scale, scale),
        "wk": jax.random.uniform(ks[2], (dim, hidden_dim), jnp.float32, -scale, scale),
        "bk": jax.random.uniform(ks[3], (1, hidden_dim), jnp.float32, -scale, scale),
        "wv": jax.random.uniform(ks[4], (dim, hidden_dim), jnp.float32, -scale, scale),
        "bv": jax.random.uniform(ks[5], (1, hidden_dim), jnp.float32, -scale, scale),
        # Module inits w_bias to zeros; small random values exercise the path.
        "w_bias": 0.02 * jax.random.normal(ks[6], (q_T, kv_T), jnp.float32),
    }


if __name__ == "__main__":
    # Lane-dense shapes (multiples of 128 on dim/hidden, tile-aligned seqs).
    B, dim, hidden_dim, q_T, kv_T = 2, 128, 128, 512, 512

    key = jax.random.PRNGKey(0)
    kq, kkv, kp = jax.random.split(key, 3)
    q = jax.random.normal(kq, (B, q_T, dim), jnp.float32)
    kv = jax.random.normal(kkv, (B, kv_T, dim), jnp.float32)
    params = init_params(kp, dim, hidden_dim, q_T, kv_T)

    ref = aft_full_ref(q, kv, params)

    # Default (auto) tiling: full-kv-resident ekkv, tq = tk = 512.
    out = jax.block_until_ready(aft_full(q, kv, params))
    assert out.shape == (B, q_T, hidden_dim)
    err = jnp.max(jnp.abs(out - ref))
    # bf16 MXU operands (f32 accumulation) -> ~1e-3 level error; 2e-2 is generous.
    assert jnp.allclose(out, ref, rtol=2e-2, atol=2e-2), f"max abs err {err}"

    # Also exercise the streamed multi-kv-tile accumulation path.
    out2 = jax.block_until_ready(aft_full(q, kv, params, tq=256, tk=128))
    err2 = jnp.max(jnp.abs(out2 - ref))
    assert jnp.allclose(out2, ref, rtol=2e-2, atol=2e-2), f"max abs err {err2}"

    print("KERNEL_OK")
</pallas_src>

<mosaic_0001>
module attributes {stable_mosaic.version = 11 : i64} {
  func.func @_kv_proj_kernel(%arg0: i32, %arg1: i32, %arg2: memref<1x512x128xf32, #tpu.memory_space<vmem>>, %arg3: memref<128x256xbf16, #tpu.memory_space<vmem>>, %arg4: memref<1x256xf32, #tpu.memory_space<vmem>>, %arg5: memref<1x512x256xf32, #tpu.memory_space<vmem>>, %arg6: memref<1x1x128xf32, #tpu.memory_space<vmem>>) attributes {dimension_semantics = [#tpu.dimension_semantics<parallel>, #tpu.dimension_semantics<arbitrary>], iteration_bounds = array<i64: 2, 1>, scalar_prefetch = 0 : i64, scratch_operands = 0 : i64, tpu.core_type = #tpu.core_type<tc>, window_params = [{transform_indices = @transform_0, window_bounds = array<i64: 1, 512, 128>}, {pipeline_mode = #tpu.pipeline_mode<synchronous>, transform_indices = @transform_1, window_bounds = array<i64: 128, 256>}, {pipeline_mode = #tpu.pipeline_mode<synchronous>, transform_indices = @transform_2, window_bounds = array<i64: 1, 256>}, {transform_indices = @transform_3, window_bounds = array<i64: 1, 512, 256>}, {transform_indices = @transform_4, window_bounds = array<i64: 1, 1, 128>}]} {
    %c0 = arith.constant 0 : index
    %c0_0 = arith.constant 0 : index
    %c0_1 = arith.constant 0 : index
    %0 = vector.load %arg2[%c0, %c0_0, %c0_1] : memref<1x512x128xf32, #tpu.memory_space<vmem>>, vector<1x512x128xf32>
    %1 = vector.shape_cast %0 : vector<1x512x128xf32> to vector<512x128xf32>
    %2 = arith.truncf %1 : vector<512x128xf32> to vector<512x128xbf16>
    %c0_2 = arith.constant 0 : index
    %c0_3 = arith.constant 0 : index
    %3 = vector.load %arg3[%c0_2, %c0_3] : memref<128x256xbf16, #tpu.memory_space<vmem>>, vector<128x256xbf16>
    %cst = arith.constant dense<0.000000e+00> : vector<512x256xf32>
    %4 = tpu.matmul %2, %3, %cst {dimension_numbers = #tpu.dot_dimension_numbers<[1], [0], [0], [1], [0, 0, 1, 1], [], []>} : vector<512x128xbf16>, vector<128x256xbf16>, vector<512x256xf32> -> vector<512x256xf32>
    %c0_4 = arith.constant 0 : index
    %c0_5 = arith.constant 0 : index
    %5 = vector.load %arg4[%c0_4, %c0_5] : memref<1x256xf32, #tpu.memory_space<vmem>>, vector<1x256xf32>
    %6 = vector.broadcast %5 : vector<1x256xf32> to vector<512x256xf32>
    %7 = arith.addf %4, %6 : vector<512x256xf32>
    %c0_6 = arith.constant 0 : index
    %c0_7 = arith.constant 0 : index
    %c0_8 = arith.constant 0 : index
    %8 = vector.load %arg5[%c0_6, %c0_7, %c0_8] : memref<1x512x256xf32, #tpu.memory_space<vmem>>, vector<1x512x256xf32>
    %9 = vector.shape_cast %8 : vector<1x512x256xf32> to vector<512x256xf32>
    %10 = vector.shape_cast %7 : vector<512x256xf32> to vector<1x512x256xf32>
    tpu.vector_store %arg5[%c0_6, %c0_7, %c0_8], %10 {strides = array<i32>} : memref<1x512x256xf32, #tpu.memory_space<vmem>>, vector<1x512x256xf32>,
    %11 = vector.extract_strided_slice %7 {offsets = [0, 0], sizes = [512, 128], strides = [1, 1]} : vector<512x256xf32> to vector<512x128xf32>
    %cst_9 = arith.constant dense<0xFF800000> : vector<128xf32>
    %12 = vector.multi_reduction <maximumf>, %11, %cst_9 [0] : vector<512x128xf32> to vector<128xf32>
    %13 = vector.shape_cast %12 : vector<128xf32> to vector<1x128xf32>
    %c0_i32 = arith.constant 0 : i32
    %14 = arith.cmpi eq, %arg1, %c0_i32 : i32
    %15 = arith.extui %14 : i1 to i32
    %c0_i32_10 = arith.constant 0 : i32
    %16 = arith.cmpi ne, %15, %c0_i32_10 : i32
    scf.if %16 {
      %c0_13 = arith.constant 0 : index
      %c0_14 = arith.constant 0 : index
      %c0_15 = arith.constant 0 : index
      %20 = vector.load %arg6[%c0_13, %c0_14, %c0_15] : memref<1x1x128xf32, #tpu.memory_space<vmem>>, vector<1x1x128xf32>
      %21 = vector.shape_cast %20 : vector<1x1x128xf32> to vector<1x128xf32>
      %22 = vector.shape_cast %13 : vector<1x128xf32> to vector<1x1x128xf32>
      tpu.vector_store %arg6[%c0_13, %c0_14, %c0_15], %22 {strides = array<i32>} : memref<1x1x128xf32, #tpu.memory_space<vmem>>, vector<1x1x128xf32>,
    } else {
    }
    %c0_i32_11 = arith.constant 0 : i32
    %17 = arith.cmpi ne, %arg1, %c0_i32_11 : i32
    %18 = arith.extui %17 : i1 to i32
    %c0_i32_12 = arith.constant 0 : i32
    %19 = arith.cmpi ne, %18, %c0_i32_12 : i32
    scf.if %19 {
      %c0_13 = arith.constant 0 : index
      %c0_14 = arith.constant 0 : index
      %c0_15 = arith.constant 0 : index
      %20 = vector.load %arg6[%c0_13, %c0_14, %c0_15] : memref<1x1x128xf32, #tpu.memory_space<vmem>>, vector<1x1x128xf32>
      %21 = vector.shape_cast %20 : vector<1x1x128xf32> to vector<1x128xf32>
      %22 = arith.maximumf %21, %13 : vector<1x128xf32>
      %c0_16 = arith.constant 0 : index
      %c0_17 = arith.constant 0 : index
      %c0_18 = arith.constant 0 : index
      %23 = vector.load %arg6[%c0_16, %c0_17, %c0_18] : memref<1x1x128xf32, #tpu.memory_space<vmem>>, vector<1x1x128xf32>
      %24 = vector.shape_cast %23 : vector<1x1x128xf32> to vector<1x128xf32>
      %25 = vector.shape_cast %22 : vector<1x128xf32> to vector<1x1x128xf32>
      tpu.vector_store %arg6[%c0_16, %c0_17, %c0_18], %25 {strides = array<i32>} : memref<1x1x128xf32, #tpu.memory_space<vmem>>, vector<1x1x128xf32>,
    } else {
    }
    return
  }
  func.func @transform_0(%arg0: i32, %arg1: i32) -> (i32, i32, i32) {
    %c0_i32 = arith.constant 0 : i32
    %c0_i32_0 = arith.constant 0 : i32
    return %arg0, %arg1, %c0_i32 : i32, i32, i32
  }
  func.func @transform_1(%arg0: i32, %arg1: i32) -> (i32, i32) {
    %c0_i32 = arith.constant 0 : i32
    %c0_i32_0 = arith.constant 0 : i32
    %c0_i32_1 = arith.constant 0 : i32
    return %c0_i32, %c0_i32_0 : i32, i32
  }
  func.func @transform_2(%arg0: i32, %arg1: i32) -> (i32, i32) {
    %c0_i32 = arith.constant 0 : i32
    %c0_i32_0 = arith.constant 0 : i32
    %c0_i32_1 = arith.constant 0 : i32
    return %c0_i32, %c0_i32_0 : i32, i32
  }
  func.func @transform_3(%arg0: i32, %arg1: i32) -> (i32, i32, i32) {
    %c0_i32 = arith.constant 0 : i32
    %c0_i32_0 = arith.constant 0 : i32
    return %arg0, %arg1, %c0_i32 : i32, i32, i32
  }
  func.func @transform_4(%arg0: i32, %arg1: i32) -> (i32, i32, i32) {
    %c0_i32 = arith.constant 0 : i32
    %c0_i32_0 = arith.constant 0 : i32
    %c0_i32_1 = arith.constant 0 : i32
    return %arg0, %c0_i32, %c0_i32_0 : i32, i32, i32
  }
}

module attributes {stable_mosaic.version = 11 : i64} {
  func.func @_prep_kernel(%arg0: i32, %arg1: i32, %arg2: memref<1x512x256xf32, #tpu.memory_space<vmem>>, %arg3: memref<1x1x128xf32, #tpu.memory_space<vmem>>, %arg4: memref<1x512x256xbf16, #tpu.memory_space<vmem>>) attributes {dimension_semantics = [#tpu.dimension_semantics<parallel>, #tpu.dimension_semantics<parallel>], iteration_bounds = array<i64: 2, 1>, scalar_prefetch = 0 : i64, scratch_operands = 0 : i64, tpu.core_type = #tpu.core_type<tc>, window_params = [{transform_indices = @transform_0, window_bounds = array<i64: 1, 512, 256>}, {transform_indices = @transform_1, window_bounds = array<i64: 1, 1, 128>}, {transform_indices = @transform_2, window_bounds = array<i64: 1, 512, 256>}]} {
    %c0 = arith.constant 0 : index
    %c0_0 = arith.constant 0 : index
    %c0_1 = arith.constant 0 : index
    %0 = vector.load %arg2[%c0, %c0_0, %c0_1] : memref<1x512x256xf32, #tpu.memory_space<vmem>>, vector<1x512x256xf32>
    %1 = vector.shape_cast %0 : vector<1x512x256xf32> to vector<512x256xf32>
    %2 = vector.extract_strided_slice %1 {offsets = [0, 0], sizes = [512, 128], strides = [1, 1]} : vector<512x256xf32> to vector<512x128xf32>
    %3 = vector.extract_strided_slice %1 {offsets = [0, 128], sizes = [512, 128], strides = [1, 1]} : vector<512x256xf32> to vector<512x128xf32>
    %c0_2 = arith.constant 0 : index
    %c0_3 = arith.constant 0 : index
    %c0_4 = arith.constant 0 : index
    %4 = vector.load %arg3[%c0_2, %c0_3, %c0_4] : memref<1x1x128xf32, #tpu.memory_space<vmem>>, vector<1x1x128xf32>
    %5 = vector.shape_cast %4 : vector<1x1x128xf32> to vector<1x128xf32>
    %6 = vector.broadcast %5 : vector<1x128xf32> to vector<512x128xf32>
    %7 = arith.subf %2, %6 : vector<512x128xf32>
    %8 = math.exp %7 : vector<512x128xf32>
    %9 = arith.mulf %8, %3 : vector<512x128xf32>
    %10 = arith.truncf %9 : vector<512x128xf32> to vector<512x128xbf16>
    %c0_5 = arith.constant 0 : index
    %c0_6 = arith.constant 0 : index
    %c0_7 = arith.constant 0 : index
    %11 = vector.load %arg4[%c0_5, %c0_6, %c0_7] : memref<1x512x256xbf16, #tpu.memory_space<vmem>>, vector<1x512x128xbf16>
    %12 = vector.shape_cast %11 : vector<1x512x128xbf16> to vector<512x128xbf16>
    %13 = vector.shape_cast %10 : vector<512x128xbf16> to vector<1x512x128xbf16>
    tpu.vector_store %arg4[%c0_5, %c0_6, %c0_7], %13 {strides = array<i32>} : memref<1x512x256xbf16, #tpu.memory_space<vmem>>, vector<1x512x128xbf16>,
    %14 = arith.truncf %8 : vector<512x128xf32> to vector<512x128xbf16>
    %c0_8 = arith.constant 0 : index
    %c0_9 = arith.constant 0 : index
    %c128 = arith.constant 128 : index
    %15 = vector.load %arg4[%c0_8, %c0_9, %c128] : memref<1x512x256xbf16, #tpu.memory_space<vmem>>, vector<1x512x128xbf16>
    %16 = vector.shape_cast %15 : vector<1x512x128xbf16> to vector<512x128xbf16>
    %17 = vector.shape_cast %14 : vector<512x128xbf16> to vector<1x512x128xbf16>
    tpu.vector_store %arg4[%c0_8, %c0_9, %c128], %17 {strides = array<i32>} : memref<1x512x256xbf16, #tpu.memory_space<vmem>>, vector<1x512x128xbf16>,
    return
  }
  func.func @transform_0(%arg0: i32, %arg1: i32) -> (i32, i32, i32) {
    %c0_i32 = arith.constant 0 : i32
    %c0_i32_0 = arith.constant 0 : i32
    return %arg0, %arg1, %c0_i32 : i32, i32, i32
  }
  func.func @transform_1(%arg0: i32, %arg1: i32) -> (i32, i32, i32) {
    %c0_i32 = arith.constant 0 : i32
    %c0_i32_0 = arith.constant 0 : i32
    %c0_i32_1 = arith.constant 0 : i32
    return %arg0, %c0_i32, %c0_i32_0 : i32, i32, i32
  }
  func.func @transform_2(%arg0: i32, %arg1: i32) -> (i32, i32, i32) {
    %c0_i32 = arith.constant 0 : i32
    %c0_i32_0 = arith.constant 0 : i32
    return %arg0, %arg1, %c0_i32 : i32, i32, i32
  }
}

module attributes {stable_mosaic.version = 11 : i64} {
  func.func @_aft_agg_kernel(%arg0: i32, %arg1: i32, %arg2: i32, %arg3: memref<512x512xbf16, #tpu.memory_space<vmem>>, %arg4: memref<1x512x256xbf16, #tpu.memory_space<vmem>>, %arg5: memref<1x512x128xf32, #tpu.memory_space<vmem>>, %arg6: memref<128x128xbf16, #tpu.memory_space<vmem>>, %arg7: memref<1x128xf32, #tpu.memory_space<vmem>>, %arg8: memref<1x512x128xf32, #tpu.memory_space<vmem>>, %arg9: memref<512x256xf32, #tpu.memory_space<vmem>>) attributes {dimension_semantics = [#tpu.dimension_semantics<parallel>, #tpu.dimension_semantics<parallel>, #tpu.dimension_semantics<arbitrary>], iteration_bounds = array<i64: 2, 1, 1>, scalar_prefetch = 0 : i64, scratch_operands = 1 : i64, tpu.core_type = #tpu.core_type<tc>, window_params = [{transform_indices = @transform_0, window_bounds = array<i64: 512, 512>}, {transform_indices = @transform_1, window_bounds = array<i64: 1, 512, 256>}, {transform_indices = @transform_2, window_bounds = array<i64: 1, 512, 128>}, {pipeline_mode = #tpu.pipeline_mode<synchronous>, transform_indices = @transform_3, window_bounds = array<i64: 128, 128>}, {pipeline_mode = #tpu.pipeline_mode<synchronous>, transform_indices = @transform_4, window_bounds = array<i64: 1, 128>}, {transform_indices = @transform_5, window_bounds = array<i64: 1, 512, 128>}]} {
    %c0_i32 = arith.constant 0 : i32
    %0 = arith.cmpi eq, %arg2, %c0_i32 : i32
    %1 = arith.extui %0 : i1 to i32
    %c0_i32_0 = arith.constant 0 : i32
    %2 = arith.cmpi ne, %1, %c0_i32_0 : i32
    scf.if %2 {
      %cst_11 = arith.constant 0.000000e+00 : f32
      %13 = vector.broadcast %cst_11 : f32 to vector<512x256xf32>
      %c0_12 = arith.constant 0 : index
      %c0_13 = arith.constant 0 : index
      %14 = vector.load %arg9[%c0_12, %c0_13] : memref<512x256xf32, #tpu.memory_space<vmem>>, vector<512x256xf32>
      tpu.vector_store %arg9[%c0_12, %c0_13], %13 {strides = array<i32>} : memref<512x256xf32, #tpu.memory_space<vmem>>, vector<512x256xf32>,
    } else {
    }
    %c0 = arith.constant 0 : index
    %c0_1 = arith.constant 0 : index
    %3 = vector.load %arg9[%c0, %c0_1] : memref<512x256xf32, #tpu.memory_space<vmem>>, vector<512x256xf32>
    %c0_2 = arith.constant 0 : index
    %c0_3 = arith.constant 0 : index
    %4 = vector.load %arg3[%c0_2, %c0_3] : memref<512x512xbf16, #tpu.memory_space<vmem>>, vector<512x512xbf16>
    %c0_4 = arith.constant 0 : index
    %c0_5 = arith.constant 0 : index
    %c0_6 = arith.constant 0 : index
    %5 = vector.load %arg4[%c0_4, %c0_5, %c0_6] : memref<1x512x256xbf16, #tpu.memory_space<vmem>>, vector<1x512x256xbf16>
    %6 = vector.shape_cast %5 : vector<1x512x256xbf16> to vector<512x256xbf16>
    %cst = arith.constant dense<0.000000e+00> : vector<512x256xf32>
    %7 = tpu.matmul %4, %6, %cst {dimension_numbers = #tpu.dot_dimension_numbers<[1], [0], [0], [1], [0, 0, 1, 1], [], []>} : vector<512x512xbf16>, vector<512x256xbf16>, vector<512x256xf32> -> vector<512x256xf32>
    %8 = arith.addf %3, %7 : vector<512x256xf32>
    %c0_7 = arith.constant 0 : index
    %c0_8 = arith.constant 0 : index
    %9 = vector.load %arg9[%c0_7, %c0_8] : memref<512x256xf32, #tpu.memory_space<vmem>>, vector<512x256xf32>
    tpu.vector_store %arg9[%c0_7, %c0_8], %8 {strides = array<i32>} : memref<512x256xf32, #tpu.memory_space<vmem>>, vector<512x256xf32>,
    %c0_i32_9 = arith.constant 0 : i32
    %10 = arith.cmpi eq, %arg2, %c0_i32_9 : i32
    %11 = arith.extui %10 : i1 to i32
    %c0_i32_10 = arith.constant 0 : i32
    %12 = arith.cmpi ne, %11, %c0_i32_10 : i32
    scf.if %12 {
      %c0_11 = arith.constant 0 : index
      %c0_12 = arith.constant 0 : index
      %c0_13 = arith.constant 0 : index
      %13 = vector.load %arg5[%c0_11, %c0_12, %c0_13] : memref<1x512x128xf32, #tpu.memory_space<vmem>>, vector<1x512x128xf32>
      %14 = vector.shape_cast %13 : vector<1x512x128xf32> to vector<512x128xf32>
      %15 = arith.truncf %14 : vector<512x128xf32> to vector<512x128xbf16>
      %c0_14 = arith.constant 0 : index
      %c0_15 = arith.constant 0 : index
      %16 = vector.load %arg6[%c0_14, %c0_15] : memref<128x128xbf16, #tpu.memory_space<vmem>>, vector<128x128xbf16>
      %cst_16 = arith.constant dense<0.000000e+00> : vector<512x128xf32>
      %17 = tpu.matmul %15, %16, %cst_16 {dimension_numbers = #tpu.dot_dimension_numbers<[1], [0], [0], [1], [0, 0, 1, 1], [], []>} : vector<512x128xbf16>, vector<128x128xbf16>, vector<512x128xf32> -> vector<512x128xf32>
      %c0_17 = arith.constant 0 : index
      %c0_18 = arith.constant 0 : index
      %18 = vector.load %arg7[%c0_17, %c0_18] : memref<1x128xf32, #tpu.memory_space<vmem>>, vector<1x128xf32>
      %19 = vector.broadcast %18 : vector<1x128xf32> to vector<512x128xf32>
      %20 = arith.addf %17, %19 : vector<512x128xf32>
      %21 = arith.negf %20 : vector<512x128xf32>
      %22 = math.exp %21 : vector<512x128xf32>
      %cst_19 = arith.constant 1.000000e+00 : f32
      %23 = vector.broadcast %cst_19 : f32 to vector<512x128xf32>
      %24 = arith.addf %23, %22 : vector<512x128xf32>
      %25 = arith.divf %23, %24 : vector<512x128xf32>
      %c0_20 = arith.constant 0 : index
      %c0_21 = arith.constant 0 : index
      %26 = vector.load %arg9[%c0_20, %c0_21] : memref<512x256xf32, #tpu.memory_space<vmem>>, vector<512x128xf32>
      %c0_22 = arith.constant 0 : index
      %c128 = arith.constant 128 : index
      %27 = vector.load %arg9[%c0_22, %c128] : memref<512x256xf32, #tpu.memory_space<vmem>>, vector<512x128xf32>
      %28 = arith.mulf %25, %26 : vector<512x128xf32>
      %29 = tpu.reciprocal %27 : vector<512x128xf32> -> vector<512x128xf32>
      %30 = arith.mulf %28, %29 : vector<512x128xf32>
      %c0_23 = arith.constant 0 : index
      %c0_24 = arith.constant 0 : index
      %c0_25 = arith.constant 0 : index
      %31 = vector.load %arg8[%c0_23, %c0_24, %c0_25] : memref<1x512x128xf32, #tpu.memory_space<vmem>>, vector<1x512x128xf32>
      %32 = vector.shape_cast %31 : vector<1x512x128xf32> to vector<512x128xf32>
      %33 = vector.shape_cast %30 : vector<512x128xf32> to vector<1x512x128xf32>
      tpu.vector_store %arg8[%c0_23, %c0_24, %c0_25], %33 {strides = array<i32>} : memref<1x512x128xf32, #tpu.memory_space<vmem>>, vector<1x512x128xf32>,
    } else {
    }
    return
  }
  func.func @transform_0(%arg0: i32, %arg1: i32, %arg2: i32) -> (i32, i32) {
    %c0_i32 = arith.constant 0 : i32
    return %arg1, %arg2 : i32, i32
  }
  func.func @transform_1(%arg0: i32, %arg1: i32, %arg2: i32) -> (i32, i32, i32) {
    %c0_i32 = arith.constant 0 : i32
    %c0_i32_0 = arith.constant 0 : i32
    return %arg0, %arg2, %c0_i32 : i32, i32, i32
  }
  func.func @transform_2(%arg0: i32, %arg1: i32, %arg2: i32) -> (i32, i32, i32) {
    %c0_i32 = arith.constant 0 : i32
    %c0_i32_0 = arith.constant 0 : i32
    return %arg0, %arg1, %c0_i32 : i32, i32, i32
  }
  func.func @transform_3(%arg0: i32, %arg1: i32, %arg2: i32) -> (i32, i32) {
    %c0_i32 = arith.constant 0 : i32
    %c0_i32_0 = arith.constant 0 : i32
    %c0_i32_1 = arith.constant 0 : i32
    return %c0_i32, %c0_i32_0 : i32, i32
  }
  func.func @transform_4(%arg0: i32, %arg1: i32, %arg2: i32) -> (i32, i32) {
    %c0_i32 = arith.constant 0 : i32
    %c0_i32_0 = arith.constant 0 : i32
    %c0_i32_1 = arith.constant 0 : i32
    return %c0_i32, %c0_i32_0 : i32, i32
  }
  func.func @transform_5(%arg0: i32, %arg1: i32, %arg2: i32) -> (i32, i32, i32) {
    %c0_i32 = arith.constant 0 : i32
    %c0_i32_0 = arith.constant 0 : i32
    return %arg0, %arg1, %c0_i32 : i32, i32, i32
  }
}

</mosaic_0001>

<bundles_post_ra>
// kernel: aft_full.3
= control target key start
LH: loop header
LB: loop body
LE: loop exit
PB: predicated region body
PF: predicated region fallthrough
CT: control target
= control target key end

     0   :  { %10 = vsyncpa [#allocation3], 0  ;;  %s2102_s0 = inlined_call_operand.hbm [shape: f32[2,512,128], index: 0, kind: input, shape index: {}]   ;;  %s2103_s1 = inlined_call_operand.vmem [shape: bf16[128,256], index: 1, kind: input, shape index: {}]   ;;  %s2104_s2 = inlined_call_operand.vmem [shape: f32[1,256], index: 2, kind: input, shape index: {}]   ;;  %s2105_s3 = inlined_call_operand.vmem [shape: f32[2,512,256], index: 3, kind: output, shape index: {0}]   ;;  %s2106_s4 = inlined_call_operand.vmem [shape: f32[2,1,128], index: 4, kind: output, shape index: {1}]  }
   0x1   :  { %12 = vsyncpa [#allocation3 + $0x1], 0  ;;  %s1388_s15 = smov 0   ;;  %s1390_s16 = smov 0  }
   0x2   :  { %s1392_s17 = smov 0   ;;  %s1394_s18 = smov 0  }
   0x3   :  { %s1396_s19 = smov 0   ;;  %s1398_s20 = smov 0  }
   0x4 LB: > { %s1150_s21 = sadd.s32 4294967295, %s1357_s20   ;;  %s30_s22 = sadd.s32 1, %s1353_s19  ;;  %s1357_s20 = sphi %s1398_s20, %s18_s20   ;;  %s1353_s19 = sphi %s1396_s19, %s2114_s19   ;;  %s1349_s18 = sphi %s1394_s18, %s2113_s18   ;;  %s1345_s17 = sphi %s1392_s17, %s2112_s17   ;;  %s1341_s16 = sphi %s1390_s16, %s2111_s16   ;;  %s1337_s15 = sphi %s1388_s15, %s2110_s15  }
   0x5   : > { %p32_p0 = scmp.ge.s32.totalorder %s30_s22, 2  ;;  %s39_s23 = sadd.s32 1, %s1345_s17 }
   0x6   : > { %p46_p1 = scmp.ne.s32.totalorder %s1345_s17, %s1341_s16  ;;  %p47_p2 = scmp.eq.s32.totalorder %s1357_s20, 0 }
   0x7   : > { %s2116_s22 = smov (%p32_p0, %s30_s22), 0  ;;  %p52_p4 = scmp.ne.s32.totalorder %s1341_s16, %s1337_s15 }
   0x8   : > { %p1424_p3 = por %p47_p2, %p46_p1  ;;  %s34_s25 = ssub.s32 %s1353_s19, %s2116_s22 }
   0x9   : > { %p53_p5 = scmp.eq.s32.totalorder %s1150_s21, 0  ;;  %p37_p6 = scmp.eq.s32.totalorder %s34_s25, 0 }
   0xa   : > { %p1203_p8 = scmp.lt.s32.totalorder %s1357_s20, 2  ;;  %s178_s28 = sand.u32 1, %s1345_s17  }
   0xb   : > { %p1431_p7 = por %p53_p5, %p52_p4  ;;  %s1179_s29 = sshll.u32 %s1353_s19, 13 }
   0xc   : > { %s1437_s27 = scalar_select %p37_p6, %s1345_s17, %s39_s23  }
   0xd   : > { %s1154_s30 = sshll.u32 %s178_s28, 9  ;;  %s190_s7 = scalar_lea.hbm %s2102_s0, %s1179_s29 }
   0xe   : > { %s182_s8 = scalar_lea.vmem [#allocation2], %s1154_s30  ;;  %p1446_p9 = pnand %p1203_p8, %p1424_p3 }
   0xf   : > { %s191_s9 = sshll.u32 %s182_s8, 4  ;;  %s179_s11 = scalar_lea.sflag [#allocation3], %s178_s28  ;;  %s192_s9 = int_to_ptr.vmem [resolvable:$true] %s191_s9 }
  0x10   : > { %p1281_p10 = pneg %p1446_p9  ;;  %s1292_s12 = scalar_lea.vmem %s192_s9, 8192 }
  0x11   : > { %p1293_p11 = scmp.ne.s32.totalorder %s192_s9, %s1292_s12  ;;  %s1359_s13 = smov [#allocation2]  }
  0x12   : > { %s1297_s14 = sshll.u32 %s1359_s13, 4  ;;  %s1298_s14 = int_to_ptr.vmem [resolvable:$false] %s1297_s14 }
  0x13   : > { %p1295_p12 = pnand %p1293_p11, %p1281_p10  ;;  %s1299_s15 = scalar_lea.vmem %s1298_s14, 16384 }
  0x14   : > { %p1300_p0 = scmp.lt.s32.totalorder %s192_s9, %s1298_s14  ;;  %p1301_p1 = scmp.lt.s32.totalorder %s1299_s15, %s1292_s12 }
  0x15   : > { %p1296_p13 = pneg %p1295_p12 }
  0x16   : > { %p1302_p2 = por %p1301_p1, %p1300_p0 }
  0x18   : > { %p1303_p3 = pnand %p1302_p2, %p1296_p13 }
  0x1a   : > { %1306 = shalt.err (!%p1303_p3)
}
  0x1b   : > { %s1360_s21 = smov 128   ;;  %s1361_s23 = smov 8  }
  0x1c   : > { %1202 = dma.hbm_to_vmem [thread:$0]  (!%p1446_p9), %s190_s7, 8192, %s192_s9, %s179_s11, %s1360_s21, %s1360_s21, %s1361_s23  }
  0x1d   : > { %p1157_p4 = scmp.ge.s32.totalorder %s1357_s20, 1  ;;  %p199_p5 = scmp.lt.s32.totalorder %s1357_s20, 3 }
  0x1f   : > { %p200_p6 = pnand %p1157_p4, %p199_p5 }
  0x20   : > { %s205_s24 = sand.u32 (!%p200_p6), 1, %s1341_s16  }
  0x21   : > { %203 = sbr.rel (%p200_p6) target bundleno = 415 (0x19f), region = 32  ;;  %s1158_s25 = sshll.u32 (!%p200_p6), %s205_s24, 9 }
  0x22   : > { %s206_s28 = scalar_lea.sflag (!%p200_p6), [#allocation3], %s205_s24  ;;  %s1457_s29 = scalar_lea.vmem (!%p200_p6), [#allocation2], %s1158_s25 }
  0x26   : > { %1332 = dma.done.wait (%p1431_p7), %s206_s28, 8192  }
  0x27   : > { %1334 = vsyncadd (%p1431_p7), %s206_s28, 4294959104  ;;  %v1362_v0 = vmov 0   ;;  %v1255_v1 = vld [vmem:[%s2103_s1 + $0x74] ss:$8 sps:$4 sm:$0xff]   ;;  %v1257_v2 = vld [vmem:[%s2103_s1 + $0x70] ss:$8 sps:$4 sm:$0xff]  }
  0x28   : > { %494 = vmatprep.mubr.bf16.mxu0 %v1362_v0  ;;  %654 = vmatprep.mubr.bf16.mxu1 %v1362_v0  ;;  %v1258_v3 = vld [vmem:[%s2103_s1 + $0x64] ss:$8 sps:$4 sm:$0xff]   ;;  %v1260_v4 = vld [vmem:[%s2103_s1 + $0x60] ss:$8 sps:$4 sm:$0xff]   ;;  %v1261_v5 = vld [vmem:[%s2103_s1 + $0x54] ss:$8 sps:$4 sm:$0xff]  }
  0x29   : > { %462 = vmatprep.subr.bf16.mxu0 %v1255_v1  ;;  %1181 = vmatprep.subr.bf16.mxu1 %v1255_v1  ;;  %v1263_v6 = vld [vmem:[%s2103_s1 + $0x50] ss:$8 sps:$4 sm:$0xff]   ;;  %v1264_v7 = vld [vmem:[%s2103_s1 + $0x44] ss:$8 sps:$4 sm:$0xff]   ;;  %v1266_v8 = vld [vmem:[%s2103_s1 + $0x40] ss:$8 sps:$4 sm:$0xff]  }
  0x2a   : > { %463 = vmatpush1.bf16.msra.mxu0 %v1257_v2  ;;  %1189 = vmatpush1.bf16.msra.mxu1 %v1257_v2  ;;  %v1267_v9 = vld [vmem:[%s2103_s1 + $0x34] ss:$8 sps:$4 sm:$0xff]   ;;  %v1269_v10 = vld [vmem:[%s2103_s1 + $0x30] ss:$8 sps:$4 sm:$0xff]   ;;  %v1270_v11 = vld [vmem:[%s2103_s1 + $0x24] ss:$8 sps:$4 sm:$0xff]  }
  0x2b   : > { %464 = vmatprep.subr.bf16.mxu0 %v1258_v3  ;;  %1182 = vmatprep.subr.bf16.mxu1 %v1258_v3  ;;  %v1272_v12 = vld [vmem:[%s2103_s1 + $0x20] ss:$8 sps:$4 sm:$0xff]   ;;  %v1273_v13 = vld [vmem:[%s2103_s1 + $0x14] ss:$8 sps:$4 sm:$0xff]   ;;  %v1275_v14 = vld [vmem:[%s2103_s1 + $0x10] ss:$8 sps:$4 sm:$0xff]  }
  0x2c   : > { %v1276_v15 = vld [vmem:[%s2103_s1 + $0x4] ss:$8 sps:$4 sm:$0xff]   ;;  %v1278_v16 = vld [vmem:[%s2103_s1] ss:$8 sps:$4 sm:$0xff]   ;;  %v260_v23 = vld [vmem:[%s1457_s29 + $0x10] sm:$0xff]  ;;  %p244_p7 = scmp.lt.s32.totalorder %s1349_s18, 1 }
  0x2d   : > { %v258_v17 = vld [vmem:[%s1457_s29] sm:$0xff]  ;;  %v259_v18 = vld [vmem:[%s1457_s29 + $0x8] sm:$0xff]  ;;  %v261_v24 = vld [vmem:[%s1457_s29 + $0x18] sm:$0xff] }
  0x2e   : > { %465 = vmatpush1.bf16.msra.mxu0 %v1260_v4  ;;  %1190 = vmatpush1.bf16.msra.mxu1 %v1260_v4  ;;  %v290_v19 = vld [vmem:[%s1457_s29 + $0x100] sm:$0xff]  ;;  %v291_v20 = vld [vmem:[%s1457_s29 + $0x108] sm:$0xff]  ;;  %v322_v21 = vpack.c.bf16 %v259_v18, %v258_v17  ;;  %v292_v25 = vld [vmem:[%s1457_s29 + $0x110] sm:$0xff]  ;;  %v323_v27 = vpack.c.bf16 %v261_v24, %v260_v23  ;;  %s2118_s18 = smov (!%p244_p7, %s1349_s18), 1 }
  0x2f   : > { %466 = vmatprep.subr.bf16.mxu0 %v1261_v5  ;;  %1183 = vmatprep.subr.bf16.mxu1 %v1261_v5  ;;  %v338_v22 = vpack.c.bf16 %v291_v20, %v290_v19  ;;  %v293_v26 = vld [vmem:[%s1457_s29 + $0x118] sm:$0xff]  ;;  %v262_v29 = vld [vmem:[%s1457_s29 + $0x20] sm:$0xff]  ;;  %v263_v30 = vld [vmem:[%s1457_s29 + $0x28] sm:$0xff]  ;;  %s1180_s25 = sshll.u32 %s2118_s18, 10  ;;  %s256_s7 = scalar_lea.vmem %s2106_s4, %s2118_s18 }
  0x30   : > { %v339_v28 = vpack.c.bf16 %v293_v26, %v292_v25  ;;  %v294_v31 = vld [vmem:[%s1457_s29 + $0x120] sm:$0xff]  ;;  %v295_v32 = vld [vmem:[%s1457_s29 + $0x128] sm:$0xff]  ;;  %v324_v33 = vpack.c.bf16 %v263_v30, %v262_v29  ;;  %v264_v35 = vld [vmem:[%s1457_s29 + $0x30] sm:$0xff]  ;;  %s1622_s30 = scalar_lea.vmem %s2105_s3, %s1180_s25 }
  0x31   : > { %v340_v34 = vpack.c.bf16 %v295_v32, %v294_v31  ;;  %v265_v36 = vld [vmem:[%s1457_s29 + $0x38] sm:$0xff]  ;;  %v296_v37 = vld [vmem:[%s1457_s29 + $0x130] sm:$0xff]  ;;  %v266_v41 = vld [vmem:[%s1457_s29 + $0x40] sm:$0xff] }
  0x32   : > { %467 = vmatpush1.bf16.msra.mxu0 %v1263_v6  ;;  %1191 = vmatpush1.bf16.msra.mxu1 %v1263_v6  ;;  %v297_v38 = vld [vmem:[%s1457_s29 + $0x138] sm:$0xff]  ;;  %v325_v39 = vpack.c.bf16 %v265_v36, %v264_v35  ;;  %v267_v42 = vld [vmem:[%s1457_s29 + $0x48] sm:$0xff]  ;;  %v298_v43 = vld [vmem:[%s1457_s29 + $0x140] sm:$0xff] }
  0x33   : > { %468 = vmatprep.subr.bf16.mxu0 %v1264_v7  ;;  %1184 = vmatprep.subr.bf16.mxu1 %v1264_v7  ;;  %v341_v40 = vpack.c.bf16 %v297_v38, %v296_v37  ;;  %v299_v44 = vld [vmem:[%s1457_s29 + $0x148] sm:$0xff]  ;;  %v326_v45 = vpack.c.bf16 %v267_v42, %v266_v41  ;;  %v268_v47 = vld [vmem:[%s1457_s29 + $0x50] sm:$0xff]  ;;  %v269_v48 = vld [vmem:[%s1457_s29 + $0x58] sm:$0xff] }
  0x34   : > { %v342_v46 = vpack.c.bf16 %v299_v44, %v298_v43  ;;  %v300_v49 = vld [vmem:[%s1457_s29 + $0x150] sm:$0xff]  ;;  %v301_v50 = vld [vmem:[%s1457_s29 + $0x158] sm:$0xff]  ;;  %v327_v51 = vpack.c.bf16 %v269_v48, %v268_v47  ;;  %v270_v53 = vld [vmem:[%s1457_s29 + $0x60] sm:$0xff] }
  0x35   : > { %v343_v52 = vpack.c.bf16 %v301_v50, %v300_v49  ;;  %v271_v54 = vld [vmem:[%s1457_s29 + $0x68] sm:$0xff]  ;;  %v302_v55 = vld [vmem:[%s1457_s29 + $0x160] sm:$0xff]  ;;  %v272_v59 = vld [vmem:[%s1457_s29 + $0x70] sm:$0xff]  ;;  %v372_v50 = vlaneseq }
  0x36   : > { %469 = vmatpush1.bf16.msra.mxu0 %v1266_v8  ;;  %1192 = vmatpush1.bf16.msra.mxu1 %v1266_v8  ;;  %v303_v56 = vld [vmem:[%s1457_s29 + $0x168] sm:$0xff]  ;;  %v328_v57 = vpack.c.bf16 %v271_v54, %v270_v53  ;;  %v273_v60 = vld [vmem:[%s1457_s29 + $0x78] sm:$0xff]  ;;  %v304_v61 = vld [vmem:[%s1457_s29 + $0x170] sm:$0xff] }
  0x37   : > { %470 = vmatprep.subr.bf16.mxu0 %v1267_v9  ;;  %1185 = vmatprep.subr.bf16.mxu1 %v1267_v9  ;;  %v344_v58 = vpack.c.bf16 %v303_v56, %v302_v55  ;;  %v305_v62 = vld [vmem:[%s1457_s29 + $0x178] sm:$0xff]  ;;  %v329_v63 = vpack.c.bf16 %v273_v60, %v272_v59  ;;  %v274_v2 = vld [vmem:[%s1457_s29 + $0x80] sm:$0xff]  ;;  %v275_v3 = vld [vmem:[%s1457_s29 + $0x88] sm:$0xff] }
  0x38   : > { %v345_v1 = vpack.c.bf16 %v305_v62, %v304_v61  ;;  %v306_v4 = vld [vmem:[%s1457_s29 + $0x180] sm:$0xff]  ;;  %v307_v5 = vld [vmem:[%s1457_s29 + $0x188] sm:$0xff]  ;;  %v330_v6 = vpack.c.bf16 %v275_v3, %v274_v2  ;;  %v276_v8 = vld [vmem:[%s1457_s29 + $0x90] sm:$0xff] }
  0x39   : > { %v346_v7 = vpack.c.bf16 %v307_v5, %v306_v4  ;;  %v277_v9 = vld [vmem:[%s1457_s29 + $0x98] sm:$0xff]  ;;  %v311_v17 = vld [vmem:[%s1457_s29 + $0x1a8] sm:$0xff]  ;;  %v280_v20 = vld [vmem:[%s1457_s29 + $0xb0] sm:$0xff] }
  0x3a   : > { %471 = vmatpush1.bf16.msra.mxu0 %v1269_v10  ;;  %1193 = vmatpush1.bf16.msra.mxu1 %v1269_v10  ;;  %v308_v10 = vld [vmem:[%s1457_s29 + $0x190] sm:$0xff]  ;;  %v313_v23 = vld [vmem:[%s1457_s29 + $0x1b8] sm:$0xff]  ;;  %v282_v26 = vld [vmem:[%s1457_s29 + $0xc0] sm:$0xff] }
  0x3b   : > { %472 = vmatprep.subr.bf16.mxu0 %v1270_v11  ;;  %1186 = vmatprep.subr.bf16.mxu1 %v1270_v11  ;;  %v309_v11 = vld [vmem:[%s1457_s29 + $0x198] sm:$0xff]  ;;  %v315_v29 = vld [vmem:[%s1457_s29 + $0x1c8] sm:$0xff]  ;;  %v284_v32 = vld [vmem:[%s1457_s29 + $0xd0] sm:$0xff] }
  0x3c   : > { %v317_v35 = vld [vmem:[%s1457_s29 + $0x1d8] sm:$0xff]  ;;  %v286_v38 = vld [vmem:[%s1457_s29 + $0xe0] sm:$0xff]  ;;  %v319_v41 = vld [vmem:[%s1457_s29 + $0x1e8] sm:$0xff] }
  0x3d   : > { %v288_v44 = vld [vmem:[%s1457_s29 + $0xf0] sm:$0xff]  ;;  %v321_v47 = vld [vmem:[%s1457_s29 + $0x1f8] sm:$0xff]  ;;  %v370_v53 = vld [vmem:[%s2104_s2] sm:$0x3] }
  0x3e   : > { %473 = vmatpush1.bf16.msra.mxu0 %v1272_v12  ;;  %1194 = vmatpush1.bf16.msra.mxu1 %v1272_v12  ;;  %v331_v12 = vpack.c.bf16 %v277_v9, %v276_v8 }
  0x3f   : > { %474 = vmatprep.subr.bf16.mxu0 %v1273_v13  ;;  %1187 = vmatprep.subr.bf16.mxu1 %v1273_v13  ;;  %v347_v13 = vpack.c.bf16 %v309_v11, %v308_v10 }
  0x42   : > { %475 = vmatpush1.bf16.msra.mxu0 %v1275_v14  ;;  %1195 = vmatpush1.bf16.msra.mxu1 %v1275_v14  ;;  %v278_v14 = vld [vmem:[%s1457_s29 + $0xa0] sm:$0xff] }
  0x43   : > { %476 = vmatprep.subr.bf16.mxu0 %v1276_v15  ;;  %1188 = vmatprep.subr.bf16.mxu1 %v1276_v15  ;;  %v279_v15 = vld [vmem:[%s1457_s29 + $0xa8] sm:$0xff] }
  0x44   : > { %v332_v18 = vpack.c.bf16 %v279_v15, %v278_v14 }
  0x46   : > { %477 = vmatpush1.bf16.msra.mxu0 %v1278_v16  ;;  %1196 = vmatpush1.bf16.msra.mxu1 %v1278_v16  ;;  %v310_v16 = vld [vmem:[%s1457_s29 + $0x1a0] sm:$0xff] }
  0x47   : > { %v348_v19 = vpack.c.bf16 %v311_v17, %v310_v16 }
  0x49   : > { %495 = vmatmul.mubr.bf16.vlgmr.msra.gmra.mxu0 %v322_v21  ;;  %655 = vmatmul.mubr.bf16.vlgmr.msra.gmra.mxu1 %v338_v22  ;;  %v281_v21 = vld [vmem:[%s1457_s29 + $0xb8] sm:$0xff]  ;;  %v312_v22 = vld [vmem:[%s1457_s29 + $0x1b0] sm:$0xff] }
  0x4a   : > { %504 = vmatprep.mubr.bf16.mxu0 %v1362_v0  ;;  %664 = vmatprep.mubr.bf16.mxu1 %v1362_v0  ;;  %v333_v24 = vpack.c.bf16 %v281_v21, %v280_v20  ;;  %v349_v25 = vpack.c.bf16 %v313_v23, %v312_v22 }
  0x51   : > { %505 = vmatmul.mubr.bf16.gmra.mxu0 %v323_v27  ;;  %665 = vmatmul.mubr.bf16.gmra.mxu1 %v339_v28  ;;  %v283_v27 = vld [vmem:[%s1457_s29 + $0xc8] sm:$0xff]  ;;  %v314_v28 = vld [vmem:[%s1457_s29 + $0x1c0] sm:$0xff] }
  0x52   : > { %514 = vmatprep.mubr.bf16.mxu0 %v1362_v0  ;;  %674 = vmatprep.mubr.bf16.mxu1 %v1362_v0  ;;  %v334_v30 = vpack.c.bf16 %v283_v27, %v282_v26  ;;  %v350_v31 = vpack.c.bf16 %v315_v29, %v314_v28 }
  0x59   : > { %515 = vmatmul.mubr.bf16.gmra.mxu0 %v324_v33  ;;  %675 = vmatmul.mubr.bf16.gmra.mxu1 %v340_v34  ;;  %v285_v33 = vld [vmem:[%s1457_s29 + $0xd8] sm:$0xff]  ;;  %v316_v34 = vld [vmem:[%s1457_s29 + $0x1d0] sm:$0xff] }
  0x5a   : > { %524 = vmatprep.mubr.bf16.mxu0 %v1362_v0  ;;  %684 = vmatprep.mubr.bf16.mxu1 %v1362_v0  ;;  %v335_v36 = vpack.c.bf16 %v285_v33, %v284_v32  ;;  %v351_v37 = vpack.c.bf16 %v317_v35, %v316_v34 }
  0x61   : > { %525 = vmatmul.mubr.bf16.gmra.mxu0 %v325_v39  ;;  %685 = vmatmul.mubr.bf16.gmra.mxu1 %v341_v40  ;;  %v287_v39 = vld [vmem:[%s1457_s29 + $0xe8] sm:$0xff]  ;;  %v318_v40 = vld [vmem:[%s1457_s29 + $0x1e0] sm:$0xff] }
  0x62   : > { %534 = vmatprep.mubr.bf16.mxu0 %v1362_v0  ;;  %694 = vmatprep.mubr.bf16.mxu1 %v1362_v0  ;;  %v336_v42 = vpack.c.bf16 %v287_v39, %v286_v38  ;;  %v352_v43 = vpack.c.bf16 %v319_v41, %v318_v40 }
  0x69   : > { %535 = vmatmul.mubr.bf16.gmra.mxu0 %v326_v45  ;;  %695 = vmatmul.mubr.bf16.gmra.mxu1 %v342_v46  ;;  %v289_v45 = vld [vmem:[%s1457_s29 + $0xf8] sm:$0xff]  ;;  %v320_v46 = vld [vmem:[%s1457_s29 + $0x1f0] sm:$0xff] }
  0x6a   : > { %544 = vmatprep.mubr.bf16.mxu0 %v1362_v0  ;;  %704 = vmatprep.mubr.bf16.mxu1 %v1362_v0  ;;  %v337_v48 = vpack.c.bf16 %v289_v45, %v288_v44  ;;  %v353_v49 = vpack.c.bf16 %v321_v47, %v320_v46 }
  0x71   : > { %545 = vmatmul.mubr.bf16.gmra.mxu0 %v327_v51  ;;  %705 = vmatmul.mubr.bf16.gmra.mxu1 %v343_v52  ;;  %v373_v51 = vshrl.u32 %v372_v50, 7 }
  0x72   : > { %554 = vmatprep.mubr.bf16.mxu0 %v1362_v0  ;;  %714 = vmatprep.mubr.bf16.mxu1 %v1362_v0 }
  0x73   : > { %v374_v52 = vsub.s32 0, %v373_v51  ;;  %v378_v54 = vsub.s32 1, %v373_v51 }
  0x75   : > { %v1617_v55 = vrot.slane %v370_v53, %v378_v54 }
  0x79   : > { %555 = vmatmul.mubr.bf16.gmra.mxu0 %v328_v57  ;;  %715 = vmatmul.mubr.bf16.gmra.mxu1 %v344_v58 }
  0x7a   : > { %564 = vmatprep.mubr.bf16.mxu0 %v1362_v0  ;;  %724 = vmatprep.mubr.bf16.mxu1 %v1362_v0 }
  0x81   : > { %565 = vmatmul.mubr.bf16.gmra.mxu0 %v329_v63  ;;  %725 = vmatmul.mubr.bf16.gmra.mxu1 %v345_v1 }
  0x82   : > { %574 = vmatprep.mubr.bf16.mxu0 %v1362_v0  ;;  %734 = vmatprep.mubr.bf16.mxu1 %v1362_v0 }
  0x89   : > { %575 = vmatmul.mubr.bf16.gmra.mxu0 %v330_v6  ;;  %735 = vmatmul.mubr.bf16.gmra.mxu1 %v346_v7 }
  0x8a   : > { %584 = vmatprep.mubr.bf16.mxu0 %v1362_v0  ;;  %744 = vmatprep.mubr.bf16.mxu1 %v1362_v0 }
  0x91   : > { %585 = vmatmul.mubr.bf16.gmra.mxu0 %v331_v12  ;;  %745 = vmatmul.mubr.bf16.gmra.mxu1 %v347_v13 }
  0x92   : > { %594 = vmatprep.mubr.bf16.mxu0 %v1362_v0  ;;  %754 = vmatprep.mubr.bf16.mxu1 %v1362_v0 }
  0x99   : > { %595 = vmatmul.mubr.bf16.gmra.mxu0 %v332_v18  ;;  %755 = vmatmul.mubr.bf16.gmra.mxu1 %v348_v19 }
  0x9a   : > { %604 = vmatprep.mubr.bf16.mxu0 %v1362_v0  ;;  %764 = vmatprep.mubr.bf16.mxu1 %v1362_v0 }
  0xa1   : > { %605 = vmatmul.mubr.bf16.gmra.mxu0 %v333_v24  ;;  %765 = vmatmul.mubr.bf16.gmra.mxu1 %v349_v25 }
  0xa2   : > { %614 = vmatprep.mubr.bf16.mxu0 %v1362_v0  ;;  %774 = vmatprep.mubr.bf16.mxu1 %v1362_v0 }
  0xa9   : > { %615 = vmatmul.mubr.bf16.gmra.mxu0 %v334_v30  ;;  %775 = vmatmul.mubr.bf16.gmra.mxu1 %v350_v31 }
  0xaa   : > { %624 = vmatprep.mubr.bf16.mxu0 %v1362_v0  ;;  %784 = vmatprep.mubr.bf16.mxu1 %v1362_v0 }
  0xb1   : > { %625 = vmatmul.mubr.bf16.gmra.mxu0 %v335_v36  ;;  %785 = vmatmul.mubr.bf16.gmra.mxu1 %v351_v37 }
  0xb2   : > { %634 = vmatprep.mubr.bf16.mxu0 %v1362_v0  ;;  %794 = vmatprep.mubr.bf16.mxu1 %v1362_v0 }
  0xb9   : > { %635 = vmatmul.mubr.bf16.gmra.mxu0 %v336_v42  ;;  %795 = vmatmul.mubr.bf16.gmra.mxu1 %v352_v43 }
  0xba   : > { %644 = vmatprep.mubr.bf16.mxu0 %v1362_v0  ;;  %804 = vmatprep.mubr.bf16.mxu1 %v1362_v0  ;;  %v1615_v0 = vrot.slane %v370_v53, %v374_v52 }
  0xc1   : > { %645 = vmatmul.mubr.bf16.gmra.mxu0 %v337_v48  ;;  %805 = vmatmul.mubr.bf16.gmra.mxu1 %v353_v49 }
 0x109   : > { %v496_v56 = vpop.f32.mrf.mxu0  ;;  %v656_v57 = vpop.f32.mrf.mxu1 }
 0x10a   : > { %v1625_v58 = vadd.f32 %v496_v56, %v1615_v0  ;;  %v1628_v59 = vadd.f32 %v656_v57, %v1615_v0 }
 0x10b   : > { %v498_v60 = vpop.f32.mrf.mxu0  ;;  %v658_v61 = vpop.f32.mrf.mxu1 }
 0x10c   : > { %815 = vst [vmem:[%s1622_s30] sm:$0xff] %v1625_v58  ;;  %v499_v62 = vadd.f32 %v498_v60, %v1617_v55  ;;  %879 = vst [vmem:[%s1622_s30 + $0x200] sm:$0xff] %v1628_v59  ;;  %v659_v63 = vadd.f32 %v658_v61, %v1617_v55 }
 0x10d   : > { %v500_v1 = vpop.f32.mrf.mxu0  ;;  %v660_v2 = vpop.f32.mrf.mxu1 }
 0x10e   : > { %816 = vst [vmem:[%s1622_s30 + $0x8] sm:$0xff] %v499_v62  ;;  %v1638_v3 = vadd.f32 %v500_v1, %v1615_v0  ;;  %880 = vst [vmem:[%s1622_s30 + $0x208] sm:$0xff] %v659_v63  ;;  %v1642_v4 = vadd.f32 %v660_v2, %v1615_v0 }
 0x10f   : > { %v502_v5 = vpop.f32.mrf.mxu0  ;;  %v662_v6 = vpop.f32.mrf.mxu1 }
 0x110   : > { %817 = vst [vmem:[%s1622_s30 + $0x10] sm:$0xff] %v1638_v3  ;;  %v503_v7 = vadd.f32 %v502_v5, %v1617_v55  ;;  %881 = vst [vmem:[%s1622_s30 + $0x210] sm:$0xff] %v1642_v4  ;;  %v663_v8 = vadd.f32 %v662_v6, %v1617_v55 }
 0x111   : > { %v506_v9 = vpop.f32.mrf.mxu0  ;;  %v666_v10 = vpop.f32.mrf.mxu1 }
 0x112   : > { %818 = vst [vmem:[%s1622_s30 + $0x18] sm:$0xff] %v503_v7  ;;  %v1652_v11 = vadd.f32 %v506_v9, %v1615_v0  ;;  %882 = vst [vmem:[%s1622_s30 + $0x218] sm:$0xff] %v663_v8  ;;  %v1656_v12 = vadd.f32 %v666_v10, %v1615_v0 }
 0x113   : > { %v508_v13 = vpop.f32.mrf.mxu0  ;;  %v668_v14 = vpop.f32.mrf.mxu1 }
 0x114   : > { %819 = vst [vmem:[%s1622_s30 + $0x20] sm:$0xff] %v1652_v11  ;;  %v509_v15 = vadd.f32 %v508_v13, %v1617_v55  ;;  %883 = vst [vmem:[%s1622_s30 + $0x220] sm:$0xff] %v1656_v12  ;;  %v669_v16 = vadd.f32 %v668_v14, %v1617_v55 }
 0x115   : > { %v510_v17 = vpop.f32.mrf.mxu0  ;;  %v670_v18 = vpop.f32.mrf.mxu1 }
 0x116   : > { %820 = vst [vmem:[%s1622_s30 + $0x28] sm:$0xff] %v509_v15  ;;  %v1666_v19 = vadd.f32 %v510_v17, %v1615_v0  ;;  %884 = vst [vmem:[%s1622_s30 + $0x228] sm:$0xff] %v669_v16  ;;  %v1670_v20 = vadd.f32 %v670_v18, %v1615_v0 }
 0x117   : > { %v512_v21 = vpop.f32.mrf.mxu0  ;;  %v672_v22 = vpop.f32.mrf.mxu1 }
 0x118   : > { %821 = vst [vmem:[%s1622_s30 + $0x30] sm:$0xff] %v1666_v19  ;;  %v513_v23 = vadd.f32 %v512_v21, %v1617_v55  ;;  %885 = vst [vmem:[%s1622_s30 + $0x230] sm:$0xff] %v1670_v20  ;;  %v673_v24 = vadd.f32 %v672_v22, %v1617_v55 }
 0x119   : > { %v516_v25 = vpop.f32.mrf.mxu0  ;;  %v676_v26 = vpop.f32.mrf.mxu1 }
 0x11a   : > { %822 = vst [vmem:[%s1622_s30 + $0x38] sm:$0xff] %v513_v23  ;;  %v517_v27 = vadd.f32 %v516_v25, %v1615_v0  ;;  %886 = vst [vmem:[%s1622_s30 + $0x238] sm:$0xff] %v673_v24  ;;  %v1682_v28 = vadd.f32 %v676_v26, %v1615_v0 }
 0x11b   : > { %v518_v29 = vpop.f32.mrf.mxu0  ;;  %v678_v30 = vpop.f32.mrf.mxu1 }
 0x11c   : > { %823 = vst [vmem:[%s1622_s30 + $0x40] sm:$0xff] %v517_v27  ;;  %v943_v31 = vmax.f32 %v1625_v58, %v517_v27  ;;  %v519_v32 = vadd.f32 %v518_v29, %v1617_v55  ;;  %887 = vst [vmem:[%s1622_s30 + $0x240] sm:$0xff] %v1682_v28  ;;  %v679_v33 = vadd.f32 %v678_v30, %v1617_v55 }
 0x11d   : > { %v520_v34 = vpop.f32.mrf.mxu0  ;;  %v680_v35 = vpop.f32.mrf.mxu1 }
 0x11e   : > { %824 = vst [vmem:[%s1622_s30 + $0x48] sm:$0xff] %v519_v32  ;;  %v521_v36 = vadd.f32 %v520_v34, %v1615_v0  ;;  %888 = vst [vmem:[%s1622_s30 + $0x248] sm:$0xff] %v679_v33  ;;  %v1694_v37 = vadd.f32 %v680_v35, %v1615_v0 }
 0x11f   : > { %v522_v38 = vpop.f32.mrf.mxu0  ;;  %v682_v39 = vpop.f32.mrf.mxu1 }
 0x120   : > { %825 = vst [vmem:[%s1622_s30 + $0x50] sm:$0xff] %v521_v36  ;;  %v944_v40 = vmax.f32 %v1638_v3, %v521_v36  ;;  %v523_v41 = vadd.f32 %v522_v38, %v1617_v55  ;;  %889 = vst [vmem:[%s1622_s30 + $0x250] sm:$0xff] %v1694_v37  ;;  %v683_v42 = vadd.f32 %v682_v39, %v1617_v55 }
 0x121   : > { %v526_v43 = vpop.f32.mrf.mxu0  ;;  %v686_v44 = vpop.f32.mrf.mxu1 }
 0x122   : > { %826 = vst [vmem:[%s1622_s30 + $0x58] sm:$0xff] %v523_v41  ;;  %v527_v45 = vadd.f32 %v526_v43, %v1615_v0  ;;  %890 = vst [vmem:[%s1622_s30 + $0x258] sm:$0xff] %v683_v42  ;;  %v1706_v46 = vadd.f32 %v686_v44, %v1615_v0 }
 0x123   : > { %v528_v47 = vpop.f32.mrf.mxu0  ;;  %v688_v48 = vpop.f32.mrf.mxu1 }
 0x124   : > { %827 = vst [vmem:[%s1622_s30 + $0x60] sm:$0xff] %v527_v45  ;;  %v945_v49 = vmax.f32 %v1652_v11, %v527_v45  ;;  %v529_v50 = vadd.f32 %v528_v47, %v1617_v55  ;;  %891 = vst [vmem:[%s1622_s30 + $0x260] sm:$0xff] %v1706_v46  ;;  %v689_v51 = vadd.f32 %v688_v48, %v1617_v55 }
 0x125   : > { %v530_v52 = vpop.f32.mrf.mxu0  ;;  %v690_v53 = vpop.f32.mrf.mxu1 }
 0x126   : > { %828 = vst [vmem:[%s1622_s30 + $0x68] sm:$0xff] %v529_v50  ;;  %v531_v54 = vadd.f32 %v530_v52, %v1615_v0  ;;  %892 = vst [vmem:[%s1622_s30 + $0x268] sm:$0xff] %v689_v51  ;;  %v1718_v56 = vadd.f32 %v690_v53, %v1615_v0 }
 0x127   : > { %v532_v57 = vpop.f32.mrf.mxu0  ;;  %v692_v58 = vpop.f32.mrf.mxu1 }
 0x128   : > { %829 = vst [vmem:[%s1622_s30 + $0x70] sm:$0xff] %v531_v54  ;;  %v946_v60 = vmax.f32 %v1666_v19, %v531_v54  ;;  %v533_v61 = vadd.f32 %v532_v57, %v1617_v55  ;;  %893 = vst [vmem:[%s1622_s30 + $0x270] sm:$0xff] %v1718_v56  ;;  %v693_v62 = vadd.f32 %v692_v58, %v1617_v55 }
 0x129   : > { %v536_v63 = vpop.f32.mrf.mxu0  ;;  %v696_v1 = vpop.f32.mrf.mxu1 }
 0x12a   : > { %830 = vst [vmem:[%s1622_s30 + $0x78] sm:$0xff] %v533_v61  ;;  %v537_v2 = vadd.f32 %v536_v63, %v1615_v0  ;;  %894 = vst [vmem:[%s1622_s30 + $0x278] sm:$0xff] %v693_v62  ;;  %v1730_v3 = vadd.f32 %v696_v1, %v1615_v0 }
 0x12b   : > { %v538_v5 = vpop.f32.mrf.mxu0  ;;  %v698_v6 = vpop.f32.mrf.mxu1 }
 0x12c   : > { %831 = vst [vmem:[%s1622_s30 + $0x80] sm:$0xff] %v537_v2  ;;  %v1733_v7 = vmax.f32 %v943_v31, %v537_v2  ;;  %v539_v8 = vadd.f32 %v538_v5, %v1617_v55  ;;  %895 = vst [vmem:[%s1622_s30 + $0x280] sm:$0xff] %v1730_v3  ;;  %v699_v9 = vadd.f32 %v698_v6, %v1617_v55 }
 0x12d   : > { %v540_v10 = vpop.f32.mrf.mxu0  ;;  %v700_v11 = vpop.f32.mrf.mxu1 }
 0x12e   : > { %832 = vst [vmem:[%s1622_s30 + $0x88] sm:$0xff] %v539_v8  ;;  %v541_v13 = vadd.f32 %v540_v10, %v1615_v0  ;;  %896 = vst [vmem:[%s1622_s30 + $0x288] sm:$0xff] %v699_v9  ;;  %v1743_v14 = vadd.f32 %v700_v11, %v1615_v0 }
 0x12f   : > { %v542_v15 = vpop.f32.mrf.mxu0  ;;  %v702_v16 = vpop.f32.mrf.mxu1 }
 0x130   : > { %833 = vst [vmem:[%s1622_s30 + $0x90] sm:$0xff] %v541_v13  ;;  %v1746_v17 = vmax.f32 %v944_v40, %v541_v13  ;;  %v543_v18 = vadd.f32 %v542_v15, %v1617_v55  ;;  %897 = vst [vmem:[%s1622_s30 + $0x290] sm:$0xff] %v1743_v14  ;;  %v703_v19 = vadd.f32 %v702_v16, %v1617_v55 }
 0x131   : > { %v546_v21 = vpop.f32.mrf.mxu0  ;;  %v706_v22 = vpop.f32.mrf.mxu1 }
 0x132   : > { %834 = vst [vmem:[%s1622_s30 + $0x98] sm:$0xff] %v543_v18  ;;  %v547_v23 = vadd.f32 %v546_v21, %v1615_v0  ;;  %898 = vst [vmem:[%s1622_s30 + $0x298] sm:$0xff] %v703_v19  ;;  %v1756_v24 = vadd.f32 %v706_v22, %v1615_v0  ;;  %v971_v18 = vmax.f32 %v1642_v4, %v1628_v59 }
 0x133   : > { %v548_v25 = vpop.f32.mrf.mxu0  ;;  %v708_v26 = vpop.f32.mrf.mxu1 }
 0x134   : > { %835 = vst [vmem:[%s1622_s30 + $0xa0] sm:$0xff] %v547_v23  ;;  %v1759_v27 = vmax.f32 %v945_v49, %v547_v23  ;;  %v549_v29 = vadd.f32 %v548_v25, %v1617_v55  ;;  %899 = vst [vmem:[%s1622_s30 + $0x2a0] sm:$0xff] %v1756_v24  ;;  %v709_v30 = vadd.f32 %v708_v26, %v1617_v55 }
 0x135   : > { %v550_v31 = vpop.f32.mrf.mxu0  ;;  %v710_v32 = vpop.f32.mrf.mxu1 }
 0x136   : > { %836 = vst [vmem:[%s1622_s30 + $0xa8] sm:$0xff] %v549_v29  ;;  %v551_v33 = vadd.f32 %v550_v31, %v1615_v0  ;;  %900 = vst [vmem:[%s1622_s30 + $0x2a8] sm:$0xff] %v709_v30  ;;  %v1769_v34 = vadd.f32 %v710_v32, %v1615_v0  ;;  %v975_v29 = vmax.f32 %v971_v18, %v1656_v12 }
 0x137   : > { %v552_v35 = vpop.f32.mrf.mxu0  ;;  %v712_v36 = vpop.f32.mrf.mxu1 }
 0x138   : > { %837 = vst [vmem:[%s1622_s30 + $0xb0] sm:$0xff] %v551_v33  ;;  %v1772_v38 = vmax.f32 %v946_v60, %v551_v33  ;;  %v553_v39 = vadd.f32 %v552_v35, %v1617_v55  ;;  %901 = vst [vmem:[%s1622_s30 + $0x2b0] sm:$0xff] %v1769_v34  ;;  %v713_v40 = vadd.f32 %v712_v36, %v1617_v55 }
 0x139   : > { %v556_v41 = vpop.f32.mrf.mxu0  ;;  %v716_v42 = vpop.f32.mrf.mxu1 }
 0x13a   : > { %838 = vst [vmem:[%s1622_s30 + $0xb8] sm:$0xff] %v553_v39  ;;  %v1780_v43 = vadd.f32 %v556_v41, %v1615_v0  ;;  %902 = vst [vmem:[%s1622_s30 + $0x2b8] sm:$0xff] %v713_v40  ;;  %v1784_v44 = vadd.f32 %v716_v42, %v1615_v0  ;;  %v979_v40 = vmax.f32 %v975_v29, %v1670_v20 }
 0x13b   : > { %v558_v45 = vpop.f32.mrf.mxu0  ;;  %v718_v47 = vpop.f32.mrf.mxu1 }
 0x13c   : > { %839 = vst [vmem:[%s1622_s30 + $0xc0] sm:$0xff] %v1780_v43  ;;  %v559_v48 = vadd.f32 %v558_v45, %v1617_v55  ;;  %903 = vst [vmem:[%s1622_s30 + $0x2c0] sm:$0xff] %v1784_v44  ;;  %v719_v49 = vadd.f32 %v718_v47, %v1617_v55 }
 0x13d   : > { %v560_v50 = vpop.f32.mrf.mxu0  ;;  %v720_v51 = vpop.f32.mrf.mxu1 }
 0x13e   : > { %840 = vst [vmem:[%s1622_s30 + $0xc8] sm:$0xff] %v559_v48  ;;  %v1794_v52 = vadd.f32 %v560_v50, %v1615_v0  ;;  %904 = vst [vmem:[%s1622_s30 + $0x2c8] sm:$0xff] %v719_v49  ;;  %v1798_v53 = vadd.f32 %v720_v51, %v1615_v0  ;;  %v972_v48 = vmax.f32 %v1682_v28, %v979_v40 }
 0x13f   : > { %v562_v54 = vpop.f32.mrf.mxu0  ;;  %v722_v57 = vpop.f32.mrf.mxu1 }
 0x140   : > { %841 = vst [vmem:[%s1622_s30 + $0xd0] sm:$0xff] %v1794_v52  ;;  %v563_v58 = vadd.f32 %v562_v54, %v1617_v55  ;;  %905 = vst [vmem:[%s1622_s30 + $0x2d0] sm:$0xff] %v1798_v53  ;;  %v723_v60 = vadd.f32 %v722_v57, %v1617_v55  ;;  %v976_v54 = vmax.f32 %v972_v48, %v1694_v37 }
 0x141   : > { %v566_v61 = vpop.f32.mrf.mxu0  ;;  %v726_v62 = vpop.f32.mrf.mxu1 }
 0x142   : > { %842 = vst [vmem:[%s1622_s30 + $0xd8] sm:$0xff] %v563_v58  ;;  %v1808_v63 = vadd.f32 %v566_v61, %v1615_v0  ;;  %906 = vst [vmem:[%s1622_s30 + $0x2d8] sm:$0xff] %v723_v60  ;;  %v1812_v1 = vadd.f32 %v726_v62, %v1615_v0  ;;  %v980_v61 = vmax.f32 %v976_v54, %v1706_v46 }
 0x143   : > { %v568_v2 = vpop.f32.mrf.mxu0  ;;  %v728_v5 = vpop.f32.mrf.mxu1 }
 0x144   : > { %843 = vst [vmem:[%s1622_s30 + $0xe0] sm:$0xff] %v1808_v63  ;;  %v569_v6 = vadd.f32 %v568_v2, %v1617_v55  ;;  %907 = vst [vmem:[%s1622_s30 + $0x2e0] sm:$0xff] %v1812_v1  ;;  %v729_v8 = vadd.f32 %v728_v5, %v1617_v55 }
 0x145   : > { %v570_v9 = vpop.f32.mrf.mxu0  ;;  %v730_v10 = vpop.f32.mrf.mxu1 }
 0x146   : > { %844 = vst [vmem:[%s1622_s30 + $0xe8] sm:$0xff] %v569_v6  ;;  %v1822_v11 = vadd.f32 %v570_v9, %v1615_v0  ;;  %908 = vst [vmem:[%s1622_s30 + $0x2e8] sm:$0xff] %v729_v8  ;;  %v1826_v13 = vadd.f32 %v730_v10, %v1615_v0  ;;  %v973_v6 = vmax.f32 %v1718_v56, %v980_v61 }
 0x147   : > { %v572_v15 = vpop.f32.mrf.mxu0  ;;  %v732_v16 = vpop.f32.mrf.mxu1 }
 0x148   : > { %845 = vst [vmem:[%s1622_s30 + $0xf0] sm:$0xff] %v1822_v11  ;;  %v573_v19 = vadd.f32 %v572_v15, %v1617_v55  ;;  %909 = vst [vmem:[%s1622_s30 + $0x2f0] sm:$0xff] %v1826_v13  ;;  %v733_v21 = vadd.f32 %v732_v16, %v1617_v55  ;;  %v977_v15 = vmax.f32 %v973_v6, %v1730_v3 }
 0x149   : > { %v576_v22 = vpop.f32.mrf.mxu0  ;;  %v736_v23 = vpop.f32.mrf.mxu1 }
 0x14a   : > { %846 = vst [vmem:[%s1622_s30 + $0xf8] sm:$0xff] %v573_v19  ;;  %v1838_v25 = vadd.f32 %v576_v22, %v1615_v0  ;;  %910 = vst [vmem:[%s1622_s30 + $0x2f8] sm:$0xff] %v733_v21  ;;  %v1842_v59 = vadd.f32 %v736_v23, %v1615_v0  ;;  %v981_v21 = vmax.f32 %v977_v15, %v1743_v14 }
 0x14b   : > { %v578_v4 = vpop.f32.mrf.mxu0  ;;  %v738_v26 = vpop.f32.mrf.mxu1 }
 0x14c   : > { %847 = vst [vmem:[%s1622_s30 + $0x100] sm:$0xff] %v1838_v25  ;;  %v579_v30 = vadd.f32 %v578_v4, %v1617_v55  ;;  %911 = vst [vmem:[%s1622_s30 + $0x300] sm:$0xff] %v1842_v59  ;;  %v739_v31 = vadd.f32 %v738_v26, %v1617_v55  ;;  %v983_v26 = vmax.f32 %v1756_v24, %v981_v21 }
 0x14d   : > { %v580_v32 = vpop.f32.mrf.mxu0  ;;  %v740_v33 = vpop.f32.mrf.mxu1 }
 0x14e   : > { %848 = vst [vmem:[%s1622_s30 + $0x108] sm:$0xff] %v579_v30  ;;  %v1853_v35 = vadd.f32 %v580_v32, %v1615_v0  ;;  %912 = vst [vmem:[%s1622_s30 + $0x308] sm:$0xff] %v739_v31  ;;  %v1857_v12 = vadd.f32 %v740_v33, %v1615_v0  ;;  %v987_v32 = vmax.f32 %v983_v26, %v1769_v34 }
 0x14f   : > { %v582_v36 = vpop.f32.mrf.mxu0  ;;  %v742_v39 = vpop.f32.mrf.mxu1 }
 0x150   : > { %849 = vst [vmem:[%s1622_s30 + $0x110] sm:$0xff] %v1853_v35  ;;  %v583_v41 = vadd.f32 %v582_v36, %v1617_v55  ;;  %913 = vst [vmem:[%s1622_s30 + $0x310] sm:$0xff] %v1857_v12  ;;  %v743_v42 = vadd.f32 %v742_v39, %v1617_v55  ;;  %v991_v40 = vmax.f32 %v987_v32, %v1784_v44 }
 0x151   : > { %v586_v45 = vpop.f32.mrf.mxu0  ;;  %v746_v47 = vpop.f32.mrf.mxu1 }
 0x152   : > { %850 = vst [vmem:[%s1622_s30 + $0x118] sm:$0xff] %v583_v41  ;;  %v1869_v49 = vadd.f32 %v586_v45, %v1615_v0  ;;  %914 = vst [vmem:[%s1622_s30 + $0x318] sm:$0xff] %v743_v42  ;;  %v1873_v20 = vadd.f32 %v746_v47, %v1615_v0  ;;  %v995_v47 = vmax.f32 %v991_v40, %v1798_v53 }
 0x153   : > { %v588_v50 = vpop.f32.mrf.mxu0  ;;  %v748_v51 = vpop.f32.mrf.mxu1 }
 0x154   : > { %851 = vst [vmem:[%s1622_s30 + $0x120] sm:$0xff] %v1869_v49  ;;  %v589_v57 = vadd.f32 %v588_v50, %v1617_v55  ;;  %915 = vst [vmem:[%s1622_s30 + $0x320] sm:$0xff] %v1873_v20  ;;  %v749_v28 = vadd.f32 %v748_v51, %v1617_v55  ;;  %v999_v54 = vmax.f32 %v995_v47, %v1812_v1 }
 0x155   : > { %v590_v58 = vpop.f32.mrf.mxu0  ;;  %v750_v60 = vpop.f32.mrf.mxu1 }
 0x156   : > { %852 = vst [vmem:[%s1622_s30 + $0x128] sm:$0xff] %v589_v57  ;;  %v1885_v62 = vadd.f32 %v590_v58, %v1615_v0  ;;  %916 = vst [vmem:[%s1622_s30 + $0x328] sm:$0xff] %v749_v28  ;;  %v1889_v37 = vadd.f32 %v750_v60, %v1615_v0  ;;  %v974_v60 = vmax.f32 %v1826_v13, %v999_v54 }
 0x157   : > { %v592_v2 = vpop.f32.mrf.mxu0  ;;  %v752_v5 = vpop.f32.mrf.mxu1 }
 0x158   : > { %853 = vst [vmem:[%s1622_s30 + $0x130] sm:$0xff] %v1885_v62  ;;  %v593_v8 = vadd.f32 %v592_v2, %v1617_v55  ;;  %917 = vst [vmem:[%s1622_s30 + $0x330] sm:$0xff] %v1889_v37  ;;  %v753_v46 = vadd.f32 %v752_v5, %v1617_v55  ;;  %v978_v6 = vmax.f32 %v974_v60, %v1842_v59 }
 0x159   : > { %v596_v9 = vpop.f32.mrf.mxu0  ;;  %v756_v10 = vpop.f32.mrf.mxu1 }
 0x15a   : > { %854 = vst [vmem:[%s1622_s30 + $0x138] sm:$0xff] %v593_v8  ;;  %v1901_v16 = vadd.f32 %v596_v9, %v1615_v0  ;;  %918 = vst [vmem:[%s1622_s30 + $0x338] sm:$0xff] %v753_v46  ;;  %v1905_v56 = vadd.f32 %v756_v10, %v1615_v0  ;;  %v982_v10 = vmax.f32 %v978_v6, %v1857_v12 }
 0x15b   : > { %v598_v18 = vpop.f32.mrf.mxu0  ;;  %v758_v19 = vpop.f32.mrf.mxu1 }
 0x15c   : > { %855 = vst [vmem:[%s1622_s30 + $0x140] sm:$0xff] %v1901_v16  ;;  %v599_v22 = vadd.f32 %v598_v18, %v1617_v55  ;;  %919 = vst [vmem:[%s1622_s30 + $0x340] sm:$0xff] %v1905_v56  ;;  %v759_v3 = vadd.f32 %v758_v19, %v1617_v55  ;;  %v984_v21 = vmax.f32 %v1873_v20, %v982_v10 }
 0x15d   : > { %v600_v23 = vpop.f32.mrf.mxu0  ;;  %v760_v4 = vpop.f32.mrf.mxu1 }
 0x15e   : > { %856 = vst [vmem:[%s1622_s30 + $0x148] sm:$0xff] %v599_v22  ;;  %v1917_v29 = vadd.f32 %v600_v23, %v1615_v0  ;;  %920 = vst [vmem:[%s1622_s30 + $0x348] sm:$0xff] %v759_v3  ;;  %v1921_v14 = vadd.f32 %v760_v4, %v1615_v0  ;;  %v988_v4 = vmax.f32 %v984_v21, %v1889_v37 }
 0x15f   : > { %v602_v30 = vpop.f32.mrf.mxu0  ;;  %v762_v31 = vpop.f32.mrf.mxu1 }
 0x160   : > { %857 = vst [vmem:[%s1622_s30 + $0x150] sm:$0xff] %v1917_v29  ;;  %v603_v33 = vadd.f32 %v602_v30, %v1617_v55  ;;  %921 = vst [vmem:[%s1622_s30 + $0x350] sm:$0xff] %v1921_v14  ;;  %v763_v24 = vadd.f32 %v762_v31, %v1617_v55  ;;  %v992_v32 = vmax.f32 %v988_v4, %v1905_v56 }
 0x161   : > { %v606_v36 = vpop.f32.mrf.mxu0  ;;  %v766_v39 = vpop.f32.mrf.mxu1 }
 0x162   : > { %858 = vst [vmem:[%s1622_s30 + $0x158] sm:$0xff] %v603_v33  ;;  %v1933_v41 = vadd.f32 %v606_v36, %v1615_v0  ;;  %922 = vst [vmem:[%s1622_s30 + $0x358] sm:$0xff] %v763_v24  ;;  %v1937_v34 = vadd.f32 %v766_v39, %v1615_v0  ;;  %v951_v39 = vmax.f32 %v1733_v7, %v1780_v43 }
 0x163   : > { %v608_v42 = vpop.f32.mrf.mxu0  ;;  %v768_v45 = vpop.f32.mrf.mxu1  ;;  %v996_v40 = vmax.f32 %v992_v32, %v1921_v14  ;;  %v952_v14 = vmax.f32 %v1746_v17, %v1794_v52 }
 0x164   : > { %859 = vst [vmem:[%s1622_s30 + $0x160] sm:$0xff] %v1933_v41  ;;  %v609_v48 = vadd.f32 %v608_v42, %v1617_v55  ;;  %923 = vst [vmem:[%s1622_s30 + $0x360] sm:$0xff] %v1937_v34  ;;  %v769_v44 = vadd.f32 %v768_v45, %v1617_v55 }
 0x165   : > { %v610_v50 = vpop.f32.mrf.mxu0  ;;  %v770_v51 = vpop.f32.mrf.mxu1 }
 0x166   : > { %860 = vst [vmem:[%s1622_s30 + $0x168] sm:$0xff] %v609_v48  ;;  %v1949_v57 = vadd.f32 %v610_v50, %v1615_v0  ;;  %924 = vst [vmem:[%s1622_s30 + $0x368] sm:$0xff] %v769_v44  ;;  %v1953_v53 = vadd.f32 %v770_v51, %v1615_v0  ;;  %v955_v48 = vmax.f32 %v951_v39, %v1838_v25 }
 0x167   : > { %v612_v28 = vpop.f32.mrf.mxu0  ;;  %v772_v58 = vpop.f32.mrf.mxu1  ;;  %v1000_v44 = vmax.f32 %v996_v40, %v1937_v34 }
 0x168   : > { %861 = vst [vmem:[%s1622_s30 + $0x170] sm:$0xff] %v1949_v57  ;;  %v613_v61 = vadd.f32 %v612_v28, %v1617_v55  ;;  %925 = vst [vmem:[%s1622_s30 + $0x370] sm:$0xff] %v1953_v53  ;;  %v773_v1 = vadd.f32 %v772_v58, %v1617_v55  ;;  %v959_v54 = vmax.f32 %v955_v48, %v1901_v16 }
 0x169   : > { %v616_v2 = vpop.f32.mrf.mxu0  ;;  %v776_v5 = vpop.f32.mrf.mxu1  ;;  %v1003_v25 = vmax.f32 %v1953_v53, %v1000_v44  ;;  %v956_v58 = vmax.f32 %v952_v14, %v1853_v35 }
 0x16a   : > { %862 = vst [vmem:[%s1622_s30 + $0x178] sm:$0xff] %v613_v61  ;;  %v617_v8 = vadd.f32 %v616_v2, %v1615_v0  ;;  %926 = vst [vmem:[%s1622_s30 + $0x378] sm:$0xff] %v773_v1  ;;  %v777_v13 = vadd.f32 %v776_v5, %v1615_v0  ;;  %v953_v1 = vmax.f32 %v1759_v27, %v1808_v63 }
 0x16b   : > { %v618_v46 = vpop.f32.mrf.mxu0  ;;  %v778_v9 = vpop.f32.mrf.mxu1  ;;  %v960_v2 = vmax.f32 %v956_v58, %v1917_v29 }
 0x16c   : > { %863 = vst [vmem:[%s1622_s30 + $0x180] sm:$0xff] %v617_v8  ;;  %v619_v15 = vadd.f32 %v618_v46, %v1617_v55  ;;  %927 = vst [vmem:[%s1622_s30 + $0x380] sm:$0xff] %v777_v13  ;;  %v779_v18 = vadd.f32 %v778_v9, %v1617_v55  ;;  %v963_v52 = vmax.f32 %v959_v54, %v617_v8 }
 0x16d   : > { %v620_v59 = vpop.f32.mrf.mxu0  ;;  %v780_v19 = vpop.f32.mrf.mxu1  ;;  %v985_v61 = vmax.f32 %v777_v13, %v1003_v25  ;;  %v957_v9 = vmax.f32 %v953_v1, %v1869_v49 }
 0x16e   : > { %864 = vst [vmem:[%s1622_s30 + $0x188] sm:$0xff] %v619_v15  ;;  %v1975_v22 = vadd.f32 %v620_v59, %v1615_v0  ;;  %928 = vst [vmem:[%s1622_s30 + $0x388] sm:$0xff] %v779_v18  ;;  %v1979_v12 = vadd.f32 %v780_v19, %v1615_v0  ;;  %v954_v59 = vmax.f32 %v1772_v38, %v1822_v11 }
 0x16f   : > { %v622_v3 = vpop.f32.mrf.mxu0  ;;  %v782_v23 = vpop.f32.mrf.mxu1  ;;  %v961_v19 = vmax.f32 %v957_v9, %v1933_v41 }
 0x170   : > { %865 = vst [vmem:[%s1622_s30 + $0x190] sm:$0xff] %v1975_v22  ;;  %v623_v26 = vadd.f32 %v622_v3, %v1617_v55  ;;  %929 = vst [vmem:[%s1622_s30 + $0x390] sm:$0xff] %v1979_v12  ;;  %v783_v20 = vadd.f32 %v782_v23, %v1617_v55  ;;  %v989_v6 = vmax.f32 %v985_v61, %v1979_v12 }
 0x171   : > { %v626_v30 = vpop.f32.mrf.mxu0  ;;  %v786_v31 = vpop.f32.mrf.mxu1  ;;  %v964_v63 = vmax.f32 %v960_v2, %v1975_v22  ;;  %v958_v4 = vmax.f32 %v954_v59, %v1885_v62 }
 0x172   : > { %866 = vst [vmem:[%s1622_s30 + $0x198] sm:$0xff] %v623_v26  ;;  %v1991_v33 = vadd.f32 %v626_v30, %v1615_v0  ;;  %930 = vst [vmem:[%s1622_s30 + $0x398] sm:$0xff] %v783_v20  ;;  %v1995_v37 = vadd.f32 %v786_v31, %v1615_v0 }
 0x173   : > { %v628_v24 = vpop.f32.mrf.mxu0  ;;  %v788_v36 = vpop.f32.mrf.mxu1  ;;  %v962_v31 = vmax.f32 %v958_v4, %v1949_v57 }
 0x174   : > { %867 = vst [vmem:[%s1622_s30 + $0x1a0] sm:$0xff] %v1991_v33  ;;  %v629_v56 = vadd.f32 %v628_v24, %v1617_v55  ;;  %931 = vst [vmem:[%s1622_s30 + $0x3a0] sm:$0xff] %v1995_v37  ;;  %v789_v42 = vadd.f32 %v788_v36, %v1617_v55  ;;  %v965_v11 = vmax.f32 %v961_v19, %v1991_v33 }
 0x175   : > { %v630_v45 = vpop.f32.mrf.mxu0  ;;  %v790_v47 = vpop.f32.mrf.mxu1 }
 0x176   : > { %868 = vst [vmem:[%s1622_s30 + $0x1a8] sm:$0xff] %v629_v56  ;;  %v2010_v7 = vadd.f32 %v630_v45, %v1615_v0  ;;  %932 = vst [vmem:[%s1622_s30 + $0x3a8] sm:$0xff] %v789_v42  ;;  %v2014_v43 = vadd.f32 %v790_v47, %v1615_v0 }
 0x177   : > { %v632_v50 = vpop.f32.mrf.mxu0  ;;  %v792_v51 = vpop.f32.mrf.mxu1 }
 0x178   : > { %869 = vst [vmem:[%s1622_s30 + $0x1b0] sm:$0xff] %v2010_v7  ;;  %v633_v34 = vadd.f32 %v632_v50, %v1617_v55  ;;  %933 = vst [vmem:[%s1622_s30 + $0x3b0] sm:$0xff] %v2014_v43  ;;  %v793_v28 = vadd.f32 %v792_v51, %v1617_v55  ;;  %v966_v56 = vmax.f32 %v962_v31, %v2010_v7 }
 0x179   : > { %v636_v60 = vpop.f32.mrf.mxu0  ;;  %v796_v17 = vpop.f32.mrf.mxu1 }
 0x17a   : > { %870 = vst [vmem:[%s1622_s30 + $0x1b8] sm:$0xff] %v633_v34  ;;  %v637_v16 = vadd.f32 %v636_v60, %v1615_v0  ;;  %934 = vst [vmem:[%s1622_s30 + $0x3b8] sm:$0xff] %v793_v28  ;;  %v2031_v53 = vadd.f32 %v796_v17, %v1615_v0 }
 0x17b   : > { %v638_v35 = vpop.f32.mrf.mxu0  ;;  %v798_v5 = vpop.f32.mrf.mxu1 }
 0x17c   : > { %871 = vst [vmem:[%s1622_s30 + $0x1c0] sm:$0xff] %v637_v16  ;;  %v967_v8 = vmax.f32 %v963_v52, %v637_v16  ;;  %v639_v13 = vadd.f32 %v638_v35, %v1617_v55  ;;  %935 = vst [vmem:[%s1622_s30 + $0x3c0] sm:$0xff] %v2031_v53  ;;  %v799_v46 = vadd.f32 %v798_v5, %v1617_v55 }
 0x17d   : > { %v640_v10 = vpop.f32.mrf.mxu0  ;;  %v800_v27 = vpop.f32.mrf.mxu1 }
 0x17e   : > { %v993_v29 = vmax.f32 %v989_v6, %v967_v8  ;;  %872 = vst [vmem:[%s1622_s30 + $0x1c8] sm:$0xff] %v639_v13  ;;  %v641_v15 = vadd.f32 %v640_v10, %v1615_v0  ;;  %936 = vst [vmem:[%s1622_s30 + $0x3c8] sm:$0xff] %v799_v46  ;;  %v801_v18 = vadd.f32 %v800_v27, %v1615_v0 }
 0x17f   : > { %v642_v49 = vpop.f32.mrf.mxu0  ;;  %v802_v21 = vpop.f32.mrf.mxu1 }
 0x180   : > { %v997_v12 = vmax.f32 %v993_v29, %v1995_v37  ;;  %873 = vst [vmem:[%s1622_s30 + $0x1d0] sm:$0xff] %v641_v15  ;;  %v968_v22 = vmax.f32 %v964_v63, %v641_v15  ;;  %v643_v3 = vadd.f32 %v642_v49, %v1617_v55  ;;  %937 = vst [vmem:[%s1622_s30 + $0x3d0] sm:$0xff] %v801_v18 }
 0x181   : > { %v803_v23 = vadd.f32 %v802_v21, %v1617_v55  ;;  %v646_v26 = vpop.f32.mrf.mxu0  ;;  %v806_v38 = vpop.f32.mrf.mxu1 }
 0x182   : > { %v1001_v41 = vmax.f32 %v997_v12, %v968_v22  ;;  %874 = vst [vmem:[%s1622_s30 + $0x1d8] sm:$0xff] %v643_v3  ;;  %v647_v20 = vadd.f32 %v646_v26, %v1615_v0  ;;  %v807_v30 = vadd.f32 %v806_v38, %v1615_v0 }
 0x183   : > { %938 = vst [vmem:[%s1622_s30 + $0x3d8] sm:$0xff] %v803_v23  ;;  %v648_v32 = vpop.f32.mrf.mxu0  ;;  %v808_v37 = vpop.f32.mrf.mxu1 }
 0x184   : > { %v986_v62 = vmax.f32 %v2014_v43, %v1001_v41  ;;  %875 = vst [vmem:[%s1622_s30 + $0x1e0] sm:$0xff] %v647_v20  ;;  %v969_v24 = vmax.f32 %v965_v11, %v647_v20  ;;  %v649_v33 = vadd.f32 %v648_v32, %v1617_v55  ;;  %939 = vst [vmem:[%s1622_s30 + $0x3e0] sm:$0xff] %v807_v30 }
 0x185   : > { %v809_v36 = vadd.f32 %v808_v37, %v1617_v55  ;;  %v650_v39 = vpop.f32.mrf.mxu0  ;;  %v810_v40 = vpop.f32.mrf.mxu1 }
 0x186   : > { %v990_v57 = vmax.f32 %v986_v62, %v969_v24  ;;  %876 = vst [vmem:[%s1622_s30 + $0x1e8] sm:$0xff] %v649_v33  ;;  %v651_v42 = vadd.f32 %v650_v39, %v1615_v0  ;;  %v811_v45 = vadd.f32 %v810_v40, %v1615_v0 }
 0x187   : > { %940 = vst [vmem:[%s1622_s30 + $0x3e8] sm:$0xff] %v809_v36  ;;  %v652_v47 = vpop.f32.mrf.mxu0  ;;  %v812_v48 = vpop.f32.mrf.mxu1 }
 0x188   : > { %v994_v44 = vmax.f32 %v990_v57, %v2031_v53  ;;  %877 = vst [vmem:[%s1622_s30 + $0x1f0] sm:$0xff] %v651_v42  ;;  %v970_v43 = vmax.f32 %v966_v56, %v651_v42  ;;  %v653_v14 = vadd.f32 %v652_v47, %v1617_v55  ;;  %941 = vst [vmem:[%s1622_s30 + $0x3f0] sm:$0xff] %v811_v45 }
 0x189   : > { %v813_v7 = vadd.f32 %v812_v48, %v1617_v55 }
 0x18a   : > { %v998_v50 = vmax.f32 %v994_v44, %v970_v43  ;;  %878 = vst [vmem:[%s1622_s30 + $0x1f8] sm:$0xff] %v653_v14 }
 0x18b   : > { %942 = vst [vmem:[%s1622_s30 + $0x3f8] sm:$0xff] %v813_v7 }
 0x18c   : > { %v1002_v51 = vmax.f32 %v998_v50, %v801_v18 }
 0x18e   : > { %v1004_v54 = vmax.f32 %v807_v30, %v1002_v51 }
 0x190   : > { %v1005_v25 = vmax.f32 %v811_v45, %v1004_v54 }
 0x192   : > { %v1006_v34 = vrot.slane %v1005_v25, 4 }
 0x194   : > { %v1007_v0 = vmax.f32 %v1005_v25, %v1006_v34 }
 0x196   : > { %v1008_v28 = vrot.slane %v1007_v0, 2 }
 0x198   : > { %v1009_v58 = vmax.f32 %v1007_v0, %v1008_v28 }
 0x19a   : > { %v1010_v60 = vrot.slane %v1009_v58, 1 }
 0x19c   : > { %v1011_v17 = vmax.f32 %v1009_v58, %v1010_v60 }
 0x19e   : > { %1016 = vst [vmem:[%s256_s7] sm:$0x1] %v1011_v17 }
 0x19f PF: > { %s18_s20 = sadd.s32 1, %s1357_s20   ;;  %s2110_s15 = smov %s1341_s16 }
 0x1a0   : > { %p15_p8 = scmp.ge.s32.totalorder %s18_s20, 4   ;;  %s2111_s16 = smov %s1345_s17 }
 0x1a1   : > { %s2112_s17 = smov %s1437_s27  ;;  %s2113_s18 = smov %s1353_s19 }
 0x1a2   : > { %s2114_s19 = smov %s2116_s22  ;;  %17 = sbr.rel (!%p15_p8) target bundleno = 4 (0x4), region = 92 }
 0x1a7   :  { %1068 = vsyncpa [#allocation3], 1 }
 0x1a8   :  { %1070 = vsyncpa [#allocation3 + $0x1], 1 }

// kernel: aft_full.4
= control target key start
LH: loop header
LB: loop body
LE: loop exit
PB: predicated region body
PF: predicated region fallthrough
CT: control target
= control target key end

     0   :  { %s1799_s9 = smov 0   ;;  %s1801_s10 = smov 0   ;;  %s2486_s0 = inlined_call_operand.vmem [shape: f32[2,512,256], index: 0, kind: input, shape index: {}]   ;;  %s2487_s1 = inlined_call_operand.vmem [shape: f32[2,1,128], index: 1, kind: input, shape index: {}]   ;;  %s2488_s2 = inlined_call_operand.vmem [shape: bf16[2,512,256], index: 2, kind: output, shape index: {}]  }
   0x1   :  { %s1803_s11 = smov 0  }
   0x2 LB: > { %s24_s12 = sadd.s32 1, %s1778_s10  ;;  %p1342_p0 = scmp.ge.s32.totalorder %s1782_s11, 1  ;;  %s1782_s11 = sphi %s1803_s11, %s12_s11   ;;  %s1778_s10 = sphi %s1801_s10, %s2505_s10   ;;  %s1774_s9 = sphi %s1799_s9, %s2504_s9  }
   0x3   : > { %p26_p1 = scmp.ge.s32.totalorder %s24_s12, 2  ;;  %p142_p2 = scmp.lt.s32.totalorder %s1782_s11, 3 }
   0x5   : > { %s2507_s12 = smov (%p26_p1, %s24_s12), 0  ;;  %p143_p3 = pnand %p1342_p0, %p142_p2 }
   0x7   : > { %146 = sbr.rel (%p143_p3) target bundleno = 133 (0x85), region = 28 }
   0xc   : > { %p178_p4 = scmp.lt.s32.totalorder %s1774_s9, 1 }
   0xe   : > { %s2509_s9 = smov (!%p178_p4, %s1774_s9), 1 }
   0xf   : > { %s1478_s13 = sshll.u32 %s2509_s9, 10  ;;  %s190_s16 = scalar_lea.vmem %s2487_s1, %s2509_s9 }
  0x10   : > { %s1827_s19 = scalar_lea.vmem %s2486_s0, %s1478_s13  ;;  %v1829_v0 = vld [vmem:[%s190_s16] ss:$0 sm:$0xff]  ;;  %s1479_s20 = sshll.u32 %s2509_s9, 9 }
  0x11   : > { %v202_v1 = vld [vmem:[%s1827_s19] sm:$0xff]  ;;  %v204_v2 = vld [vmem:[%s1827_s19 + $0x10] sm:$0xff]  ;;  %v203_v60 = vld [vmem:[%s1827_s19 + $0x8] sm:$0xff]  ;;  %s1897_s23 = scalar_lea.vmem %s2488_s2, %s1479_s20 }
  0x12   : > { %v337_v3 = vsub.f32 %v202_v1, %v1829_v0  ;;  %v338_v4 = vsub.f32 %v204_v2, %v1829_v0  ;;  %v206_v5 = vld [vmem:[%s1827_s19 + $0x20] sm:$0xff]  ;;  %v208_v7 = vld [vmem:[%s1827_s19 + $0x30] sm:$0xff]  ;;  %v205_v61 = vld [vmem:[%s1827_s19 + $0x18] sm:$0xff] }
  0x13   : > { %v339_v6 = vsub.f32 %v206_v5, %v1829_v0  ;;  %v210_v8 = vld [vmem:[%s1827_s19 + $0x40] sm:$0xff]  ;;  %v340_v11 = vsub.f32 %v208_v7, %v1829_v0  ;;  %v212_v13 = vld [vmem:[%s1827_s19 + $0x50] sm:$0xff] }
  0x14   : > { %v401_v9 = vmul.f32 1.442695, %v337_v3  ;;  %v403_v10 = vmul.f32 1.442695, %v338_v4  ;;  %v341_v12 = vsub.f32 %v210_v8, %v1829_v0  ;;  %v342_v15 = vsub.f32 %v212_v13, %v1829_v0  ;;  %v214_v16 = vld [vmem:[%s1827_s19 + $0x60] sm:$0xff]  ;;  %v216_v20 = vld [vmem:[%s1827_s19 + $0x70] sm:$0xff] }
  0x15   : > { %v405_v14 = vmul.f32 1.442695, %v339_v6  ;;  %v407_v17 = vmul.f32 1.442695, %v340_v11  ;;  %v343_v19 = vsub.f32 %v214_v16, %v1829_v0  ;;  %v344_v22 = vsub.f32 %v216_v20, %v1829_v0  ;;  %v218_v23 = vld [vmem:[%s1827_s19 + $0x80] sm:$0xff]  ;;  %v220_v24 = vld [vmem:[%s1827_s19 + $0x90] sm:$0xff] }
  0x16   : > { %1632 = vpow2.f32 %v401_v9  ;;  %v409_v18 = vmul.f32 1.442695, %v341_v12  ;;  %v411_v21 = vmul.f32 1.442695, %v342_v15  ;;  %v345_v26 = vsub.f32 %v218_v23, %v1829_v0  ;;  %v222_v28 = vld [vmem:[%s1827_s19 + $0xa0] sm:$0xff]  ;;  %v224_v31 = vld [vmem:[%s1827_s19 + $0xb0] sm:$0xff] }
  0x17   : > { %1634 = vpow2.f32 %v403_v10  ;;  %v413_v25 = vmul.f32 1.442695, %v343_v19  ;;  %v346_v27 = vsub.f32 %v220_v24, %v1829_v0  ;;  %v415_v29 = vmul.f32 1.442695, %v344_v22  ;;  %v226_v32 = vld [vmem:[%s1827_s19 + $0xc0] sm:$0xff]  ;;  %v228_v35 = vld [vmem:[%s1827_s19 + $0xd0] sm:$0xff] }
  0x18   : > { %1636 = vpow2.f32 %v405_v14  ;;  %v347_v30 = vsub.f32 %v222_v28, %v1829_v0  ;;  %v417_v33 = vmul.f32 1.442695, %v345_v26  ;;  %v348_v34 = vsub.f32 %v224_v31, %v1829_v0  ;;  %v230_v39 = vld [vmem:[%s1827_s19 + $0xe0] sm:$0xff]  ;;  %v232_v42 = vld [vmem:[%s1827_s19 + $0xf0] sm:$0xff]  ;;  %v207_v9 = vld [vmem:[%s1827_s19 + $0x28] sm:$0xff] }
  0x19   : > { %1638 = vpow2.f32 %v407_v17  ;;  %v419_v36 = vmul.f32 1.442695, %v346_v27  ;;  %v349_v37 = vsub.f32 %v226_v32, %v1829_v0  ;;  %v350_v38 = vsub.f32 %v228_v35, %v1829_v0  ;;  %v234_v43 = vld [vmem:[%s1827_s19 + $0x100] sm:$0xff]  ;;  %v236_v46 = vld [vmem:[%s1827_s19 + $0x110] sm:$0xff]  ;;  %v209_v16 = vld [vmem:[%s1827_s19 + $0x38] sm:$0xff] }
  0x1a   : > { %1640 = vpow2.f32 %v409_v18  ;;  %v421_v40 = vmul.f32 1.442695, %v347_v30  ;;  %v351_v41 = vsub.f32 %v230_v39, %v1829_v0  ;;  %v423_v44 = vmul.f32 1.442695, %v348_v34  ;;  %v238_v50 = vld [vmem:[%s1827_s19 + $0x120] sm:$0xff]  ;;  %v240_v54 = vld [vmem:[%s1827_s19 + $0x130] sm:$0xff] }
  0x1b   : > { %1642 = vpow2.f32 %v411_v21  ;;  %v352_v45 = vsub.f32 %v232_v42, %v1829_v0  ;;  %v425_v47 = vmul.f32 1.442695, %v349_v37  ;;  %v353_v48 = vsub.f32 %v234_v43, %v1829_v0  ;;  %v242_v55 = vld [vmem:[%s1827_s19 + $0x140] sm:$0xff]  ;;  %v244_v59 = vld [vmem:[%s1827_s19 + $0x150] sm:$0xff]  ;;  %v211_v21 = vld [vmem:[%s1827_s19 + $0x48] sm:$0xff] }
  0x1c   : > { %1644 = vpow2.f32 %v413_v25  ;;  %v354_v49 = vsub.f32 %v236_v46, %v1829_v0  ;;  %v427_v51 = vmul.f32 1.442695, %v350_v38  ;;  %v429_v52 = vmul.f32 1.442695, %v351_v41  ;;  %v246_v2 = vld [vmem:[%s1827_s19 + $0x160] sm:$0xff]  ;;  %v248_v6 = vld [vmem:[%s1827_s19 + $0x170] sm:$0xff] }
  0x1d   : > { %1646 = vpow2.f32 %v415_v29  ;;  %v355_v53 = vsub.f32 %v238_v50, %v1829_v0  ;;  %v431_v56 = vmul.f32 1.442695, %v352_v45  ;;  %v433_v57 = vmul.f32 1.442695, %v353_v48  ;;  %v250_v7 = vld [vmem:[%s1827_s19 + $0x180] sm:$0xff]  ;;  %v252_v13 = vld [vmem:[%s1827_s19 + $0x190] sm:$0xff] }
  0x1e   : > { %1648 = vpow2.f32 %v417_v33  ;;  %v356_v58 = vsub.f32 %v240_v54, %v1829_v0  ;;  %v435_v62 = vmul.f32 1.442695, %v354_v49  ;;  %v357_v63 = vsub.f32 %v242_v55, %v1829_v0  ;;  %v254_v24 = vld [vmem:[%s1827_s19 + $0x1a0] sm:$0xff]  ;;  %v213_v28 = vld [vmem:[%s1827_s19 + $0x58] sm:$0xff]  ;;  %v256_v30 = vld [vmem:[%s1827_s19 + $0x1b0] sm:$0xff] }
  0x1f   : > { %1650 = vpow2.f32 %v419_v36  ;;  %v358_v1 = vsub.f32 %v244_v59, %v1829_v0  ;;  %v437_v3 = vmul.f32 1.442695, %v355_v53  ;;  %v359_v5 = vsub.f32 %v246_v2, %v1829_v0  ;;  %v215_v34 = vld [vmem:[%s1827_s19 + $0x68] sm:$0xff]  ;;  %v217_v39 = vld [vmem:[%s1827_s19 + $0x78] sm:$0xff]  ;;  %v258_v46 = vld [vmem:[%s1827_s19 + $0x1c0] sm:$0xff] }
  0x20   : > { %1652 = vpow2.f32 %v421_v40  ;;  %v439_v4 = vmul.f32 1.442695, %v356_v58  ;;  %v441_v10 = vmul.f32 1.442695, %v357_v63  ;;  %v360_v12 = vsub.f32 %v248_v6, %v1829_v0  ;;  %v221_v50 = vld [vmem:[%s1827_s19 + $0x98] sm:$0xff] }
  0x21   : > { %1654 = vpow2.f32 %v423_v44  ;;  %v443_v11 = vmul.f32 1.442695, %v358_v1  ;;  %v445_v17 = vmul.f32 1.442695, %v359_v5  ;;  %v361_v18 = vsub.f32 %v250_v7, %v1829_v0  ;;  %v219_v44 = vld [vmem:[%s1827_s19 + $0x88] sm:$0xff]  ;;  %v262_v5 = vld [vmem:[%s1827_s19 + $0x1e0] sm:$0xff] }
  0x22   : > { %1656 = vpow2.f32 %v425_v47  ;;  %v447_v22 = vmul.f32 1.442695, %v360_v12  ;;  %v362_v23 = vsub.f32 %v252_v13, %v1829_v0  ;;  %v363_v40 = vsub.f32 %v254_v24, %v1829_v0  ;;  %v264_v12 = vld [vmem:[%s1827_s19 + $0x1f0] sm:$0xff] }
  0x23   : > { %v1882_v8 = vpop.eup %1632  ;;  %1658 = vpow2.f32 %v427_v51  ;;  %v449_v29 = vmul.f32 1.442695, %v361_v18  ;;  %v364_v45 = vsub.f32 %v256_v30, %v1829_v0  ;;  %v367_v24 = vsub.f32 %v262_v5, %v1829_v0 }
  0x24   : > { %v1887_v14 = vpop.eup %1634  ;;  %v529_v15 = vmul.f32 %v1882_v8, %v203_v60  ;;  %1660 = vpow2.f32 %v429_v52  ;;  %v451_v35 = vmul.f32 1.442695, %v362_v23  ;;  %v453_v51 = vmul.f32 1.442695, %v363_v40  ;;  %v260_v52 = vld [vmem:[%s1827_s19 + $0x1d0] sm:$0xff]  ;;  %v233_v23 = vld [vmem:[%s1827_s19 + $0xf8] sm:$0xff] }
  0x25   : > { %v1892_v19 = vpop.eup %1636  ;;  %v530_v20 = vmul.f32 %v1887_v14, %v205_v61  ;;  %1662 = vpow2.f32 %v431_v56  ;;  %v223_v56 = vld [vmem:[%s1827_s19 + $0xa8] sm:$0xff]  ;;  %v225_v61 = vld [vmem:[%s1827_s19 + $0xb8] sm:$0xff]  ;;  %v368_v30 = vsub.f32 %v264_v12, %v1829_v0 }
  0x26   : > { %v1903_v25 = vpop.eup %1638  ;;  %v1480_v26 = vpack.c.bf16 %v529_v15, %v529_v15  ;;  %v531_v27 = vmul.f32 %v1892_v19, %v207_v9  ;;  %1664 = vpow2.f32 %v433_v57  ;;  %v455_v57 = vmul.f32 1.442695, %v364_v45 }
  0x27   : > { %v1908_v31 = vpop.eup %1640  ;;  %v1481_v32 = vpack.c.bf16 %v530_v20, %v530_v20  ;;  %v532_v33 = vmul.f32 %v1903_v25, %v209_v16  ;;  %1666 = vpow2.f32 %v435_v62  ;;  %v365_v62 = vsub.f32 %v258_v46, %v1829_v0  ;;  %v270_v46 = vld [vmem:[%s1827_s19 + $0x220] sm:$0xff] }
  0x28   : > { %v1912_v36 = vpop.eup %1642  ;;  %849 = vst [vmem:[%s1897_s23] sm:$0xf] %v1480_v26  ;;  %v1482_v37 = vpack.c.bf16 %v531_v27, %v531_v27  ;;  %v533_v38 = vmul.f32 %v1908_v31, %v211_v21  ;;  %1668 = vpow2.f32 %v437_v3  ;;  %v227_v3 = vld [vmem:[%s1827_s19 + $0xc8] sm:$0xff]  ;;  %v463_v45 = vmul.f32 1.442695, %v368_v30 }
  0x29   : > { %v1918_v41 = vpop.eup %1644  ;;  %850 = vst [vmem:[%s1897_s23 + $0x8] sm:$0xf] %v1481_v32  ;;  %v1483_v42 = vpack.c.bf16 %v532_v33, %v532_v33  ;;  %v534_v43 = vmul.f32 %v1912_v36, %v213_v28  ;;  %1670 = vpow2.f32 %v439_v4  ;;  %v366_v4 = vsub.f32 %v260_v52, %v1829_v0  ;;  %v266_v32 = vld [vmem:[%s1827_s19 + $0x200] sm:$0xff] }
  0x2a   : > { %v1925_v47 = vpop.eup %1646  ;;  %851 = vst [vmem:[%s1897_s23 + $0x10] sm:$0xf] %v1482_v37  ;;  %v1484_v48 = vpack.c.bf16 %v533_v38, %v533_v38  ;;  %v535_v49 = vmul.f32 %v1918_v41, %v215_v34  ;;  %1672 = vpow2.f32 %v441_v10  ;;  %v229_v10 = vld [vmem:[%s1827_s19 + $0xd8] sm:$0xff]  ;;  %v461_v38 = vmul.f32 1.442695, %v367_v24 }
  0x2b   : > { %v1931_v53 = vpop.eup %1648  ;;  %852 = vst [vmem:[%s1897_s23 + $0x18] sm:$0xf] %v1483_v42  ;;  %v1485_v54 = vpack.c.bf16 %v534_v43, %v534_v43  ;;  %v536_v55 = vmul.f32 %v1925_v47, %v217_v39  ;;  %1674 = vpow2.f32 %v443_v11  ;;  %v457_v11 = vmul.f32 1.442695, %v365_v62  ;;  %v237_v37 = vld [vmem:[%s1827_s19 + $0x118] sm:$0xff]  ;;  %v268_v39 = vld [vmem:[%s1827_s19 + $0x210] sm:$0xff] }
  0x2c   : > { %v1936_v58 = vpop.eup %1650  ;;  %853 = vst [vmem:[%s1897_s23 + $0x20] sm:$0xf] %v1484_v48  ;;  %v1486_v59 = vpack.c.bf16 %v535_v49, %v535_v49  ;;  %v537_v60 = vmul.f32 %v1931_v53, %v219_v44  ;;  %1676 = vpow2.f32 %v445_v17  ;;  %v231_v17 = vld [vmem:[%s1827_s19 + $0xe8] sm:$0xff]  ;;  %v459_v18 = vmul.f32 1.442695, %v366_v4 }
  0x2d   : > { %v1942_v63 = vpop.eup %1652  ;;  %854 = vst [vmem:[%s1897_s23 + $0x28] sm:$0xf] %v1485_v54  ;;  %v1487_v1 = vpack.c.bf16 %v536_v55, %v536_v55  ;;  %v538_v2 = vmul.f32 %v1936_v58, %v221_v50  ;;  %1678 = vpow2.f32 %v447_v22  ;;  %v239_v44 = vld [vmem:[%s1827_s19 + $0x128] sm:$0xff]  ;;  %v369_v52 = vsub.f32 %v266_v32, %v1829_v0  ;;  %v272_v54 = vld [vmem:[%s1827_s19 + $0x230] sm:$0xff]  ;;  %v278_v32 = vld [vmem:[%s1827_s19 + $0x260] sm:$0xff] }
  0x2e   : > { %v1949_v6 = vpop.eup %1654  ;;  %855 = vst [vmem:[%s1897_s23 + $0x30] sm:$0xf] %v1486_v59  ;;  %v1488_v7 = vpack.c.bf16 %v537_v60, %v537_v60  ;;  %v539_v9 = vmul.f32 %v1942_v63, %v223_v56  ;;  %1680 = vpow2.f32 %v449_v29  ;;  %v235_v29 = vld [vmem:[%s1827_s19 + $0x108] sm:$0xff]  ;;  %v370_v60 = vsub.f32 %v268_v39, %v1829_v0 }
  0x2f   : > { %v1955_v13 = vpop.eup %1656  ;;  %856 = vst [vmem:[%s1897_s23 + $0x38] sm:$0xf] %v1487_v1  ;;  %v1489_v15 = vpack.c.bf16 %v538_v2, %v538_v2  ;;  %v540_v16 = vmul.f32 %v1949_v6, %v225_v61  ;;  %1682 = vpow2.f32 %v451_v35  ;;  %v243_v59 = vld [vmem:[%s1827_s19 + $0x148] sm:$0xff]  ;;  %v245_v2 = vld [vmem:[%s1827_s19 + $0x158] sm:$0xff]  ;;  %v371_v4 = vsub.f32 %v270_v46, %v1829_v0 }
  0x30   : > { %v1960_v20 = vpop.eup %1658  ;;  %857 = vst [vmem:[%s1897_s23 + $0x40] sm:$0xf] %v1488_v7  ;;  %v1490_v21 = vpack.c.bf16 %v539_v9, %v539_v9  ;;  %v541_v22 = vmul.f32 %v1955_v13, %v227_v3  ;;  %1684 = vpow2.f32 %v453_v51  ;;  %v241_v51 = vld [vmem:[%s1827_s19 + $0x138] sm:$0xff]  ;;  %v465_v3 = vmul.f32 1.442695, %v369_v52  ;;  %v255_v46 = vld [vmem:[%s1827_s19 + $0x1a8] sm:$0xff] }
  0x31   : > { %v1966_v26 = vpop.eup %1660  ;;  %858 = vst [vmem:[%s1897_s23 + $0x48] sm:$0xf] %v1489_v15  ;;  %v1491_v27 = vpack.c.bf16 %v540_v16, %v540_v16  ;;  %v542_v28 = vmul.f32 %v1960_v20, %v229_v10  ;;  %1686 = vpow2.f32 %v455_v57  ;;  %v247_v10 = vld [vmem:[%s1827_s19 + $0x168] sm:$0xff]  ;;  %v372_v12 = vsub.f32 %v272_v54, %v1829_v0  ;;  %v274_v15 = vld [vmem:[%s1827_s19 + $0x240] sm:$0xff]  ;;  %v257_v54 = vld [vmem:[%s1827_s19 + $0x1b8] sm:$0xff] }
  0x32   : > { %v1973_v33 = vpop.eup %1662  ;;  %859 = vst [vmem:[%s1897_s23 + $0x50] sm:$0xf] %v1490_v21  ;;  %v1492_v34 = vpack.c.bf16 %v541_v22, %v541_v22  ;;  %v543_v35 = vmul.f32 %v1966_v26, %v231_v17  ;;  %1688 = vpow2.f32 %v457_v11  ;;  %v467_v11 = vmul.f32 1.442695, %v370_v60  ;;  %v249_v21 = vld [vmem:[%s1827_s19 + $0x178] sm:$0xff] }
  0x33   : > { %v1979_v40 = vpop.eup %1664  ;;  %860 = vst [vmem:[%s1897_s23 + $0x58] sm:$0xf] %v1491_v27  ;;  %v1493_v42 = vpack.c.bf16 %v542_v28, %v542_v28  ;;  %v544_v43 = vmul.f32 %v1973_v33, %v233_v23  ;;  %1690 = vpow2.f32 %v459_v18  ;;  %v469_v22 = vmul.f32 1.442695, %v371_v4  ;;  %v276_v23 = vld [vmem:[%s1827_s19 + $0x250] sm:$0xff]  ;;  %v282_v4 = vld [vmem:[%s1827_s19 + $0x280] sm:$0xff] }
  0x34   : > { %v1985_v48 = vpop.eup %1666  ;;  %861 = vst [vmem:[%s1897_s23 + $0x60] sm:$0xf] %v1492_v34  ;;  %v1494_v49 = vpack.c.bf16 %v543_v35, %v543_v35  ;;  %v545_v50 = vmul.f32 %v1979_v40, %v235_v29  ;;  %1692 = vpow2.f32 %v461_v38  ;;  %v251_v29 = vld [vmem:[%s1827_s19 + $0x188] sm:$0xff]  ;;  %v471_v30 = vmul.f32 1.442695, %v372_v12  ;;  %v253_v38 = vld [vmem:[%s1827_s19 + $0x198] sm:$0xff] }
  0x35   : > { %v1992_v55 = vpop.eup %1668  ;;  %862 = vst [vmem:[%s1897_s23 + $0x68] sm:$0xf] %v1493_v42  ;;  %v1495_v56 = vpack.c.bf16 %v544_v43, %v544_v43  ;;  %v546_v57 = vmul.f32 %v1985_v48, %v237_v37  ;;  %1694 = vpow2.f32 %v463_v45  ;;  %v373_v39 = vsub.f32 %v274_v15, %v1829_v0  ;;  %v280_v42 = vld [vmem:[%s1827_s19 + $0x270] sm:$0xff] }
  0x36   : > { %v1998_v61 = vpop.eup %1670  ;;  %863 = vst [vmem:[%s1897_s23 + $0x70] sm:$0xf] %v1494_v49  ;;  %v1496_v62 = vpack.c.bf16 %v545_v50, %v545_v50  ;;  %v547_v1 = vmul.f32 %v1992_v55, %v239_v44  ;;  %1696 = vpow2.f32 %v465_v3  ;;  %v374_v49 = vsub.f32 %v276_v23, %v1829_v0  ;;  %v284_v15 = vld [vmem:[%s1827_s19 + $0x290] sm:$0xff] }
  0x37   : > { %v2004_v5 = vpop.eup %1672  ;;  %864 = vst [vmem:[%s1897_s23 + $0x78] sm:$0xf] %v1495_v56  ;;  %v1497_v7 = vpack.c.bf16 %v546_v57, %v546_v57  ;;  %v548_v9 = vmul.f32 %v1998_v61, %v241_v51  ;;  %1698 = vpow2.f32 %v467_v11  ;;  %v473_v56 = vmul.f32 1.442695, %v373_v39  ;;  %v261_v11 = vld [vmem:[%s1827_s19 + $0x1d8] sm:$0xff] }
  0x38   : > { %v2011_v16 = vpop.eup %1674  ;;  %865 = vst [vmem:[%s1897_s23 + $0x80] sm:$0xf] %v1496_v62  ;;  %v1498_v17 = vpack.c.bf16 %v547_v1, %v547_v1  ;;  %v549_v18 = vmul.f32 %v2004_v5, %v243_v59  ;;  %1700 = vpow2.f32 %v469_v22  ;;  %v375_v57 = vsub.f32 %v278_v32, %v1829_v0  ;;  %v259_v1 = vld [vmem:[%s1827_s19 + $0x1c8] sm:$0xff]  ;;  %v265_v32 = vld [vmem:[%s1827_s19 + $0x1f8] sm:$0xff] }
  0x39   : > { %v2017_v24 = vpop.eup %1676  ;;  %866 = vst [vmem:[%s1897_s23 + $0x88] sm:$0xf] %v1497_v7  ;;  %v1499_v27 = vpack.c.bf16 %v548_v9, %v548_v9  ;;  %v550_v28 = vmul.f32 %v2011_v16, %v245_v2  ;;  %1702 = vpow2.f32 %v471_v30  ;;  %v475_v2 = vmul.f32 1.442695, %v374_v49  ;;  %v263_v22 = vld [vmem:[%s1827_s19 + $0x1e8] sm:$0xff] }
  0x3a   : > { %v2023_v34 = vpop.eup %1678  ;;  %867 = vst [vmem:[%s1897_s23 + $0x90] sm:$0xf] %v1498_v17  ;;  %v1500_v35 = vpack.c.bf16 %v549_v18, %v549_v18  ;;  %v551_v37 = vmul.f32 %v2017_v24, %v247_v10  ;;  %v376_v3 = vsub.f32 %v280_v42, %v1829_v0  ;;  %1704 = vpow2.f32 %v473_v56  ;;  %v292_v56 = vld [vmem:[%s1827_s19 + $0x2d0] sm:$0xff] }
  0x3b   : > { %v2030_v43 = vpop.eup %1680  ;;  %868 = vst [vmem:[%s1897_s23 + $0x98] sm:$0xf] %v1499_v27  ;;  %v1501_v44 = vpack.c.bf16 %v550_v28, %v550_v28  ;;  %v552_v45 = vmul.f32 %v2023_v34, %v249_v21  ;;  %v477_v12 = vmul.f32 1.442695, %v375_v57  ;;  %1706 = vpow2.f32 %v475_v2  ;;  %v286_v27 = vld [vmem:[%s1827_s19 + $0x2a0] sm:$0xff] }
  0x3c   : > { %v2036_v50 = vpop.eup %1682  ;;  %869 = vst [vmem:[%s1897_s23 + $0xa0] sm:$0xf] %v1500_v35  ;;  %v1502_v51 = vpack.c.bf16 %v551_v37, %v551_v37  ;;  %v553_v52 = vmul.f32 %v2030_v43, %v251_v29  ;;  %v479_v23 = vmul.f32 1.442695, %v376_v3  ;;  %v377_v35 = vsub.f32 %v282_v4, %v1829_v0  ;;  %v288_v37 = vld [vmem:[%s1827_s19 + $0x2b0] sm:$0xff]  ;;  %v294_v3 = vld [vmem:[%s1827_s19 + $0x2e0] sm:$0xff] }
  0x3d   : > { %v2042_v59 = vpop.eup %1684  ;;  %870 = vst [vmem:[%s1897_s23 + $0xa8] sm:$0xf] %v1501_v44  ;;  %v1503_v60 = vpack.c.bf16 %v552_v45, %v552_v45  ;;  %v554_v62 = vmul.f32 %v2036_v50, %v253_v38  ;;  %1708 = vpow2.f32 %v477_v12  ;;  %v378_v44 = vsub.f32 %v284_v15, %v1829_v0  ;;  %v290_v45 = vld [vmem:[%s1827_s19 + $0x2c0] sm:$0xff]  ;;  %v296_v12 = vld [vmem:[%s1827_s19 + $0x2f0] sm:$0xff] }
  0x3e   : > { %v2049_v7 = vpop.eup %1686  ;;  %871 = vst [vmem:[%s1897_s23 + $0xb0] sm:$0xf] %v1502_v51  ;;  %v1504_v9 = vpack.c.bf16 %v553_v52, %v553_v52  ;;  %v555_v10 = vmul.f32 %v2042_v59, %v255_v46  ;;  %1710 = vpow2.f32 %v479_v23  ;;  %v481_v52 = vmul.f32 1.442695, %v377_v35 }
  0x3f   : > { %v2055_v17 = vpop.eup %1688  ;;  %872 = vst [vmem:[%s1897_s23 + $0xb8] sm:$0xf] %v1503_v60  ;;  %v1505_v18 = vpack.c.bf16 %v554_v62, %v554_v62  ;;  %v556_v21 = vmul.f32 %v2049_v7, %v257_v54  ;;  %v379_v54 = vsub.f32 %v286_v27, %v1829_v0  ;;  %v267_v62 = vld [vmem:[%s1827_s19 + $0x208] sm:$0xff]  ;;  %v380_v2 = vsub.f32 %v288_v37, %v1829_v0 }
  0x40   : > { %v2061_v28 = vpop.eup %1690  ;;  %873 = vst [vmem:[%s1897_s23 + $0xc0] sm:$0xf] %v1504_v9  ;;  %v1506_v29 = vpack.c.bf16 %v555_v10, %v555_v10  ;;  %v557_v30 = vmul.f32 %v2055_v17, %v259_v1  ;;  %v483_v1 = vmul.f32 1.442695, %v378_v44  ;;  %v269_v9 = vld [vmem:[%s1827_s19 + $0x218] sm:$0xff]  ;;  %1712 = vpow2.f32 %v481_v52 }
  0x41   : > { %v2068_v38 = vpop.eup %1692  ;;  %874 = vst [vmem:[%s1897_s23 + $0xc8] sm:$0xf] %v1505_v18  ;;  %v1507_v39 = vpack.c.bf16 %v556_v21, %v556_v21  ;;  %v558_v42 = vmul.f32 %v2061_v28, %v261_v11  ;;  %v485_v10 = vmul.f32 1.442695, %v379_v54  ;;  %v381_v11 = vsub.f32 %v290_v45, %v1829_v0  ;;  %v271_v21 = vld [vmem:[%s1827_s19 + $0x228] sm:$0xff]  ;;  %v298_v45 = vld [vmem:[%s1827_s19 + $0x300] sm:$0xff] }
  0x42   : > { %v2074_v46 = vpop.eup %1694  ;;  %875 = vst [vmem:[%s1897_s23 + $0xd0] sm:$0xf] %v1506_v29  ;;  %v1508_v49 = vpack.c.bf16 %v557_v30, %v557_v30  ;;  %v559_v51 = vmul.f32 %v2068_v38, %v263_v22  ;;  %1714 = vpow2.f32 %v483_v1  ;;  %v487_v22 = vmul.f32 1.442695, %v380_v2  ;;  %v273_v30 = vld [vmem:[%s1827_s19 + $0x238] sm:$0xff]  ;;  %v275_v2 = vld [vmem:[%s1827_s19 + $0x248] sm:$0xff] }
  0x43   : > { %876 = vst [vmem:[%s1897_s23 + $0xd8] sm:$0xf] %v1507_v39  ;;  %v1509_v57 = vpack.c.bf16 %v558_v42, %v558_v42  ;;  %v560_v60 = vmul.f32 %v2074_v46, %v265_v32  ;;  %v2089_v15 = vpop.eup %1696  ;;  %v382_v23 = vsub.f32 %v292_v56, %v1829_v0  ;;  %1716 = vpow2.f32 %v485_v10  ;;  %v277_v10 = vld [vmem:[%s1827_s19 + $0x258] sm:$0xff] }
  0x44   : > { %877 = vst [vmem:[%s1897_s23 + $0xe0] sm:$0xf] %v1508_v49  ;;  %v1510_v4 = vpack.c.bf16 %v559_v51, %v559_v51  ;;  %v2094_v27 = vpop.eup %1698  ;;  %v561_v29 = vmul.f32 %v2089_v15, %v267_v62  ;;  %v489_v32 = vmul.f32 1.442695, %v381_v11  ;;  %v383_v35 = vsub.f32 %v294_v3, %v1829_v0  ;;  %v300_v49 = vld [vmem:[%s1827_s19 + $0x310] sm:$0xff] }
  0x45   : > { %878 = vst [vmem:[%s1897_s23 + $0xe8] sm:$0xf] %v1509_v57  ;;  %v1511_v18 = vpack.c.bf16 %v560_v60, %v560_v60  ;;  %v2100_v37 = vpop.eup %1700  ;;  %v562_v39 = vmul.f32 %v2094_v27, %v269_v9  ;;  %1718 = vpow2.f32 %v487_v22  ;;  %v491_v42 = vmul.f32 1.442695, %v382_v23  ;;  %v302_v57 = vld [vmem:[%s1827_s19 + $0x320] sm:$0xff]  ;;  %v304_v60 = vld [vmem:[%s1827_s19 + $0x330] sm:$0xff] }
  0x46   : > { %879 = vst [vmem:[%s1897_s23 + $0xf0] sm:$0xf] %v1510_v4  ;;  %v384_v44 = vsub.f32 %v296_v12, %v1829_v0  ;;  %v2107_v51 = vpop.eup %1702  ;;  %v1512_v52 = vpack.c.bf16 %v561_v29, %v561_v29  ;;  %v563_v54 = vmul.f32 %v2100_v37, %v271_v21  ;;  %1720 = vpow2.f32 %v489_v32  ;;  %v306_v4 = vld [vmem:[%s1827_s19 + $0x340] sm:$0xff]  ;;  %v279_v23 = vld [vmem:[%s1827_s19 + $0x268] sm:$0xff] }
  0x47   : > { %880 = vst [vmem:[%s1897_s23 + $0xf8] sm:$0xf] %v1511_v18  ;;  %v493_v56 = vmul.f32 1.442695, %v383_v35  ;;  %v1513_v62 = vpack.c.bf16 %v562_v39, %v562_v39  ;;  %v564_v1 = vmul.f32 %v2107_v51, %v273_v30  ;;  %1722 = vpow2.f32 %v491_v42  ;;  %v308_v18 = vld [vmem:[%s1827_s19 + $0x350] sm:$0xff]  ;;  %v2120_v21 = vpop.eup %1704  ;;  %v281_v39 = vld [vmem:[%s1827_s19 + $0x278] sm:$0xff] }
  0x48   : > { %v495_v3 = vmul.f32 1.442695, %v384_v44  ;;  %881 = vst [vmem:[%s1897_s23 + $0x100] sm:$0xf] %v1512_v52  ;;  %v1514_v9 = vpack.c.bf16 %v563_v54, %v563_v54  ;;  %v385_v11 = vsub.f32 %v298_v45, %v1829_v0  ;;  %v386_v12 = vsub.f32 %v300_v49, %v1829_v0  ;;  %v2126_v32 = vpop.eup %1706 }
  0x49   : > { %1724 = vpow2.f32 %v493_v56  ;;  %882 = vst [vmem:[%s1897_s23 + $0x108] sm:$0xf] %v1513_v62  ;;  %v1515_v22 = vpack.c.bf16 %v564_v1, %v564_v1  ;;  %v387_v29 = vsub.f32 %v302_v57, %v1829_v0  ;;  %v388_v30 = vsub.f32 %v304_v60, %v1829_v0  ;;  %v310_v60 = vld [vmem:[%s1827_s19 + $0x360] sm:$0xff]  ;;  %v312_v62 = vld [vmem:[%s1827_s19 + $0x370] sm:$0xff] }
  0x4a   : > { %1726 = vpow2.f32 %v495_v3  ;;  %883 = vst [vmem:[%s1897_s23 + $0x110] sm:$0xf] %v1514_v9  ;;  %v565_v35 = vmul.f32 %v2120_v21, %v275_v2  ;;  %v497_v42 = vmul.f32 1.442695, %v385_v11  ;;  %v499_v44 = vmul.f32 1.442695, %v386_v12  ;;  %v2132_v49 = vpop.eup %1708 }
  0x4b   : > { %v389_v45 = vsub.f32 %v306_v4, %v1829_v0  ;;  %884 = vst [vmem:[%s1897_s23 + $0x118] sm:$0xf] %v1515_v22  ;;  %v566_v52 = vmul.f32 %v2126_v32, %v277_v10  ;;  %v501_v54 = vmul.f32 1.442695, %v387_v29  ;;  %v503_v56 = vmul.f32 1.442695, %v388_v30  ;;  %v2139_v1 = vpop.eup %1710 }
  0x4c   : > { %v390_v57 = vsub.f32 %v308_v18, %v1829_v0  ;;  %2494 = vst [vmem:[#allocation2_spill] sm:$0xff] %v2139_v1  ;;  %v1516_v2 = vpack.c.bf16 %v565_v35, %v565_v35  ;;  %v567_v3 = vmul.f32 %v2132_v49, %v279_v23  ;;  %1728 = vpow2.f32 %v497_v42  ;;  %v314_v9 = vld [vmem:[%s1827_s19 + $0x380] sm:$0xff]  ;;  %v316_v11 = vld [vmem:[%s1827_s19 + $0x390] sm:$0xff]  ;;  %v283_v22 = vld [vmem:[%s1827_s19 + $0x288] sm:$0xff] }
  0x4d   : > { %v505_v4 = vmul.f32 1.442695, %v389_v45  ;;  %v1517_v10 = vpack.c.bf16 %v566_v52, %v566_v52  ;;  %v568_v12 = vmul.f32 %v2139_v1, %v281_v39  ;;  %1730 = vpow2.f32 %v499_v44  ;;  %v285_v30 = vld [vmem:[%s1827_s19 + $0x298] sm:$0xff]  ;;  %v2150_v42 = vpop.eup %1712  ;;  %v287_v45 = vld [vmem:[%s1827_s19 + $0x2a8] sm:$0xff] }
  0x4e   : > { %v507_v18 = vmul.f32 1.442695, %v390_v57  ;;  %885 = vst [vmem:[%s1897_s23 + $0x120] sm:$0xf] %v1516_v2  ;;  %v1518_v29 = vpack.c.bf16 %v567_v3, %v567_v3  ;;  %1732 = vpow2.f32 %v501_v54  ;;  %v391_v23 = vsub.f32 %v310_v60, %v1829_v0  ;;  %2495 = vst [vmem:[#allocation3_spill] sm:$0xff] %v2150_v42  ;;  %v318_v57 = vld [vmem:[%s1827_s19 + $0x3a0] sm:$0xff] }
  0x4f   : > { %v392_v35 = vsub.f32 %v312_v62, %v1829_v0  ;;  %886 = vst [vmem:[%s1897_s23 + $0x128] sm:$0xf] %v1517_v10  ;;  %v1519_v39 = vpack.c.bf16 %v568_v12, %v568_v12  ;;  %1734 = vpow2.f32 %v503_v56  ;;  %v393_v44 = vsub.f32 %v314_v9, %v1829_v0  ;;  %v2157_v2 = vpop.eup %1714  ;;  %v289_v60 = vld [vmem:[%s1827_s19 + $0x2b8] sm:$0xff]  ;;  %v320_v10 = vld [vmem:[%s1827_s19 + $0x3b0] sm:$0xff]  ;;  %v291_v9 = vld [vmem:[%s1827_s19 + $0x2c8] sm:$0xff] }
  0x50   : > { %v394_v52 = vsub.f32 %v316_v11, %v1829_v0  ;;  %2496 = vst [vmem:[#allocation4_spill] sm:$0xff] %v2157_v2  ;;  %887 = vst [vmem:[%s1897_s23 + $0x130] sm:$0xf] %v1518_v29  ;;  %v569_v54 = vmul.f32 %v2150_v42, %v283_v22  ;;  %1736 = vpow2.f32 %v505_v4  ;;  %v509_v62 = vmul.f32 1.442695, %v391_v23  ;;  %v2163_v12 = vpop.eup %1716  ;;  %v293_v23 = vld [vmem:[%s1827_s19 + $0x2d8] sm:$0xff] }
  0x51   : > { %v511_v3 = vmul.f32 1.442695, %v392_v35  ;;  %2497 = vst [vmem:[#allocation5_spill] sm:$0xff] %v2163_v12  ;;  %888 = vst [vmem:[%s1897_s23 + $0x138] sm:$0xf] %v1519_v39  ;;  %v570_v56 = vmul.f32 %v2157_v2, %v285_v30  ;;  %1738 = vpow2.f32 %v507_v18  ;;  %v571_v4 = vmul.f32 %v2163_v12, %v287_v45 }
  0x52   : > { %v513_v11 = vmul.f32 1.442695, %v393_v44  ;;  %v515_v29 = vmul.f32 1.442695, %v394_v52  ;;  %v2168_v1 = vpop.eup %1718  ;;  %v1520_v22 = vpack.c.bf16 %v569_v54, %v569_v54  ;;  %1740 = vpow2.f32 %v509_v62  ;;  %v295_v44 = vld [vmem:[%s1827_s19 + $0x2e8] sm:$0xff]  ;;  %v322_v54 = vld [vmem:[%s1827_s19 + $0x3c0] sm:$0xff] }
  0x53   : > { %2498 = vst [vmem:[#allocation6_spill] sm:$0xff] %v2168_v1  ;;  %v395_v35 = vsub.f32 %v318_v57, %v1829_v0  ;;  %v2173_v39 = vpop.eup %1720  ;;  %v1521_v30 = vpack.c.bf16 %v570_v56, %v570_v56  ;;  %v572_v18 = vmul.f32 %v2168_v1, %v289_v60  ;;  %1742 = vpow2.f32 %v511_v3  ;;  %v297_v62 = vld [vmem:[%s1827_s19 + $0x2f8] sm:$0xff]  ;;  %v324_v56 = vld [vmem:[%s1827_s19 + $0x3d0] sm:$0xff] }
  0x54   : > { %v396_v52 = vsub.f32 %v320_v10, %v1829_v0  ;;  %v2179_v2 = vpop.eup %1722  ;;  %889 = vst [vmem:[%s1897_s23 + $0x140] sm:$0xf] %v1520_v22  ;;  %v1522_v45 = vpack.c.bf16 %v571_v4, %v571_v4  ;;  %v573_v57 = vmul.f32 %v2173_v39, %v291_v9  ;;  %1744 = vpow2.f32 %v513_v11  ;;  %v326_v22 = vld [vmem:[%s1827_s19 + $0x3e0] sm:$0xff]  ;;  %v328_v4 = vld [vmem:[%s1827_s19 + $0x3f0] sm:$0xff] }
  0x55   : > { %v517_v12 = vmul.f32 1.442695, %v395_v35  ;;  %890 = vst [vmem:[%s1897_s23 + $0x148] sm:$0xf] %v1521_v30  ;;  %v1523_v3 = vpack.c.bf16 %v572_v18, %v572_v18  ;;  %v574_v10 = vmul.f32 %v2179_v2, %v293_v23  ;;  %1746 = vpow2.f32 %v515_v29  ;;  %v299_v23 = vld [vmem:[%s1827_s19 + $0x308] sm:$0xff] }
  0x56   : > { %v2185_v60 = vpop.eup %1724  ;;  %v519_v1 = vmul.f32 1.442695, %v396_v52  ;;  %891 = vst [vmem:[%s1897_s23 + $0x150] sm:$0xf] %v1522_v45  ;;  %v1524_v9 = vpack.c.bf16 %v573_v57, %v573_v57  ;;  %v397_v35 = vsub.f32 %v322_v54, %v1829_v0  ;;  %v398_v18 = vsub.f32 %v324_v56, %v1829_v0  ;;  %v301_v45 = vld [vmem:[%s1827_s19 + $0x318] sm:$0xff] }
  0x57   : > { %v2191_v42 = vpop.eup %1726  ;;  %v575_v11 = vmul.f32 %v2185_v60, %v295_v44  ;;  %1748 = vpow2.f32 %v517_v12  ;;  %892 = vst [vmem:[%s1897_s23 + $0x158] sm:$0xf] %v1523_v3  ;;  %v1525_v30 = vpack.c.bf16 %v574_v10, %v574_v10  ;;  %v399_v44 = vsub.f32 %v326_v22, %v1829_v0  ;;  %v303_v3 = vld [vmem:[%s1827_s19 + $0x328] sm:$0xff]  ;;  %v305_v22 = vld [vmem:[%s1827_s19 + $0x338] sm:$0xff] }
  0x58   : > { %v576_v29 = vmul.f32 %v2191_v42, %v297_v62  ;;  %1750 = vpow2.f32 %v519_v1  ;;  %893 = vst [vmem:[%s1897_s23 + $0x160] sm:$0xf] %v1524_v9  ;;  %v521_v57 = vmul.f32 1.442695, %v397_v35  ;;  %v400_v12 = vsub.f32 %v328_v4, %v1829_v0 }
  0x59   : > { %v1526_v52 = vpack.c.bf16 %v575_v11, %v575_v11  ;;  %v2204_v54 = vpop.eup %1728  ;;  %894 = vst [vmem:[%s1897_s23 + $0x168] sm:$0xf] %v1525_v30  ;;  %v523_v1 = vmul.f32 1.442695, %v398_v18  ;;  %v1544_v56 = vpack.c.bf16 %v1882_v8, %v1882_v8  ;;  %v1545_v10 = vpack.c.bf16 %v1887_v14, %v1887_v14  ;;  %v307_v8 = vld [vmem:[%s1827_s19 + $0x348] sm:$0xff] }
  0x5a   : > { %v1527_v62 = vpack.c.bf16 %v576_v29, %v576_v29  ;;  %v2212_v9 = vpop.eup %1730  ;;  %v577_v0 = vmul.f32 %v2204_v54, %v299_v23  ;;  %1752 = vpow2.f32 %v521_v57  ;;  %v525_v4 = vmul.f32 1.442695, %v399_v44 }
  0x5b   : > { %895 = vst [vmem:[%s1897_s23 + $0x170] sm:$0xf] %v1526_v52  ;;  %v527_v11 = vmul.f32 1.442695, %v400_v12  ;;  %v2217_v35 = vpop.eup %1732  ;;  %v578_v30 = vmul.f32 %v2212_v9, %v301_v45  ;;  %1754 = vpow2.f32 %v523_v1  ;;  %1169 = vst [vmem:[%s1897_s23 + $0x4] sm:$0xf] %v1544_v56  ;;  %v1546_v14 = vpack.c.bf16 %v1892_v19, %v1892_v19 }
  0x5c   : > { %896 = vst [vmem:[%s1897_s23 + $0x178] sm:$0xf] %v1527_v62  ;;  %1170 = vst [vmem:[%s1897_s23 + $0xc] sm:$0xf] %v1545_v10  ;;  %v1547_v29 = vpack.c.bf16 %v1903_v25, %v1903_v25  ;;  %v2228_v23 = vpop.eup %1734  ;;  %v1528_v18 = vpack.c.bf16 %v577_v0, %v577_v0  ;;  %v579_v52 = vmul.f32 %v2217_v35, %v303_v3  ;;  %v309_v45 = vld [vmem:[%s1827_s19 + $0x358] sm:$0xff]  ;;  %1756 = vpow2.f32 %v525_v4  ;;  %v311_v25 = vld [vmem:[%s1827_s19 + $0x368] sm:$0xff] }
  0x5d   : > { %v1548_v57 = vpack.c.bf16 %v1908_v31, %v1908_v31  ;;  %v2234_v44 = vpop.eup %1736  ;;  %v1529_v12 = vpack.c.bf16 %v578_v30, %v578_v30  ;;  %v580_v19 = vmul.f32 %v2228_v23, %v305_v22  ;;  %1758 = vpow2.f32 %v527_v11  ;;  %1171 = vst [vmem:[%s1897_s23 + $0x14] sm:$0xf] %v1546_v14  ;;  %v313_v56 = vld [vmem:[%s1827_s19 + $0x378] sm:$0xff]  ;;  %v315_v11 = vld [vmem:[%s1827_s19 + $0x388] sm:$0xff] }
  0x5e   : > { %1172 = vst [vmem:[%s1897_s23 + $0x1c] sm:$0xf] %v1547_v29  ;;  %v1549_v62 = vpack.c.bf16 %v1912_v36, %v1912_v36  ;;  %v2242_v3 = vpop.eup %1738  ;;  %897 = vst [vmem:[%s1897_s23 + $0x180] sm:$0xf] %v1528_v18  ;;  %v1530_v31 = vpack.c.bf16 %v579_v52, %v579_v52  ;;  %v581_v1 = vmul.f32 %v2234_v44, %v307_v8  ;;  %v317_v29 = vld [vmem:[%s1827_s19 + $0x398] sm:$0xff] }
  0x5f   : > { %1173 = vst [vmem:[%s1897_s23 + $0x24] sm:$0xf] %v1548_v57  ;;  %v1550_v10 = vpack.c.bf16 %v1918_v41, %v1918_v41  ;;  %v1551_v0 = vpack.c.bf16 %v1925_v47, %v1925_v47  ;;  %v2252_v22 = vpop.eup %1740  ;;  %898 = vst [vmem:[%s1897_s23 + $0x188] sm:$0xf] %v1529_v12  ;;  %v1531_v36 = vpack.c.bf16 %v580_v19, %v580_v19  ;;  %v319_v57 = vld [vmem:[%s1827_s19 + $0x3a8] sm:$0xff] }
  0x60   : > { %v582_v4 = vmul.f32 %v2242_v3, %v309_v45  ;;  %1174 = vst [vmem:[%s1897_s23 + $0x2c] sm:$0xf] %v1549_v62  ;;  %v1552_v30 = vpack.c.bf16 %v1931_v53, %v1931_v53  ;;  %v1553_v41 = vpack.c.bf16 %v1936_v58, %v1936_v58  ;;  %v2262_v8 = vpop.eup %1742  ;;  %899 = vst [vmem:[%s1897_s23 + $0x190] sm:$0xf] %v1530_v31  ;;  %v321_v62 = vld [vmem:[%s1827_s19 + $0x3b8] sm:$0xff] }
  0x61   : > { %v1532_v47 = vpack.c.bf16 %v581_v1, %v581_v1  ;;  %v583_v14 = vmul.f32 %v2252_v22, %v311_v25  ;;  %1175 = vst [vmem:[%s1897_s23 + $0x34] sm:$0xf] %v1550_v10  ;;  %1176 = vst [vmem:[%s1897_s23 + $0x3c] sm:$0xf] %v1551_v0  ;;  %v1554_v18 = vpack.c.bf16 %v1942_v63, %v1942_v63  ;;  %v2273_v58 = vpop.eup %1744 }
  0x62   : > { %v1555_v53 = vpack.c.bf16 %v1949_v6, %v1949_v6  ;;  %900 = vst [vmem:[%s1897_s23 + $0x198] sm:$0xf] %v1531_v36  ;;  %v1533_v52 = vpack.c.bf16 %v582_v4, %v582_v4  ;;  %v584_v45 = vmul.f32 %v2262_v8, %v313_v56  ;;  %1177 = vst [vmem:[%s1897_s23 + $0x44] sm:$0xf] %v1552_v30  ;;  %v2284_v6 = vpop.eup %1746  ;;  %v323_v30 = vld [vmem:[%s1827_s19 + $0x3c8] sm:$0xff] }
  0x63   : > { %1178 = vst [vmem:[%s1897_s23 + $0x4c] sm:$0xf] %v1553_v41  ;;  %v1556_v12 = vpack.c.bf16 %v1955_v13, %v1955_v13  ;;  %v1557_v63 = vpack.c.bf16 %v1960_v20, %v1960_v20  ;;  %901 = vst [vmem:[%s1897_s23 + $0x1a0] sm:$0xf] %v1532_v47  ;;  %v1534_v19 = vpack.c.bf16 %v583_v14, %v583_v14 }
  0x64   : > { %v585_v25 = vmul.f32 %v2273_v58, %v315_v11  ;;  %1179 = vst [vmem:[%s1897_s23 + $0x54] sm:$0xf] %v1554_v18  ;;  %1180 = vst [vmem:[%s1897_s23 + $0x5c] sm:$0xf] %v1555_v53  ;;  %v1558_v31 = vpack.c.bf16 %v1966_v26, %v1966_v26  ;;  %v1559_v13 = vpack.c.bf16 %v1973_v33, %v1973_v33  ;;  %v2295_v1 = vpop.eup %1748  ;;  %v327_v53 = vld [vmem:[%s1827_s19 + $0x3e8] sm:$0xff] }
  0x65   : > { %902 = vst [vmem:[%s1897_s23 + $0x1a8] sm:$0xf] %v1533_v52  ;;  %v1535_v20 = vpack.c.bf16 %v584_v45, %v584_v45  ;;  %v586_v56 = vmul.f32 %v2284_v6, %v317_v29  ;;  %1181 = vst [vmem:[%s1897_s23 + $0x64] sm:$0xf] %v1556_v12  ;;  %v1560_v10 = vpack.c.bf16 %v1979_v40, %v1979_v40  ;;  %v2305_v0 = vpop.eup %1750 }
  0x66   : > { %1182 = vst [vmem:[%s1897_s23 + $0x6c] sm:$0xf] %v1557_v63  ;;  %v1561_v26 = vpack.c.bf16 %v1985_v48, %v1985_v48  ;;  %903 = vst [vmem:[%s1897_s23 + $0x1b0] sm:$0xf] %v1534_v19  ;;  %v1536_v33 = vpack.c.bf16 %v585_v25, %v585_v25  ;;  %v587_v36 = vmul.f32 %v2295_v1, %v319_v57  ;;  %v329_v57 = vld [vmem:[%s1827_s19 + $0x3f8] sm:$0xff] }
  0x67   : > { %1183 = vst [vmem:[%s1897_s23 + $0x74] sm:$0xf] %v1558_v31  ;;  %1184 = vst [vmem:[%s1897_s23 + $0x7c] sm:$0xf] %v1559_v13  ;;  %v1562_v4 = vpack.c.bf16 %v1992_v55, %v1992_v55  ;;  %v1563_v40 = vpack.c.bf16 %v1998_v61, %v1998_v61  ;;  %v1537_v48 = vpack.c.bf16 %v586_v56, %v586_v56  ;;  %v325_v61 = vld [vmem:[%s1827_s19 + $0x3d8] sm:$0xff]  ;;  %v2499_v56 = vld [vmem:[#allocation2_spill] sm:$0xff] }
  0x68   : > { %904 = vst [vmem:[%s1897_s23 + $0x1b8] sm:$0xf] %v1535_v20  ;;  %v588_v11 = vmul.f32 %v2305_v0, %v321_v62  ;;  %1185 = vst [vmem:[%s1897_s23 + $0x84] sm:$0xf] %v1560_v10  ;;  %v1564_v41 = vpack.c.bf16 %v2004_v5, %v2004_v5  ;;  %v1565_v55 = vpack.c.bf16 %v2011_v16, %v2011_v16  ;;  %v2334_v16 = vpop.eup %1752 }
  0x69   : > { %1186 = vst [vmem:[%s1897_s23 + $0x8c] sm:$0xf] %v1561_v26  ;;  %905 = vst [vmem:[%s1897_s23 + $0x1c0] sm:$0xf] %v1536_v33  ;;  %v1538_v47 = vpack.c.bf16 %v587_v36, %v587_v36  ;;  %v1566_v14 = vpack.c.bf16 %v2017_v24, %v2017_v24  ;;  %v1567_v29 = vpack.c.bf16 %v2023_v34, %v2023_v34  ;;  %v2346_v52 = vpop.eup %1754  ;;  %v2500_v26 = vld [vmem:[#allocation3_spill] sm:$0xff]  ;;  %v2501_v33 = vld [vmem:[#allocation4_spill] sm:$0xff] }
  0x6a   : > { %1187 = vst [vmem:[%s1897_s23 + $0x94] sm:$0xf] %v1562_v4  ;;  %1188 = vst [vmem:[%s1897_s23 + $0x9c] sm:$0xf] %v1563_v40  ;;  %v1568_v5 = vpack.c.bf16 %v2030_v43, %v2030_v43  ;;  %v1539_v18 = vpack.c.bf16 %v588_v11, %v588_v11  ;;  %v1569_v24 = vpack.c.bf16 %v2036_v50, %v2036_v50  ;;  %v2360_v12 = vpop.eup %1756  ;;  %v2502_v4 = vld [vmem:[#allocation5_spill] sm:$0xff]  ;;  %v2503_v40 = vld [vmem:[#allocation6_spill] sm:$0xff] }
  0x6b   : > { %906 = vst [vmem:[%s1897_s23 + $0x1c8] sm:$0xf] %v1537_v48  ;;  %1189 = vst [vmem:[%s1897_s23 + $0xa4] sm:$0xf] %v1564_v41  ;;  %v1570_v34 = vpack.c.bf16 %v2042_v59, %v2042_v59  ;;  %v1571_v43 = vpack.c.bf16 %v2049_v7, %v2049_v7  ;;  %v589_v45 = vmul.f32 %v2334_v16, %v323_v30  ;;  %v2373_v19 = vpop.eup %1758 }
  0x6c   : > { %1190 = vst [vmem:[%s1897_s23 + $0xac] sm:$0xf] %v1565_v55  ;;  %907 = vst [vmem:[%s1897_s23 + $0x1d0] sm:$0xf] %v1538_v47  ;;  %v1572_v50 = vpack.c.bf16 %v2055_v17, %v2055_v17  ;;  %v1573_v59 = vpack.c.bf16 %v2061_v28, %v2061_v28  ;;  %v1574_v7 = vpack.c.bf16 %v2068_v38, %v2068_v38 }
  0x6d   : > { %1191 = vst [vmem:[%s1897_s23 + $0xb4] sm:$0xf] %v1566_v14  ;;  %1192 = vst [vmem:[%s1897_s23 + $0xbc] sm:$0xf] %v1567_v29  ;;  %v590_v63 = vmul.f32 %v2346_v52, %v325_v61  ;;  %v1575_v17 = vpack.c.bf16 %v2074_v46, %v2074_v46  ;;  %v1576_v28 = vpack.c.bf16 %v2089_v15, %v2089_v15 }
  0x6e   : > { %1193 = vst [vmem:[%s1897_s23 + $0xc4] sm:$0xf] %v1568_v5  ;;  %908 = vst [vmem:[%s1897_s23 + $0x1d8] sm:$0xf] %v1539_v18  ;;  %v1577_v38 = vpack.c.bf16 %v2094_v27, %v2094_v27  ;;  %v1540_v25 = vpack.c.bf16 %v589_v45, %v589_v45  ;;  %v591_v62 = vmul.f32 %v2360_v12, %v327_v53 }
  0x6f   : > { %1194 = vst [vmem:[%s1897_s23 + $0xcc] sm:$0xf] %v1569_v24  ;;  %1195 = vst [vmem:[%s1897_s23 + $0xd4] sm:$0xf] %v1570_v34  ;;  %v1578_v46 = vpack.c.bf16 %v2100_v37, %v2100_v37  ;;  %v1579_v15 = vpack.c.bf16 %v2107_v51, %v2107_v51  ;;  %v1541_v31 = vpack.c.bf16 %v590_v63, %v590_v63 }
  0x70   : > { %1196 = vst [vmem:[%s1897_s23 + $0xdc] sm:$0xf] %v1571_v43  ;;  %1197 = vst [vmem:[%s1897_s23 + $0xe4] sm:$0xf] %v1572_v50  ;;  %v592_v27 = vmul.f32 %v2373_v19, %v329_v57  ;;  %v1580_v13 = vpack.c.bf16 %v2120_v21, %v2120_v21  ;;  %v1581_v20 = vpack.c.bf16 %v2126_v32, %v2126_v32 }
  0x71   : > { %1198 = vst [vmem:[%s1897_s23 + $0xec] sm:$0xf] %v1573_v59  ;;  %1199 = vst [vmem:[%s1897_s23 + $0xf4] sm:$0xf] %v1574_v7  ;;  %v1542_v37 = vpack.c.bf16 %v591_v62, %v591_v62  ;;  %v1582_v51 = vpack.c.bf16 %v2132_v49, %v2132_v49  ;;  %v1583_v10 = vpack.c.bf16 %v2499_v56, %v2499_v56 }
  0x72   : > { %1200 = vst [vmem:[%s1897_s23 + $0xfc] sm:$0xf] %v1575_v17  ;;  %1201 = vst [vmem:[%s1897_s23 + $0x104] sm:$0xf] %v1576_v28  ;;  %v1584_v21 = vpack.c.bf16 %v2500_v26, %v2500_v26  ;;  %v1543_v32 = vpack.c.bf16 %v592_v27, %v592_v27  ;;  %v1585_v36 = vpack.c.bf16 %v2501_v33, %v2501_v33 }
  0x73   : > { %1202 = vst [vmem:[%s1897_s23 + $0x10c] sm:$0xf] %v1577_v38  ;;  %909 = vst [vmem:[%s1897_s23 + $0x1e0] sm:$0xf] %v1540_v25  ;;  %v1586_v49 = vpack.c.bf16 %v2502_v4, %v2502_v4  ;;  %v1587_v48 = vpack.c.bf16 %v2503_v40, %v2503_v40  ;;  %v1588_v11 = vpack.c.bf16 %v2173_v39, %v2173_v39 }
  0x74   : > { %1203 = vst [vmem:[%s1897_s23 + $0x114] sm:$0xf] %v1578_v46  ;;  %1204 = vst [vmem:[%s1897_s23 + $0x11c] sm:$0xf] %v1579_v15  ;;  %v1589_v30 = vpack.c.bf16 %v2179_v2, %v2179_v2  ;;  %v1590_v41 = vpack.c.bf16 %v2185_v60, %v2185_v60  ;;  %v1591_v55 = vpack.c.bf16 %v2191_v42, %v2191_v42 }
  0x75   : > { %910 = vst [vmem:[%s1897_s23 + $0x1e8] sm:$0xf] %v1541_v31  ;;  %1205 = vst [vmem:[%s1897_s23 + $0x124] sm:$0xf] %v1580_v13  ;;  %v1592_v39 = vpack.c.bf16 %v2204_v54, %v2204_v54  ;;  %v1593_v2 = vpack.c.bf16 %v2212_v9, %v2212_v9  ;;  %v1594_v60 = vpack.c.bf16 %v2217_v35, %v2217_v35 }
  0x76   : > { %1206 = vst [vmem:[%s1897_s23 + $0x12c] sm:$0xf] %v1581_v20  ;;  %911 = vst [vmem:[%s1897_s23 + $0x1f0] sm:$0xf] %v1542_v37  ;;  %v1595_v42 = vpack.c.bf16 %v2228_v23, %v2228_v23  ;;  %v1596_v54 = vpack.c.bf16 %v2234_v44, %v2234_v44  ;;  %v1597_v9 = vpack.c.bf16 %v2242_v3, %v2242_v3 }
  0x77   : > { %1207 = vst [vmem:[%s1897_s23 + $0x134] sm:$0xf] %v1582_v51  ;;  %1208 = vst [vmem:[%s1897_s23 + $0x13c] sm:$0xf] %v1583_v10  ;;  %v1598_v35 = vpack.c.bf16 %v2252_v22, %v2252_v22  ;;  %v1599_v23 = vpack.c.bf16 %v2262_v8, %v2262_v8  ;;  %v1600_v44 = vpack.c.bf16 %v2273_v58, %v2273_v58 }
  0x78   : > { %1209 = vst [vmem:[%s1897_s23 + $0x144] sm:$0xf] %v1584_v21  ;;  %912 = vst [vmem:[%s1897_s23 + $0x1f8] sm:$0xf] %v1543_v32  ;;  %v1601_v3 = vpack.c.bf16 %v2284_v6, %v2284_v6  ;;  %v1602_v22 = vpack.c.bf16 %v2295_v1, %v2295_v1  ;;  %v1603_v8 = vpack.c.bf16 %v2305_v0, %v2305_v0 }
  0x79   : > { %1210 = vst [vmem:[%s1897_s23 + $0x14c] sm:$0xf] %v1585_v36  ;;  %1211 = vst [vmem:[%s1897_s23 + $0x154] sm:$0xf] %v1586_v49  ;;  %v1604_v58 = vpack.c.bf16 %v2334_v16, %v2334_v16  ;;  %v1605_v47 = vpack.c.bf16 %v2346_v52, %v2346_v52  ;;  %v1606_v6 = vpack.c.bf16 %v2360_v12, %v2360_v12 }
  0x7a   : > { %1212 = vst [vmem:[%s1897_s23 + $0x15c] sm:$0xf] %v1587_v48  ;;  %1213 = vst [vmem:[%s1897_s23 + $0x164] sm:$0xf] %v1588_v11  ;;  %v1607_v1 = vpack.c.bf16 %v2373_v19, %v2373_v19 }
  0x7b   : > { %1214 = vst [vmem:[%s1897_s23 + $0x16c] sm:$0xf] %v1589_v30  ;;  %1215 = vst [vmem:[%s1897_s23 + $0x174] sm:$0xf] %v1590_v41 }
  0x7c   : > { %1216 = vst [vmem:[%s1897_s23 + $0x17c] sm:$0xf] %v1591_v55  ;;  %1217 = vst [vmem:[%s1897_s23 + $0x184] sm:$0xf] %v1592_v39 }
  0x7d   : > { %1218 = vst [vmem:[%s1897_s23 + $0x18c] sm:$0xf] %v1593_v2  ;;  %1219 = vst [vmem:[%s1897_s23 + $0x194] sm:$0xf] %v1594_v60 }
  0x7e   : > { %1220 = vst [vmem:[%s1897_s23 + $0x19c] sm:$0xf] %v1595_v42  ;;  %1221 = vst [vmem:[%s1897_s23 + $0x1a4] sm:$0xf] %v1596_v54 }
  0x7f   : > { %1222 = vst [vmem:[%s1897_s23 + $0x1ac] sm:$0xf] %v1597_v9  ;;  %1223 = vst [vmem:[%s1897_s23 + $0x1b4] sm:$0xf] %v1598_v35 }
  0x80   : > { %1224 = vst [vmem:[%s1897_s23 + $0x1bc] sm:$0xf] %v1599_v23  ;;  %1225 = vst [vmem:[%s1897_s23 + $0x1c4] sm:$0xf] %v1600_v44 }
  0x81   : > { %1226 = vst [vmem:[%s1897_s23 + $0x1cc] sm:$0xf] %v1601_v3  ;;  %1227 = vst [vmem:[%s1897_s23 + $0x1d4] sm:$0xf] %v1602_v22 }
  0x82   : > { %1228 = vst [vmem:[%s1897_s23 + $0x1dc] sm:$0xf] %v1603_v8  ;;  %1229 = vst [vmem:[%s1897_s23 + $0x1e4] sm:$0xf] %v1604_v58 }
  0x83   : > { %1230 = vst [vmem:[%s1897_s23 + $0x1ec] sm:$0xf] %v1605_v47  ;;  %1231 = vst [vmem:[%s1897_s23 + $0x1f4] sm:$0xf] %v1606_v6 }
  0x84   : > { %1232 = vst [vmem:[%s1897_s23 + $0x1fc] sm:$0xf] %v1607_v1 }
  0x85 PF: > { %s12_s11 = sadd.s32 1, %s1782_s11   ;;  %s2504_s9 = smov %s1778_s10 }
  0x86   : > { %p9_p5 = scmp.ge.s32.totalorder %s12_s11, 4   ;;  %s2505_s10 = smov %s2507_s12 }
  0x88   :  { %11 = sbr.rel (!%p9_p5) target bundleno = 2 (0x2), region = 61 }

// kernel: aft_full.5
= control target key start
LH: loop header
LB: loop body
LE: loop exit
PB: predicated region body
PF: predicated region fallthrough
CT: control target
= control target key end

     0   :  { %10 = vsyncpa [#allocation4], 0  ;;  %s7182_s0 = inlined_call_operand.vmem [shape: bf16[512,512], index: 0, kind: input, shape index: {}]   ;;  %s7183_s1 = inlined_call_operand.vmem [shape: bf16[2,512,256], index: 1, kind: input, shape index: {}]   ;;  %s7184_s2 = inlined_call_operand.vmem [shape: f32[2,512,128], index: 2, kind: input, shape index: {}]   ;;  %s7185_s3 = inlined_call_operand.vmem [shape: bf16[128,128], index: 3, kind: input, shape index: {}]   ;;  %s7186_s4 = inlined_call_operand.vmem [shape: f32[1,128], index: 4, kind: input, shape index: {}]   ;;  %s7187_s5 = inlined_call_operand.hbm [shape: f32[2,512,128], index: 5, kind: output, shape index: {}]  }
   0x1   :  { %12 = vsyncpa [#allocation4 + $0x1], 0  ;;  %s5368_s18 = smov 0   ;;  %s5370_s19 = smov 0  }
   0x2   :  { %s5372_s20 = smov 0   ;;  %s5374_s21 = smov 0  }
   0x3   :  { %s5376_s22 = smov 0   ;;  %s5378_s23 = smov 0  }
   0x4 LB: > { %s4083_s24 = sadd.s32 4294967295, %s5333_s23   ;;  %s4084_s25 = sadd.s32 4294967294, %s5333_s23   ;;  %s5333_s23 = sphi %s5378_s23, %s18_s23   ;;  %s5329_s22 = sphi %s5376_s22, %s7402_s22   ;;  %s5325_s21 = sphi %s5374_s21, %s7401_s21   ;;  %s5321_s20 = sphi %s5372_s20, %s7400_s20   ;;  %s5317_s19 = sphi %s5370_s19, %s7399_s19   ;;  %s5313_s18 = sphi %s5368_s18, %s7398_s18  }
   0x5   : > { %s37_s26 = sadd.s32 1, %s5329_s22  ;;  %s172_s27 = sadd.s32 1, %s5321_s20 }
   0x6   : > { %p39_p0 = scmp.ge.s32.totalorder %s37_s26, 2  ;;  %p182_p1 = scmp.ne.s32.totalorder %s5321_s20, %s5317_s19 }
   0x7   : > { %p183_p2 = scmp.eq.s32.totalorder %s4083_s24, 1  ;;  %p188_p3 = scmp.ne.s32.totalorder %s5317_s19, %s5313_s18 }
   0x8   : > { %s7404_s26 = smov (%p39_p0, %s37_s26), 0  ;;  %p189_p5 = scmp.eq.s32.totalorder %s4084_s25, 1 }
   0x9   : > { %p5408_p4 = por %p183_p2, %p182_p1  ;;  %s167_s29 = ssub.s32 %s5329_s22, %s7404_s26 }
   0xa   : > { %p4088_p6 = scmp.ge.s32.totalorder %s5333_s23, 1  ;;  %p170_p7 = scmp.eq.s32.totalorder %s167_s29, 0 }
   0xb   : > { %p5415_p8 = por %p189_p5, %p188_p3  ;;  %p255_p9 = scmp.lt.s32.totalorder %s5333_s23, 3 }
   0xc   : > { %s5421_s6 = scalar_select %p170_p7, %s5321_s20, %s172_s27  }
   0xd   : > { %p256_p10 = pnand %p4088_p6, %p255_p9 }
   0xf   : > { %259 = sbr.rel (%p256_p10) target bundleno = 685 (0x2ad), region = 40 }
  0x14   : > { %p320_p11 = scmp.lt.s32.totalorder %s5325_s21, 1  ;;  %v4626_v0 = vld [vmem:[%s7182_s0 + $0x4] ss:$16 sps:$4 sm:$0xff]   ;;  %v4633_v35 = vld [vmem:[%s7185_s3 + $0x38] sm:$0xff]   ;;  %v4624_v36 = vld [vmem:[%s7182_s0] ss:$16 sps:$4 sm:$0xff]  }
  0x15   : > { %v4629_v1 = vld [vmem:[%s7182_s0 + $0x304] ss:$16 sps:$4 sm:$0xff]   ;;  %1786 = vmatprep.mubr.bf16.mxu0 %v4626_v0  ;;  %v4627_v37 = vld [vmem:[%s7182_s0 + $0x300] ss:$16 sps:$4 sm:$0xff]   ;;  %v4707_v45 = vld [vmem:[%s7185_s3 + $0x28] sm:$0xff]   ;;  %s304_s16 = sand.u32 1, %s5317_s19  }
  0x16   : > { %s5428_s9 = scalar_select %p320_p11, %s5325_s21, 1  ;;  %2026 = vmatprep.mubr.bf16.mxu1 %v4629_v1  ;;  %v4637_v39 = vld [vmem:[%s7182_s0 + $0x24] ss:$16 sps:$4 sm:$0xff]   ;;  %v4641_v46 = vld [vmem:[%s7182_s0 + $0x20] ss:$16 sps:$4 sm:$0xff]   ;;  %v4754_v61 = vld [vmem:[%s7185_s3 + $0x18] sm:$0xff]  }
  0x17   : > { %v4639_v41 = vld [vmem:[%s7182_s0 + $0x324] ss:$16 sps:$4 sm:$0xff]   ;;  %v4642_v47 = vld [vmem:[%s7182_s0 + $0x320] ss:$16 sps:$4 sm:$0xff]   ;;  %s6573_s24 = sshll.u32 %s304_s16, 9  ;;  %s5335_s11 = smov [#allocation3]  }
  0x18   : > { %s4364_s12 = sshll.u32 %s5428_s9, 9  ;;  %v4670_v42 = vld [vmem:[%s7185_s3 + $0x30] sm:$0xff]   ;;  %v4735_v52 = vld [vmem:[%s7185_s3 + $0x20] sm:$0xff]   ;;  %s6593_s25 = scalar_lea.vmem [#allocation3], %s6573_s24 }
  0x19   : > { %s5439_s15 = scalar_lea.vmem %s7183_s1, %s4364_s12  ;;  %v4649_v49 = vld [vmem:[%s7182_s0 + $0x44] ss:$16 sps:$4 sm:$0xff]   ;;  %v4653_v55 = vld [vmem:[%s7182_s0 + $0x40] ss:$16 sps:$4 sm:$0xff]   ;;  %s5810_s17 = scalar_lea.vmem %s7184_s2, %s4364_s12 }
  0x1a   : > { %v4576_v2 = vld [vmem:[%s5439_s15 + $0x74] ss:$8 sps:$4 sm:$0xff]   ;;  %v4578_v3 = vld [vmem:[%s5439_s15 + $0x70] ss:$8 sps:$4 sm:$0xff]   ;;  %v4579_v4 = vld [vmem:[%s5439_s15 + $0x64] ss:$8 sps:$4 sm:$0xff]  }
  0x1b   : > { %1754 = vmatprep.subr.bf16.mxu0 %v4576_v2  ;;  %4487 = vmatprep.subr.bf16.mxu1 %v4576_v2  ;;  %v4581_v5 = vld [vmem:[%s5439_s15 + $0x60] ss:$8 sps:$4 sm:$0xff]   ;;  %v4582_v6 = vld [vmem:[%s5439_s15 + $0x54] ss:$8 sps:$4 sm:$0xff]   ;;  %v4584_v7 = vld [vmem:[%s5439_s15 + $0x50] ss:$8 sps:$4 sm:$0xff]  }
  0x1c   : > { %1755 = vmatpush1.bf16.msra.mxu0 %v4578_v3  ;;  %4503 = vmatpush1.bf16.msra.mxu1 %v4578_v3  ;;  %v4585_v8 = vld [vmem:[%s5439_s15 + $0x44] ss:$8 sps:$4 sm:$0xff]   ;;  %v4587_v9 = vld [vmem:[%s5439_s15 + $0x40] ss:$8 sps:$4 sm:$0xff]   ;;  %v4588_v10 = vld [vmem:[%s5439_s15 + $0x34] ss:$8 sps:$4 sm:$0xff]  }
  0x1d   : > { %1756 = vmatprep.subr.bf16.mxu0 %v4579_v4  ;;  %4488 = vmatprep.subr.bf16.mxu1 %v4579_v4  ;;  %v4590_v11 = vld [vmem:[%s5439_s15 + $0x30] ss:$8 sps:$4 sm:$0xff]   ;;  %v4591_v12 = vld [vmem:[%s5439_s15 + $0x24] ss:$8 sps:$4 sm:$0xff]   ;;  %v4593_v13 = vld [vmem:[%s5439_s15 + $0x20] ss:$8 sps:$4 sm:$0xff]  }
  0x1e   : > { %v4594_v14 = vld [vmem:[%s5439_s15 + $0x14] ss:$8 sps:$4 sm:$0xff]   ;;  %v4596_v15 = vld [vmem:[%s5439_s15 + $0x10] ss:$8 sps:$4 sm:$0xff]   ;;  %v4597_v16 = vld [vmem:[%s5439_s15 + $0x4] ss:$8 sps:$4 sm:$0xff]  }
  0x1f   : > { %v4599_v17 = vld [vmem:[%s5439_s15] ss:$8 sps:$4 sm:$0xff]   ;;  %v4600_v18 = vld [vmem:[%s5439_s15 + $0xf4] ss:$8 sps:$4 sm:$0xff]   ;;  %v4602_v19 = vld [vmem:[%s5439_s15 + $0xf0] ss:$8 sps:$4 sm:$0xff]  }
  0x20   : > { %1757 = vmatpush1.bf16.msra.mxu0 %v4581_v5  ;;  %4504 = vmatpush1.bf16.msra.mxu1 %v4581_v5  ;;  %v4603_v20 = vld [vmem:[%s5439_s15 + $0xe4] ss:$8 sps:$4 sm:$0xff]   ;;  %v4605_v21 = vld [vmem:[%s5439_s15 + $0xe0] ss:$8 sps:$4 sm:$0xff]   ;;  %v4606_v22 = vld [vmem:[%s5439_s15 + $0xd4] ss:$8 sps:$4 sm:$0xff]  }
  0x21   : > { %1758 = vmatprep.subr.bf16.mxu0 %v4582_v6  ;;  %4489 = vmatprep.subr.bf16.mxu1 %v4582_v6  ;;  %v4608_v23 = vld [vmem:[%s5439_s15 + $0xd0] ss:$8 sps:$4 sm:$0xff]   ;;  %v4609_v24 = vld [vmem:[%s5439_s15 + $0xc4] ss:$8 sps:$4 sm:$0xff]   ;;  %v4611_v25 = vld [vmem:[%s5439_s15 + $0xc0] ss:$8 sps:$4 sm:$0xff]  }
  0x22   : > { %v4612_v26 = vld [vmem:[%s5439_s15 + $0xb4] ss:$8 sps:$4 sm:$0xff]   ;;  %v4614_v27 = vld [vmem:[%s5439_s15 + $0xb0] ss:$8 sps:$4 sm:$0xff]   ;;  %v4615_v28 = vld [vmem:[%s5439_s15 + $0xa4] ss:$8 sps:$4 sm:$0xff]  }
  0x23   : > { %v4617_v29 = vld [vmem:[%s5439_s15 + $0xa0] ss:$8 sps:$4 sm:$0xff]   ;;  %v4618_v30 = vld [vmem:[%s5439_s15 + $0x94] ss:$8 sps:$4 sm:$0xff]   ;;  %v4620_v31 = vld [vmem:[%s5439_s15 + $0x90] ss:$8 sps:$4 sm:$0xff]  }
  0x24   : > { %1759 = vmatpush1.bf16.msra.mxu0 %v4584_v7  ;;  %4505 = vmatpush1.bf16.msra.mxu1 %v4584_v7  ;;  %v4621_v32 = vld [vmem:[%s5439_s15 + $0x84] ss:$8 sps:$4 sm:$0xff]   ;;  %v4623_v33 = vld [vmem:[%s5439_s15 + $0x80] ss:$8 sps:$4 sm:$0xff]   ;;  %v4632_v34 = vld [vmem:[%s5439_s15 + $0x174] ss:$8 sps:$4 sm:$0xff]  }
  0x25   : > { %1760 = vmatprep.subr.bf16.mxu0 %v4585_v8  ;;  %4490 = vmatprep.subr.bf16.mxu1 %v4585_v8  ;;  %v4630_v38 = vld [vmem:[%s5439_s15 + $0x170] ss:$8 sps:$4 sm:$0xff]   ;;  %v4636_v40 = vld [vmem:[%s5439_s15 + $0x164] ss:$8 sps:$4 sm:$0xff]   ;;  %v4634_v43 = vld [vmem:[%s5439_s15 + $0x160] ss:$8 sps:$4 sm:$0xff]  }
  0x26   : > { %v4645_v44 = vld [vmem:[%s5439_s15 + $0x154] ss:$8 sps:$4 sm:$0xff]   ;;  %v4643_v48 = vld [vmem:[%s5439_s15 + $0x150] ss:$8 sps:$4 sm:$0xff]   ;;  %v4648_v50 = vld [vmem:[%s5439_s15 + $0x144] ss:$8 sps:$4 sm:$0xff]  }
  0x27   : > { %v4651_v51 = vld [vmem:[%s7182_s0 + $0x344] ss:$16 sps:$4 sm:$0xff]   ;;  %v4646_v53 = vld [vmem:[%s5439_s15 + $0x140] ss:$8 sps:$4 sm:$0xff]   ;;  %v4655_v57 = vld [vmem:[%s5439_s15 + $0x130] ss:$8 sps:$4 sm:$0xff]  }
  0x28   : > { %1761 = vmatpush1.bf16.msra.mxu0 %v4587_v9  ;;  %4506 = vmatpush1.bf16.msra.mxu1 %v4587_v9  ;;  %v4657_v54 = vld [vmem:[%s5439_s15 + $0x134] ss:$8 sps:$4 sm:$0xff]   ;;  %v4654_v56 = vld [vmem:[%s7182_s0 + $0x340] ss:$16 sps:$4 sm:$0xff]   ;;  %v4660_v58 = vld [vmem:[%s5439_s15 + $0x124] ss:$8 sps:$4 sm:$0xff]  }
  0x29   : > { %1762 = vmatprep.subr.bf16.mxu0 %v4588_v10  ;;  %4491 = vmatprep.subr.bf16.mxu1 %v4588_v10  ;;  %v4661_v59 = vld [vmem:[%s7182_s0 + $0x64] ss:$16 sps:$4 sm:$0xff]   ;;  %v4658_v62 = vld [vmem:[%s5439_s15 + $0x120] ss:$8 sps:$4 sm:$0xff]   ;;  %v4667_v3 = vld [vmem:[%s5439_s15 + $0x110] ss:$8 sps:$4 sm:$0xff]  }
  0x2a   : > { %v4663_v60 = vld [vmem:[%s7182_s0 + $0x364] ss:$16 sps:$4 sm:$0xff]   ;;  %v4665_v63 = vld [vmem:[%s7182_s0 + $0x60] ss:$16 sps:$4 sm:$0xff]   ;;  %s4366_s12 = sshll.u32 %s5325_s21, 13  ;;  %s3959_s27 = sshll.u32 %s6593_s25, 4  ;;  %s7132_s27 = int_to_ptr.vmem [resolvable:$true] %s3959_s27 }
  0x2b   : > { %v4669_v0 = vld [vmem:[%s5439_s15 + $0x114] ss:$8 sps:$4 sm:$0xff]   ;;  %v4666_v2 = vld [vmem:[%s7182_s0 + $0x360] ss:$16 sps:$4 sm:$0xff]   ;;  %v4673_v4 = vld [vmem:[%s5439_s15 + $0x104] ss:$8 sps:$4 sm:$0xff]   ;;  %s7130_s8 = scalar_lea.hbm %s7187_s5, %s4366_s12 }
  0x2c   : > { %1763 = vmatpush1.bf16.msra.mxu0 %v4590_v11  ;;  %4507 = vmatpush1.bf16.msra.mxu1 %v4590_v11  ;;  %v4773_v1 = vld [vmem:[%s7185_s3 + $0x10] sm:$0xff]   ;;  %v4671_v7 = vld [vmem:[%s5439_s15 + $0x100] ss:$8 sps:$4 sm:$0xff]   ;;  %s7137_s21 = scalar_lea.sflag [#allocation4], %s304_s16  ;;  %s5257_s10 = scalar_lea.vmem %s7132_s27, 8192 }
  0x2d   : > { %1764 = vmatprep.subr.bf16.mxu0 %v4591_v12  ;;  %4492 = vmatprep.subr.bf16.mxu1 %v4591_v12  ;;  %v4674_v5 = vld [vmem:[%s7182_s0 + $0x84] ss:$16 sps:$4 sm:$0xff]   ;;  %v4678_v8 = vld [vmem:[%s7182_s0 + $0x80] ss:$16 sps:$4 sm:$0xff]   ;;  %v4792_v12 = vld [vmem:[%s7185_s3 + $0x8] sm:$0xff]   ;;  %p5258_p12 = scmp.ne.s32.totalorder %s7132_s27, %s5257_s10  ;;  %s5261_s13 = sshll.u32 %s5335_s11, 4  ;;  %s5262_s13 = int_to_ptr.vmem [resolvable:$false] %s5261_s13 }
  0x2e   : > { %v4676_v6 = vld [vmem:[%s7182_s0 + $0x384] ss:$16 sps:$4 sm:$0xff]   ;;  %v4679_v9 = vld [vmem:[%s7182_s0 + $0x380] ss:$16 sps:$4 sm:$0xff]   ;;  %p5264_p1 = scmp.lt.s32.totalorder %s7132_s27, %s5262_s13 }
  0x2f   : > { %v4682_v10 = vld [vmem:[%s5439_s15 + $0x1f4] ss:$8 sps:$4 sm:$0xff]   ;;  %v4680_v11 = vld [vmem:[%s5439_s15 + $0x1f0] ss:$8 sps:$4 sm:$0xff]   ;;  %p5259_p13 = pnand %p5258_p12, %p5408_p4 }
  0x30   : > { %1765 = vmatpush1.bf16.msra.mxu0 %v4593_v13  ;;  %4508 = vmatpush1.bf16.msra.mxu1 %v4593_v13  ;;  %v4686_v13 = vld [vmem:[%s7182_s0 + $0xa4] ss:$16 sps:$4 sm:$0xff]  }
  0x31   : > { %1766 = vmatprep.subr.bf16.mxu0 %v4594_v14  ;;  %4493 = vmatprep.subr.bf16.mxu1 %v4594_v14  ;;  %v4685_v14 = vld [vmem:[%s5439_s15 + $0x1e4] ss:$8 sps:$4 sm:$0xff]   ;;  %p5260_p0 = pneg %p5259_p13 }
  0x34   : > { %1767 = vmatpush1.bf16.msra.mxu0 %v4596_v15  ;;  %4509 = vmatpush1.bf16.msra.mxu1 %v4596_v15  ;;  %v4688_v15 = vld [vmem:[%s7182_s0 + $0x3a4] ss:$16 sps:$4 sm:$0xff]  }
  0x35   : > { %1768 = vmatprep.subr.bf16.mxu0 %v4597_v16  ;;  %4494 = vmatprep.subr.bf16.mxu1 %v4597_v16  ;;  %v4683_v16 = vld [vmem:[%s5439_s15 + $0x1e0] ss:$8 sps:$4 sm:$0xff]  }
  0x38   : > { %1769 = vmatpush1.bf16.msra.mxu0 %v4599_v17  ;;  %4510 = vmatpush1.bf16.msra.mxu1 %v4599_v17  ;;  %v4690_v17 = vld [vmem:[%s7182_s0 + $0xa0] ss:$16 sps:$4 sm:$0xff]  }
  0x39   : > { %1770 = vmatprep.subr.bf16.mxu0 %v4600_v18  ;;  %4495 = vmatprep.subr.bf16.mxu1 %v4600_v18  ;;  %v4691_v18 = vld [vmem:[%s7182_s0 + $0x3a0] ss:$16 sps:$4 sm:$0xff]  }
  0x3c   : > { %1771 = vmatpush2.bf16.msra.mxu0 %v4602_v19  ;;  %4511 = vmatpush2.bf16.msra.mxu1 %v4602_v19  ;;  %v4694_v19 = vld [vmem:[%s5439_s15 + $0x1d4] ss:$8 sps:$4 sm:$0xff]  }
  0x3d   : > { %1772 = vmatprep.subr.bf16.mxu0 %v4603_v20  ;;  %4496 = vmatprep.subr.bf16.mxu1 %v4603_v20  ;;  %v4692_v20 = vld [vmem:[%s5439_s15 + $0x1d0] ss:$8 sps:$4 sm:$0xff]  }
  0x40   : > { %1773 = vmatpush2.bf16.msra.mxu0 %v4605_v21  ;;  %4512 = vmatpush2.bf16.msra.mxu1 %v4605_v21  ;;  %v4698_v21 = vld [vmem:[%s7182_s0 + $0xc4] ss:$16 sps:$4 sm:$0xff]  }
  0x41   : > { %1774 = vmatprep.subr.bf16.mxu0 %v4606_v22  ;;  %4497 = vmatprep.subr.bf16.mxu1 %v4606_v22  ;;  %v4697_v22 = vld [vmem:[%s5439_s15 + $0x1c4] ss:$8 sps:$4 sm:$0xff]  }
  0x44   : > { %1775 = vmatpush2.bf16.msra.mxu0 %v4608_v23  ;;  %4513 = vmatpush2.bf16.msra.mxu1 %v4608_v23  ;;  %v4700_v23 = vld [vmem:[%s7182_s0 + $0x3c4] ss:$16 sps:$4 sm:$0xff]  }
  0x45   : > { %1776 = vmatprep.subr.bf16.mxu0 %v4609_v24  ;;  %4498 = vmatprep.subr.bf16.mxu1 %v4609_v24  ;;  %v4811_v24 = vld [vmem:[%s7185_s3] sm:$0xff]  }
  0x48   : > { %1777 = vmatpush2.bf16.msra.mxu0 %v4611_v25  ;;  %4514 = vmatpush2.bf16.msra.mxu1 %v4611_v25  ;;  %v4695_v25 = vld [vmem:[%s5439_s15 + $0x1c0] ss:$8 sps:$4 sm:$0xff]  }
  0x49   : > { %1778 = vmatprep.subr.bf16.mxu0 %v4612_v26  ;;  %4499 = vmatprep.subr.bf16.mxu1 %v4612_v26  ;;  %v4706_v26 = vld [vmem:[%s5439_s15 + $0x1b4] ss:$8 sps:$4 sm:$0xff]  }
  0x4c   : > { %1779 = vmatpush2.bf16.msra.mxu0 %v4614_v27  ;;  %4515 = vmatpush2.bf16.msra.mxu1 %v4614_v27  ;;  %v4702_v27 = vld [vmem:[%s7182_s0 + $0xc0] ss:$16 sps:$4 sm:$0xff]  }
  0x4d   : > { %1780 = vmatprep.subr.bf16.mxu0 %v4615_v28  ;;  %4500 = vmatprep.subr.bf16.mxu1 %v4615_v28  ;;  %v4703_v28 = vld [vmem:[%s7182_s0 + $0x3c0] ss:$16 sps:$4 sm:$0xff]  }
  0x50   : > { %1781 = vmatpush2.bf16.msra.mxu0 %v4617_v29  ;;  %4516 = vmatpush2.bf16.msra.mxu1 %v4617_v29  ;;  %v4704_v29 = vld [vmem:[%s5439_s15 + $0x1b0] ss:$8 sps:$4 sm:$0xff]  }
  0x51   : > { %1782 = vmatprep.subr.bf16.mxu0 %v4618_v30  ;;  %4501 = vmatprep.subr.bf16.mxu1 %v4618_v30  ;;  %v4711_v30 = vld [vmem:[%s7182_s0 + $0xe4] ss:$16 sps:$4 sm:$0xff]  }
  0x54   : > { %1783 = vmatpush2.bf16.msra.mxu0 %v4620_v31  ;;  %4517 = vmatpush2.bf16.msra.mxu1 %v4620_v31  ;;  %v4710_v31 = vld [vmem:[%s5439_s15 + $0x1a4] ss:$8 sps:$4 sm:$0xff]  }
  0x55   : > { %1784 = vmatprep.subr.bf16.mxu0 %v4621_v32  ;;  %4502 = vmatprep.subr.bf16.mxu1 %v4621_v32  ;;  %v4713_v32 = vld [vmem:[%s7182_s0 + $0x3e4] ss:$16 sps:$4 sm:$0xff]  }
  0x58   : > { %1785 = vmatpush2.bf16.msra.mxu0 %v4623_v33  ;;  %4518 = vmatpush2.bf16.msra.mxu1 %v4623_v33  ;;  %v4708_v33 = vld [vmem:[%s5439_s15 + $0x1a0] ss:$8 sps:$4 sm:$0xff]  }
  0x59   : > { %2107 = vmatprep.subr.bf16.mxu1 %v4632_v34  ;;  %4407 = vmatprep.subr.bf16.mxu0 %v4633_v35  ;;  %v4719_v34 = vld [vmem:[%s5439_s15 + $0x194] ss:$8 sps:$4 sm:$0xff]  }
  0x5b   : > { %1787 = vmatmul.mubr.bf16.vlgmr.msra.gmra.mxu0 %v4624_v36  ;;  %2027 = vmatmul.mubr.bf16.vlgmr.msra.gmra.mxu1 %v4627_v37  ;;  %v4716_v36 = vld [vmem:[%s7182_s0 + $0x3e0] ss:$16 sps:$4 sm:$0xff]  }
  0x5c   : > { %2108 = vmatpush1.bf16.msra.mxu1 %v4630_v38  ;;  %4408 = vmatpush3.bf16.msra.mxu0 %v4633_v35  ;;  %v4715_v35 = vld [vmem:[%s7182_s0 + $0xe0] ss:$16 sps:$4 sm:$0xff]   ;;  %v4723_v38 = vld [vmem:[%s7182_s0 + $0x104] ss:$16 sps:$4 sm:$0xff]  }
  0x5d   : > { %2109 = vmatprep.subr.bf16.mxu1 %v4636_v40  ;;  %1796 = vmatprep.mubr.bf16.mxu0 %v4637_v39  ;;  %v4717_v37 = vld [vmem:[%s5439_s15 + $0x190] ss:$8 sps:$4 sm:$0xff]   ;;  %v4722_v39 = vld [vmem:[%s5439_s15 + $0x184] ss:$8 sps:$4 sm:$0xff]  }
  0x5e   : > { %2036 = vmatprep.mubr.bf16.mxu1 %v4639_v41  ;;  %4409 = vmatprep.subr.bf16.mxu0 %v4670_v42  ;;  %v4727_v40 = vld [vmem:[%s7182_s0 + $0xc] ss:$16 sps:$4 sm:$0xff]   ;;  %v4720_v41 = vld [vmem:[%s5439_s15 + $0x180] ss:$8 sps:$4 sm:$0xff]  }
  0x60   : > { %2110 = vmatpush1.bf16.msra.mxu1 %v4634_v43  ;;  %4410 = vmatpush3.bf16.msra.mxu0 %v4670_v42  ;;  %v4725_v42 = vld [vmem:[%s7182_s0 + $0x8] ss:$16 sps:$4 sm:$0xff]   ;;  %v4728_v43 = vld [vmem:[%s7182_s0 + $0x100] ss:$16 sps:$4 sm:$0xff]  }
  0x61   : > { %2111 = vmatprep.subr.bf16.mxu1 %v4645_v44  ;;  %4411 = vmatprep.subr.bf16.mxu0 %v4707_v45  ;;  %v4729_v44 = vld [vmem:[%s7182_s0 + $0x124] ss:$16 sps:$4 sm:$0xff]  }
  0x63   : > { %1797 = vmatmul.mubr.bf16.gmra.mxu0 %v4641_v46  ;;  %2037 = vmatmul.mubr.bf16.gmra.mxu1 %v4642_v47  ;;  %v4733_v46 = vld [vmem:[%s7182_s0 + $0x120] ss:$16 sps:$4 sm:$0xff]   ;;  %v4734_v47 = vld [vmem:[%s7182_s0 + $0x28] ss:$16 sps:$4 sm:$0xff]  }
  0x64   : > { %2112 = vmatpush1.bf16.msra.mxu1 %v4643_v48  ;;  %1806 = vmatprep.mubr.bf16.mxu0 %v4649_v49  ;;  %v4736_v48 = vld [vmem:[%s7182_s0 + $0x144] ss:$16 sps:$4 sm:$0xff]   ;;  %v4738_v49 = vld [vmem:[%s7182_s0 + $0x4c] ss:$16 sps:$4 sm:$0xff]  }
  0x65   : > { %2113 = vmatprep.subr.bf16.mxu1 %v4648_v50  ;;  %2046 = vmatprep.mubr.bf16.mxu1 %v4651_v51  ;;  %v4740_v50 = vld [vmem:[%s7182_s0 + $0x140] ss:$16 sps:$4 sm:$0xff]   ;;  %v4741_v51 = vld [vmem:[%s7182_s0 + $0x48] ss:$16 sps:$4 sm:$0xff]  }
  0x66   : > { %4412 = vmatpush3.bf16.msra.mxu0 %v4707_v45  ;;  %v4731_v45 = vld [vmem:[%s7182_s0 + $0x2c] ss:$16 sps:$4 sm:$0xff]  }
  0x67   : > { %4413 = vmatprep.subr.bf16.mxu0 %v4735_v52 }
  0x68   : > { %2114 = vmatpush1.bf16.msra.mxu1 %v4646_v53  ;;  %v4744_v53 = vld [vmem:[%s7182_s0 + $0x6c] ss:$16 sps:$4 sm:$0xff]  }
  0x69   : > { %2115 = vmatprep.subr.bf16.mxu1 %v4657_v54  ;;  %v4746_v54 = vld [vmem:[%s7182_s0 + $0x160] ss:$16 sps:$4 sm:$0xff]  }
  0x6a   : > { %4414 = vmatpush3.bf16.msra.mxu0 %v4735_v52  ;;  %v4742_v52 = vld [vmem:[%s7182_s0 + $0x164] ss:$16 sps:$4 sm:$0xff]  }
  0x6b   : > { %1807 = vmatmul.mubr.bf16.gmra.mxu0 %v4653_v55  ;;  %2047 = vmatmul.mubr.bf16.gmra.mxu1 %v4654_v56  ;;  %v4747_v55 = vld [vmem:[%s7182_s0 + $0x68] ss:$16 sps:$4 sm:$0xff]   ;;  %v4748_v56 = vld [vmem:[%s7182_s0 + $0x184] ss:$16 sps:$4 sm:$0xff]  }
  0x6c   : > { %2116 = vmatpush1.bf16.msra.mxu1 %v4655_v57  ;;  %1816 = vmatprep.mubr.bf16.mxu0 %v4661_v59  ;;  %v4750_v57 = vld [vmem:[%s7182_s0 + $0x8c] ss:$16 sps:$4 sm:$0xff]   ;;  %v4753_v59 = vld [vmem:[%s7182_s0 + $0x88] ss:$16 sps:$4 sm:$0xff]  }
  0x6d   : > { %2117 = vmatprep.subr.bf16.mxu1 %v4660_v58  ;;  %2056 = vmatprep.mubr.bf16.mxu1 %v4663_v60  ;;  %v4752_v58 = vld [vmem:[%s7182_s0 + $0x180] ss:$16 sps:$4 sm:$0xff]   ;;  %v4755_v60 = vld [vmem:[%s7182_s0 + $0x1a4] ss:$16 sps:$4 sm:$0xff]  }
  0x6e   : > { %4415 = vmatprep.subr.bf16.mxu0 %v4754_v61 }
  0x6f   : > { %4416 = vmatpush3.bf16.msra.mxu0 %v4754_v61  ;;  %v4757_v61 = vld [vmem:[%s7182_s0 + $0xac] ss:$16 sps:$4 sm:$0xff]  }
  0x70   : > { %2118 = vmatpush1.bf16.msra.mxu1 %v4658_v62  ;;  %4417 = vmatprep.subr.bf16.mxu0 %v4773_v1  ;;  %v4759_v62 = vld [vmem:[%s7182_s0 + $0x1a0] ss:$16 sps:$4 sm:$0xff]  }
  0x71   : > { %2119 = vmatprep.subr.bf16.mxu1 %v4669_v0  ;;  %v4761_v0 = vld [vmem:[%s7182_s0 + $0x1c4] ss:$16 sps:$4 sm:$0xff]  }
  0x73   : > { %1817 = vmatmul.mubr.bf16.gmra.mxu0 %v4665_v63  ;;  %2057 = vmatmul.mubr.bf16.gmra.mxu1 %v4666_v2  ;;  %v4760_v63 = vld [vmem:[%s7182_s0 + $0xa8] ss:$16 sps:$4 sm:$0xff]   ;;  %v4765_v2 = vld [vmem:[%s7182_s0 + $0x1c0] ss:$16 sps:$4 sm:$0xff]  }
  0x74   : > { %2120 = vmatpush1.bf16.msra.mxu1 %v4667_v3  ;;  %1826 = vmatprep.mubr.bf16.mxu0 %v4674_v5  ;;  %v4766_v3 = vld [vmem:[%s7182_s0 + $0xc8] ss:$16 sps:$4 sm:$0xff]   ;;  %v4769_v5 = vld [vmem:[%s7182_s0 + $0xec] ss:$16 sps:$4 sm:$0xff]  }
  0x75   : > { %2121 = vmatprep.subr.bf16.mxu1 %v4673_v4  ;;  %2066 = vmatprep.mubr.bf16.mxu1 %v4676_v6  ;;  %v4767_v4 = vld [vmem:[%s7182_s0 + $0x1e4] ss:$16 sps:$4 sm:$0xff]   ;;  %v4771_v6 = vld [vmem:[%s7182_s0 + $0x1e0] ss:$16 sps:$4 sm:$0xff]  }
  0x76   : > { %4418 = vmatpush3.bf16.msra.mxu0 %v4773_v1  ;;  %v4763_v1 = vld [vmem:[%s7182_s0 + $0xcc] ss:$16 sps:$4 sm:$0xff]  }
  0x77   : > { %4419 = vmatprep.subr.bf16.mxu0 %v4792_v12 }
  0x78   : > { %2122 = vmatpush1.bf16.msra.mxu1 %v4671_v7  ;;  %v4772_v7 = vld [vmem:[%s7182_s0 + $0xe8] ss:$16 sps:$4 sm:$0xff]  }
  0x79   : > { %2123 = vmatprep.subr.bf16.mxu1 %v4682_v10  ;;  %v4778_v10 = vld [vmem:[%s7182_s0 + $0x200] ss:$16 sps:$4 sm:$0xff]  }
  0x7a   : > { %4420 = vmatpush3.bf16.msra.mxu0 %v4792_v12  ;;  %v4780_v12 = vld [vmem:[%s7182_s0 + $0x224] ss:$16 sps:$4 sm:$0xff]  }
  0x7b   : > { %1827 = vmatmul.mubr.bf16.gmra.mxu0 %v4678_v8  ;;  %2067 = vmatmul.mubr.bf16.gmra.mxu1 %v4679_v9  ;;  %v4774_v8 = vld [vmem:[%s7182_s0 + $0x204] ss:$16 sps:$4 sm:$0xff]   ;;  %v4776_v9 = vld [vmem:[%s7182_s0 + $0x10c] ss:$16 sps:$4 sm:$0xff]  }
  0x7c   : > { %2124 = vmatpush2.bf16.msra.mxu1 %v4680_v11  ;;  %1836 = vmatprep.mubr.bf16.mxu0 %v4686_v13  ;;  %v4779_v11 = vld [vmem:[%s7182_s0 + $0x108] ss:$16 sps:$4 sm:$0xff]   ;;  %v4782_v13 = vld [vmem:[%s7182_s0 + $0x12c] ss:$16 sps:$4 sm:$0xff]  }
  0x7d   : > { %2125 = vmatprep.subr.bf16.mxu1 %v4685_v14  ;;  %2076 = vmatprep.mubr.bf16.mxu1 %v4688_v15  ;;  %v4784_v14 = vld [vmem:[%s7182_s0 + $0x220] ss:$16 sps:$4 sm:$0xff]   ;;  %v4785_v15 = vld [vmem:[%s7182_s0 + $0x128] ss:$16 sps:$4 sm:$0xff]  }
  0x7e   : > { %4421 = vmatprep.subr.bf16.mxu0 %v4811_v24 }
  0x7f   : > { %4422 = vmatpush3.bf16.msra.mxu0 %v4811_v24  ;;  %v4799_v24 = vld [vmem:[%s7182_s0 + $0x284] ss:$16 sps:$4 sm:$0xff]  }
  0x80   : > { %2126 = vmatpush2.bf16.msra.mxu1 %v4683_v16  ;;  %v4786_v16 = vld [vmem:[%s7182_s0 + $0x244] ss:$16 sps:$4 sm:$0xff]  }
  0x81   : > { %2127 = vmatprep.subr.bf16.mxu1 %v4694_v19  ;;  %v4791_v19 = vld [vmem:[%s7182_s0 + $0x148] ss:$16 sps:$4 sm:$0xff]  }
  0x83   : > { %1837 = vmatmul.mubr.bf16.gmra.mxu0 %v4690_v17  ;;  %2077 = vmatmul.mubr.bf16.gmra.mxu1 %v4691_v18  ;;  %v4788_v17 = vld [vmem:[%s7182_s0 + $0x14c] ss:$16 sps:$4 sm:$0xff]   ;;  %v4790_v18 = vld [vmem:[%s7182_s0 + $0x240] ss:$16 sps:$4 sm:$0xff]  }
  0x84   : > { %2128 = vmatpush2.bf16.msra.mxu1 %v4692_v20  ;;  %1846 = vmatprep.mubr.bf16.mxu0 %v4698_v21  ;;  %v4793_v20 = vld [vmem:[%s7182_s0 + $0x264] ss:$16 sps:$4 sm:$0xff]   ;;  %v4795_v21 = vld [vmem:[%s7182_s0 + $0x16c] ss:$16 sps:$4 sm:$0xff]  }
  0x85   : > { %2129 = vmatprep.subr.bf16.mxu1 %v4697_v22  ;;  %2086 = vmatprep.mubr.bf16.mxu1 %v4700_v23  ;;  %v4797_v22 = vld [vmem:[%s7182_s0 + $0x260] ss:$16 sps:$4 sm:$0xff]   ;;  %v4798_v23 = vld [vmem:[%s7182_s0 + $0x168] ss:$16 sps:$4 sm:$0xff]  }
  0x88   : > { %2130 = vmatpush2.bf16.msra.mxu1 %v4695_v25  ;;  %v4801_v25 = vld [vmem:[%s7182_s0 + $0x18c] ss:$16 sps:$4 sm:$0xff]  }
  0x89   : > { %2131 = vmatprep.subr.bf16.mxu1 %v4706_v26  ;;  %v4803_v26 = vld [vmem:[%s7182_s0 + $0x280] ss:$16 sps:$4 sm:$0xff]  }
  0x8b   : > { %1847 = vmatmul.mubr.bf16.gmra.mxu0 %v4702_v27  ;;  %2087 = vmatmul.mubr.bf16.gmra.mxu1 %v4703_v28  ;;  %v4804_v27 = vld [vmem:[%s7182_s0 + $0x188] ss:$16 sps:$4 sm:$0xff]   ;;  %v4805_v28 = vld [vmem:[%s7182_s0 + $0x2a4] ss:$16 sps:$4 sm:$0xff]  }
  0x8c   : > { %2132 = vmatpush2.bf16.msra.mxu1 %v4704_v29  ;;  %1856 = vmatprep.mubr.bf16.mxu0 %v4711_v30  ;;  %v4807_v29 = vld [vmem:[%s7182_s0 + $0x1ac] ss:$16 sps:$4 sm:$0xff]   ;;  %v4809_v30 = vld [vmem:[%s7182_s0 + $0x2a0] ss:$16 sps:$4 sm:$0xff]  }
  0x8d   : > { %2133 = vmatprep.subr.bf16.mxu1 %v4710_v31  ;;  %2096 = vmatprep.mubr.bf16.mxu1 %v4713_v32  ;;  %v4810_v31 = vld [vmem:[%s7182_s0 + $0x1a8] ss:$16 sps:$4 sm:$0xff]   ;;  %v4812_v32 = vld [vmem:[%s7182_s0 + $0x2c4] ss:$16 sps:$4 sm:$0xff]  }
  0x90   : > { %2134 = vmatpush2.bf16.msra.mxu1 %v4708_v33  ;;  %v4814_v33 = vld [vmem:[%s7182_s0 + $0x1cc] ss:$16 sps:$4 sm:$0xff]  }
  0x91   : > { %2135 = vmatprep.subr.bf16.mxu1 %v4719_v34  ;;  %v4816_v34 = vld [vmem:[%s7182_s0 + $0x2c0] ss:$16 sps:$4 sm:$0xff]  }
  0x93   : > { %1857 = vmatmul.mubr.bf16.gmra.mxu0 %v4715_v35  ;;  %2097 = vmatmul.mubr.bf16.gmra.mxu1 %v4716_v36  ;;  %v4817_v35 = vld [vmem:[%s7182_s0 + $0x1c8] ss:$16 sps:$4 sm:$0xff]   ;;  %v4818_v36 = vld [vmem:[%s7182_s0 + $0x2e4] ss:$16 sps:$4 sm:$0xff]  }
  0x94   : > { %2136 = vmatpush2.bf16.msra.mxu1 %v4717_v37  ;;  %1866 = vmatprep.mubr.bf16.mxu0 %v4723_v38  ;;  %v4820_v37 = vld [vmem:[%s7182_s0 + $0x1ec] ss:$16 sps:$4 sm:$0xff]   ;;  %v2719_v38 = vld [vmem:[%s5810_s17] sm:$0xff] }
  0x95   : > { %2137 = vmatprep.subr.bf16.mxu1 %v4722_v39  ;;  %2139 = vmatprep.mubr.bf16.mxu1 %v4727_v40  ;;  %v2720_v39 = vld [vmem:[%s5810_s17 + $0x8] sm:$0xff]  ;;  %v4822_v40 = vld [vmem:[%s7182_s0 + $0x2e0] ss:$16 sps:$4 sm:$0xff]  }
  0x98   : > { %2138 = vmatpush2.bf16.msra.mxu1 %v4720_v41  ;;  %v4823_v41 = vld [vmem:[%s7182_s0 + $0x1e8] ss:$16 sps:$4 sm:$0xff]  }
  0x9b   : > { %1867 = vmatmul.mubr.bf16.gmra.mxu0 %v4728_v43  ;;  %2140 = vmatmul.mubr.bf16.vlgmr.msra.gmra.mxu1 %v4725_v42  ;;  %v4824_v42 = vld [vmem:[%s7182_s0 + $0x20c] ss:$16 sps:$4 sm:$0xff]   ;;  %v2783_v43 = vpack.c.bf16 %v2720_v39, %v2719_v38  ;;  %v2737_v38 = vld [vmem:[%s5810_s17 + $0x90] sm:$0xff] }
  0x9c   : > { %1876 = vmatprep.mubr.bf16.mxu0 %v4729_v44  ;;  %2149 = vmatprep.mubr.bf16.mxu1 %v4731_v45  ;;  %v2721_v44 = vld [vmem:[%s5810_s17 + $0x10] sm:$0xff]  ;;  %v2722_v45 = vld [vmem:[%s5810_s17 + $0x18] sm:$0xff] }
  0x9d   : > { %v2738_v39 = vld [vmem:[%s5810_s17 + $0x98] sm:$0xff] }
  0xa3   : > { %1877 = vmatmul.mubr.bf16.gmra.mxu0 %v4733_v46  ;;  %2150 = vmatmul.mubr.bf16.gmra.mxu1 %v4734_v47  ;;  %v2723_v46 = vld [vmem:[%s5810_s17 + $0x20] sm:$0xff]  ;;  %v2724_v47 = vld [vmem:[%s5810_s17 + $0x28] sm:$0xff] }
  0xa4   : > { %1886 = vmatprep.mubr.bf16.mxu0 %v4736_v48  ;;  %2159 = vmatprep.mubr.bf16.mxu1 %v4738_v49  ;;  %v4826_v48 = vld [vmem:[%s7182_s0 + $0x208] ss:$16 sps:$4 sm:$0xff]   ;;  %v2784_v49 = vpack.c.bf16 %v2722_v45, %v2721_v44 }
  0xab   : > { %1887 = vmatmul.mubr.bf16.gmra.mxu0 %v4740_v50  ;;  %2160 = vmatmul.mubr.bf16.gmra.mxu1 %v4741_v51  ;;  %v4827_v50 = vld [vmem:[%s7182_s0 + $0x22c] ss:$16 sps:$4 sm:$0xff]   ;;  %v2785_v51 = vpack.c.bf16 %v2724_v47, %v2723_v46  ;;  %v4836_v46 = vld [vmem:[%s7182_s0 + $0x288] ss:$16 sps:$4 sm:$0xff]   ;;  %v2792_v47 = vpack.c.bf16 %v2738_v39, %v2737_v38 }
  0xac   : > { %1896 = vmatprep.mubr.bf16.mxu0 %v4742_v52  ;;  %2169 = vmatprep.mubr.bf16.mxu1 %v4744_v53 }
  0xb3   : > { %1897 = vmatmul.mubr.bf16.gmra.mxu0 %v4746_v54  ;;  %2170 = vmatmul.mubr.bf16.gmra.mxu1 %v4747_v55  ;;  %v2725_v54 = vld [vmem:[%s5810_s17 + $0x30] sm:$0xff]  ;;  %v2726_v55 = vld [vmem:[%s5810_s17 + $0x38] sm:$0xff] }
  0xb4   : > { %1906 = vmatprep.mubr.bf16.mxu0 %v4748_v56  ;;  %2179 = vmatprep.mubr.bf16.mxu1 %v4750_v57 }
  0xbb   : > { %1907 = vmatmul.mubr.bf16.gmra.mxu0 %v4752_v58  ;;  %2180 = vmatmul.mubr.bf16.gmra.mxu1 %v4753_v59  ;;  %v2727_v58 = vld [vmem:[%s5810_s17 + $0x40] sm:$0xff]  ;;  %v2728_v59 = vld [vmem:[%s5810_s17 + $0x48] sm:$0xff] }
  0xbc   : > { %1916 = vmatprep.mubr.bf16.mxu0 %v4755_v60  ;;  %2189 = vmatprep.mubr.bf16.mxu1 %v4757_v61 }
  0xc3   : > { %1917 = vmatmul.mubr.bf16.gmra.mxu0 %v4759_v62  ;;  %2190 = vmatmul.mubr.bf16.gmra.mxu1 %v4760_v63  ;;  %v4829_v62 = vld [vmem:[%s7182_s0 + $0x228] ss:$16 sps:$4 sm:$0xff]   ;;  %v2786_v63 = vpack.c.bf16 %v2726_v55, %v2725_v54 }
  0xc4   : > { %1926 = vmatprep.mubr.bf16.mxu0 %v4761_v0  ;;  %2199 = vmatprep.mubr.bf16.mxu1 %v4763_v1  ;;  %v4830_v0 = vld [vmem:[%s7182_s0 + $0x24c] ss:$16 sps:$4 sm:$0xff]   ;;  %v2787_v1 = vpack.c.bf16 %v2728_v59, %v2727_v58  ;;  %v2741_v58 = vld [vmem:[%s5810_s17 + $0xb0] sm:$0xff] }
  0xc5   : > { %v2742_v59 = vld [vmem:[%s5810_s17 + $0xb8] sm:$0xff] }
  0xcb   : > { %1927 = vmatmul.mubr.bf16.gmra.mxu0 %v4765_v2  ;;  %2200 = vmatmul.mubr.bf16.gmra.mxu1 %v4766_v3 }
  0xcc   : > { %1936 = vmatprep.mubr.bf16.mxu0 %v4767_v4  ;;  %2209 = vmatprep.mubr.bf16.mxu1 %v4769_v5 }
  0xd3   : > { %1937 = vmatmul.mubr.bf16.gmra.mxu0 %v4771_v6  ;;  %2210 = vmatmul.mubr.bf16.gmra.mxu1 %v4772_v7  ;;  %v2729_v6 = vld [vmem:[%s5810_s17 + $0x50] sm:$0xff]  ;;  %v2730_v7 = vld [vmem:[%s5810_s17 + $0x58] sm:$0xff] }
  0xd4   : > { %1946 = vmatprep.mubr.bf16.mxu0 %v4774_v8  ;;  %2219 = vmatprep.mubr.bf16.mxu1 %v4776_v9 }
  0xdb   : > { %1947 = vmatmul.mubr.bf16.gmra.mxu0 %v4778_v10  ;;  %2220 = vmatmul.mubr.bf16.gmra.mxu1 %v4779_v11  ;;  %v2731_v10 = vld [vmem:[%s5810_s17 + $0x60] sm:$0xff]  ;;  %v2732_v11 = vld [vmem:[%s5810_s17 + $0x68] sm:$0xff] }
  0xdc   : > { %1956 = vmatprep.mubr.bf16.mxu0 %v4780_v12  ;;  %2229 = vmatprep.mubr.bf16.mxu1 %v4782_v13 }
  0xe3   : > { %1957 = vmatmul.mubr.bf16.gmra.mxu0 %v4784_v14  ;;  %2230 = vmatmul.mubr.bf16.gmra.mxu1 %v4785_v15  ;;  %v4832_v14 = vld [vmem:[%s7182_s0 + $0x248] ss:$16 sps:$4 sm:$0xff]   ;;  %v2788_v15 = vpack.c.bf16 %v2730_v7, %v2729_v6 }
  0xe4   : > { %1966 = vmatprep.mubr.bf16.mxu0 %v4786_v16  ;;  %2239 = vmatprep.mubr.bf16.mxu1 %v4788_v17  ;;  %v4833_v16 = vld [vmem:[%s7182_s0 + $0x26c] ss:$16 sps:$4 sm:$0xff]   ;;  %v2789_v17 = vpack.c.bf16 %v2732_v11, %v2731_v10  ;;  %v4839_v10 = vld [vmem:[%s7182_s0 + $0x2a8] ss:$16 sps:$4 sm:$0xff]   ;;  %v2794_v11 = vpack.c.bf16 %v2742_v59, %v2741_v58 }
  0xeb   : > { %1967 = vmatmul.mubr.bf16.gmra.mxu0 %v4790_v18  ;;  %2240 = vmatmul.mubr.bf16.gmra.mxu1 %v4791_v19 }
  0xec   : > { %1976 = vmatprep.mubr.bf16.mxu0 %v4793_v20  ;;  %2249 = vmatprep.mubr.bf16.mxu1 %v4795_v21 }
  0xf3   : > { %1977 = vmatmul.mubr.bf16.gmra.mxu0 %v4797_v22  ;;  %2250 = vmatmul.mubr.bf16.gmra.mxu1 %v4798_v23  ;;  %v2733_v22 = vld [vmem:[%s5810_s17 + $0x70] sm:$0xff]  ;;  %v2734_v23 = vld [vmem:[%s5810_s17 + $0x78] sm:$0xff] }
  0xf4   : > { %1986 = vmatprep.mubr.bf16.mxu0 %v4799_v24  ;;  %2259 = vmatprep.mubr.bf16.mxu1 %v4801_v25 }
  0xfb   : > { %1987 = vmatmul.mubr.bf16.gmra.mxu0 %v4803_v26  ;;  %2260 = vmatmul.mubr.bf16.gmra.mxu1 %v4804_v27  ;;  %v2735_v26 = vld [vmem:[%s5810_s17 + $0x80] sm:$0xff]  ;;  %v2736_v27 = vld [vmem:[%s5810_s17 + $0x88] sm:$0xff] }
  0xfc   : > { %1996 = vmatprep.mubr.bf16.mxu0 %v4805_v28  ;;  %2269 = vmatprep.mubr.bf16.mxu1 %v4807_v29 }
 0x103   : > { %1997 = vmatmul.mubr.bf16.gmra.mxu0 %v4809_v30  ;;  %2270 = vmatmul.mubr.bf16.gmra.mxu1 %v4810_v31  ;;  %v4835_v30 = vld [vmem:[%s7182_s0 + $0x268] ss:$16 sps:$4 sm:$0xff]   ;;  %v2790_v31 = vpack.c.bf16 %v2734_v23, %v2733_v22 }
 0x104   : > { %2006 = vmatprep.mubr.bf16.mxu0 %v4812_v32  ;;  %2279 = vmatprep.mubr.bf16.mxu1 %v4814_v33  ;;  %v4838_v32 = vld [vmem:[%s7182_s0 + $0x28c] ss:$16 sps:$4 sm:$0xff]   ;;  %v2791_v33 = vpack.c.bf16 %v2736_v27, %v2735_v26  ;;  %v2745_v26 = vld [vmem:[%s5810_s17 + $0xd0] sm:$0xff] }
 0x105   : > { %v2746_v27 = vld [vmem:[%s5810_s17 + $0xd8] sm:$0xff] }
 0x10b   : > { %2007 = vmatmul.mubr.bf16.gmra.mxu0 %v4816_v34  ;;  %2280 = vmatmul.mubr.bf16.gmra.mxu1 %v4817_v35 }
 0x10c   : > { %2016 = vmatprep.mubr.bf16.mxu0 %v4818_v36  ;;  %2289 = vmatprep.mubr.bf16.mxu1 %v4820_v37 }
 0x113   : > { %2017 = vmatmul.mubr.bf16.gmra.mxu0 %v4822_v40  ;;  %2290 = vmatmul.mubr.bf16.gmra.mxu1 %v4823_v41 }
 0x114   : > { %2299 = vmatprep.mubr.bf16.mxu1 %v4824_v42  ;;  %4423 = vmatprep.mubr.bf16.mxu0 %v2783_v43  ;;  %v2739_v42 = vld [vmem:[%s5810_s17 + $0xa0] sm:$0xff]  ;;  %v2740_v43 = vld [vmem:[%s5810_s17 + $0xa8] sm:$0xff] }
 0x11b   : > { %v5833_v52 = vpop.f32.mrf.mxu0  ;;  %v5835_v53 = vpop.f32.mrf.mxu1  ;;  %2300 = vmatmul.mubr.bf16.gmra.mxu1 %v4826_v48  ;;  %4424 = vmatmul.mubr.bf16.vlgmr.msra.gmra.mxu0 %v2784_v49  ;;  %v4841_v48 = vld [vmem:[%s7182_s0 + $0x2ac] ss:$16 sps:$4 sm:$0xff]   ;;  %v2793_v49 = vpack.c.bf16 %v2740_v43, %v2739_v42  ;;  %v4842_v42 = vld [vmem:[%s7182_s0 + $0x2c8] ss:$16 sps:$4 sm:$0xff]   ;;  %v2796_v43 = vpack.c.bf16 %v2746_v27, %v2745_v26 }
 0x11c   : > { %7190 = vst [vmem:[#allocation6_spill] sm:$0xff] %v5835_v53  ;;  %2309 = vmatprep.mubr.bf16.mxu1 %v4827_v50  ;;  %4427 = vmatprep.mubr.bf16.mxu0 %v2785_v51  ;;  %v2768_v53 = vld [vmem:[%s5810_s17 + $0x188] sm:$0xff] }
 0x11d   : > { %v5839_v56 = vpop.f32.mrf.mxu0  ;;  %v5841_v57 = vpop.f32.mrf.mxu1 }
 0x11e   : > { %7191 = vst [vmem:[#allocation7_spill] sm:$0xff] %v5841_v57 }
 0x11f   : > { %v5845_v60 = vpop.f32.mrf.mxu0  ;;  %v5847_v61 = vpop.f32.mrf.mxu1 }
 0x120   : > { %7192 = vst [vmem:[#allocation8_spill] sm:$0xff] %v5847_v61 }
 0x121   : > { %v5855_v2 = vpop.f32.mrf.mxu0  ;;  %v5857_v3 = vpop.f32.mrf.mxu1 }
 0x122   : > { %7193 = vst [vmem:[#allocation9_spill] sm:$0xff] %v5857_v3  ;;  %v2776_v3 = vld [vmem:[%s5810_s17 + $0x1c8] sm:$0xff] }
 0x123   : > { %v5859_v4 = vpop.f32.mrf.mxu0  ;;  %v5861_v5 = vpop.f32.mrf.mxu1  ;;  %2310 = vmatmul.mubr.bf16.gmra.mxu1 %v4829_v62  ;;  %4428 = vmatmul.mubr.bf16.gmra.mxu0 %v2786_v63 }
 0x124   : > { %7194 = vst [vmem:[#allocation10_spill] sm:$0xff] %v5861_v5  ;;  %2319 = vmatprep.mubr.bf16.mxu1 %v4830_v0  ;;  %4431 = vmatprep.mubr.bf16.mxu0 %v2787_v1  ;;  %v2743_v0 = vld [vmem:[%s5810_s17 + $0xc0] sm:$0xff]  ;;  %v2744_v1 = vld [vmem:[%s5810_s17 + $0xc8] sm:$0xff] }
 0x125   : > { %v5865_v8 = vpop.f32.mrf.mxu0  ;;  %v5867_v9 = vpop.f32.mrf.mxu1 }
 0x126   : > { %7195 = vst [vmem:[#allocation11_spill] sm:$0xff] %v5867_v9 }
 0x127   : > { %v5871_v12 = vpop.f32.mrf.mxu0  ;;  %v5873_v13 = vpop.f32.mrf.mxu1 }
 0x128   : > { %7196 = vst [vmem:[#allocation12_spill] sm:$0xff] %v5873_v13 }
 0x129   : > { %v5881_v18 = vpop.f32.mrf.mxu0  ;;  %v5883_v19 = vpop.f32.mrf.mxu1 }
 0x12a   : > { %7197 = vst [vmem:[#allocation13_spill] sm:$0xff] %v5883_v19 }
 0x12b   : > { %v5885_v20 = vpop.f32.mrf.mxu0  ;;  %v5887_v21 = vpop.f32.mrf.mxu1  ;;  %2320 = vmatmul.mubr.bf16.gmra.mxu1 %v4832_v14  ;;  %4432 = vmatmul.mubr.bf16.gmra.mxu0 %v2788_v15  ;;  %v4844_v14 = vld [vmem:[%s7182_s0 + $0x2cc] ss:$16 sps:$4 sm:$0xff]   ;;  %v2795_v15 = vpack.c.bf16 %v2744_v1, %v2743_v0  ;;  %v2749_v0 = vld [vmem:[%s5810_s17 + $0xf0] sm:$0xff] }
 0x12c   : > { %7198 = vst [vmem:[#allocation14_spill] sm:$0xff] %v5887_v21  ;;  %2329 = vmatprep.mubr.bf16.mxu1 %v4833_v16  ;;  %4435 = vmatprep.mubr.bf16.mxu0 %v2789_v17  ;;  %v2750_v1 = vld [vmem:[%s5810_s17 + $0xf8] sm:$0xff] }
 0x12d   : > { %v5891_v24 = vpop.f32.mrf.mxu0  ;;  %v5893_v25 = vpop.f32.mrf.mxu1 }
 0x12e   : > { %7199 = vst [vmem:[#allocation15_spill] sm:$0xff] %v5893_v25 }
 0x12f   : > { %v5897_v28 = vpop.f32.mrf.mxu0  ;;  %v5899_v29 = vpop.f32.mrf.mxu1 }
 0x130   : > { %7200 = vst [vmem:[#allocation16_spill] sm:$0xff] %v5899_v29 }
 0x131   : > { %v5907_v34 = vpop.f32.mrf.mxu0  ;;  %v5909_v35 = vpop.f32.mrf.mxu1 }
 0x132   : > { %7201 = vst [vmem:[#allocation17_spill] sm:$0xff] %v5909_v35  ;;  %v2772_v35 = vld [vmem:[%s5810_s17 + $0x1a8] sm:$0xff] }
 0x133   : > { %v5911_v36 = vpop.f32.mrf.mxu0  ;;  %v5913_v37 = vpop.f32.mrf.mxu1  ;;  %2330 = vmatmul.mubr.bf16.gmra.mxu1 %v4835_v30  ;;  %4436 = vmatmul.mubr.bf16.gmra.mxu0 %v2790_v31 }
 0x134   : > { %7202 = vst [vmem:[#allocation18_spill] sm:$0xff] %v5913_v37  ;;  %2339 = vmatprep.mubr.bf16.mxu1 %v4838_v32  ;;  %4439 = vmatprep.mubr.bf16.mxu0 %v2791_v33  ;;  %v2747_v32 = vld [vmem:[%s5810_s17 + $0xe0] sm:$0xff]  ;;  %v2748_v33 = vld [vmem:[%s5810_s17 + $0xe8] sm:$0xff] }
 0x135   : > { %v5917_v40 = vpop.f32.mrf.mxu0  ;;  %v5919_v41 = vpop.f32.mrf.mxu1 }
 0x136   : > { %7203 = vst [vmem:[#allocation19_spill] sm:$0xff] %v5919_v41 }
 0x137   : > { %v5923_v44 = vpop.f32.mrf.mxu0  ;;  %v5925_v45 = vpop.f32.mrf.mxu1 }
 0x138   : > { %7204 = vst [vmem:[#allocation20_spill] sm:$0xff] %v5925_v45 }
 0x139   : > { %v5933_v50 = vpop.f32.mrf.mxu0  ;;  %v5935_v51 = vpop.f32.mrf.mxu1 }
 0x13a   : > { %7205 = vst [vmem:[#allocation21_spill] sm:$0xff] %v5935_v51 }
 0x13b   : > { %v5937_v54 = vpop.f32.mrf.mxu0  ;;  %v5939_v55 = vpop.f32.mrf.mxu1  ;;  %2340 = vmatmul.mubr.bf16.gmra.mxu1 %v4836_v46  ;;  %4440 = vmatmul.mubr.bf16.gmra.mxu0 %v2792_v47  ;;  %v4847_v46 = vld [vmem:[%s7182_s0 + $0x2ec] ss:$16 sps:$4 sm:$0xff]   ;;  %v2797_v47 = vpack.c.bf16 %v2748_v33, %v2747_v32  ;;  %v4845_v32 = vld [vmem:[%s7182_s0 + $0x2e8] ss:$16 sps:$4 sm:$0xff]   ;;  %v2798_v33 = vpack.c.bf16 %v2750_v1, %v2749_v0 }
 0x13c   : > { %7206 = vst [vmem:[#allocation22_spill] sm:$0xff] %v5939_v55  ;;  %2349 = vmatprep.mubr.bf16.mxu1 %v4841_v48  ;;  %4443 = vmatprep.mubr.bf16.mxu0 %v2793_v49  ;;  %v2754_v0 = vld [vmem:[%s5810_s17 + $0x118] sm:$0xff]  ;;  %v2755_v55 = vld [vmem:[%s5810_s17 + $0x120] sm:$0xff] }
 0x13d   : > { %v5943_v62 = vpop.f32.mrf.mxu0  ;;  %v5945_v63 = vpop.f32.mrf.mxu1 }
 0x13e   : > { %7207 = vst [vmem:[#allocation23_spill] sm:$0xff] %v5945_v63  ;;  %v2764_v63 = vld [vmem:[%s5810_s17 + $0x168] sm:$0xff] }
 0x13f   : > { %v5949_v6 = vpop.f32.mrf.mxu0  ;;  %v5951_v7 = vpop.f32.mrf.mxu1 }
 0x140   : > { %7208 = vst [vmem:[#allocation24_spill] sm:$0xff] %v5951_v7 }
 0x141   : > { %v5959_v16 = vpop.f32.mrf.mxu0  ;;  %v5961_v17 = vpop.f32.mrf.mxu1 }
 0x142   : > { %7209 = vst [vmem:[#allocation25_spill] sm:$0xff] %v5961_v17 }
 0x143   : > { %v5963_v22 = vpop.f32.mrf.mxu0  ;;  %v5965_v23 = vpop.f32.mrf.mxu1  ;;  %2350 = vmatmul.mubr.bf16.gmra.mxu1 %v4839_v10  ;;  %4444 = vmatmul.mubr.bf16.gmra.mxu0 %v2794_v11 }
 0x144   : > { %7210 = vst [vmem:[#allocation26_spill] sm:$0xff] %v5965_v23  ;;  %2359 = vmatprep.mubr.bf16.mxu1 %v4844_v14  ;;  %4447 = vmatprep.mubr.bf16.mxu0 %v2795_v15  ;;  %v2751_v14 = vld [vmem:[%s5810_s17 + $0x100] sm:$0xff]  ;;  %v2752_v15 = vld [vmem:[%s5810_s17 + $0x108] sm:$0xff] }
 0x145   : > { %v5969_v30 = vpop.f32.mrf.mxu0  ;;  %v5971_v31 = vpop.f32.mrf.mxu1 }
 0x146   : > { %7211 = vst [vmem:[#allocation27_spill] sm:$0xff] %v5971_v31 }
 0x147   : > { %v5975_v38 = vpop.f32.mrf.mxu0  ;;  %v5977_v39 = vpop.f32.mrf.mxu1 }
 0x148   : > { %7212 = vst [vmem:[#allocation28_spill] sm:$0xff] %v5977_v39 }
 0x149   : > { %v5985_v48 = vpop.f32.mrf.mxu0  ;;  %v5987_v49 = vpop.f32.mrf.mxu1 }
 0x14a   : > { %7213 = vst [vmem:[#allocation29_spill] sm:$0xff] %v5987_v49 }
 0x14b   : > { %v5989_v58 = vpop.f32.mrf.mxu0  ;;  %v5991_v59 = vpop.f32.mrf.mxu1  ;;  %2360 = vmatmul.mubr.bf16.gmra.mxu1 %v4842_v42  ;;  %4448 = vmatmul.mubr.bf16.gmra.mxu0 %v2796_v43  ;;  %v4850_v42 = vld [vmem:[%s7182_s0 + $0x30c] ss:$16 sps:$4 sm:$0xff]   ;;  %v2799_v43 = vpack.c.bf16 %v2752_v15, %v2751_v14 }
 0x14c   : > { %7214 = vst [vmem:[#allocation30_spill] sm:$0xff] %v5991_v59  ;;  %2369 = vmatprep.mubr.bf16.mxu1 %v4847_v46  ;;  %4451 = vmatprep.mubr.bf16.mxu0 %v2797_v47  ;;  %v2756_v14 = vld [vmem:[%s5810_s17 + $0x128] sm:$0xff] }
 0x14d   : > { %v5995_v10 = vpop.f32.mrf.mxu0  ;;  %v5997_v11 = vpop.f32.mrf.mxu1 }
 0x14e   : > { %7215 = vst [vmem:[#allocation31_spill] sm:$0xff] %v5997_v11 }
 0x14f   : > { %v6001_v26 = vpop.f32.mrf.mxu0  ;;  %v6003_v27 = vpop.f32.mrf.mxu1 }
 0x150   : > { %7216 = vst [vmem:[#allocation32_spill] sm:$0xff] %v6003_v27  ;;  %v2753_v27 = vld [vmem:[%s5810_s17 + $0x110] sm:$0xff] }
 0x151   : > { %v6011_v46 = vpop.f32.mrf.mxu0  ;;  %v6013_v47 = vpop.f32.mrf.mxu1 }
 0x152   : > { %7217 = vst [vmem:[#allocation33_spill] sm:$0xff] %v6013_v47 }
 0x153   : > { %v6015_v59 = vpop.f32.mrf.mxu0  ;;  %v6017_v7 = vpop.f32.mrf.mxu1  ;;  %2370 = vmatmul.mubr.bf16.gmra.mxu1 %v4845_v32  ;;  %4452 = vmatmul.mubr.bf16.gmra.mxu0 %v2798_v33  ;;  %v4848_v32 = vld [vmem:[%s7182_s0 + $0x308] ss:$16 sps:$4 sm:$0xff]   ;;  %v2800_v33 = vpack.c.bf16 %v2754_v0, %v2753_v27  ;;  %v2757_v27 = vld [vmem:[%s5810_s17 + $0x130] sm:$0xff] }
 0x154   : > { %7218 = vst [vmem:[#allocation34_spill] sm:$0xff] %v6017_v7  ;;  %2379 = vmatprep.mubr.bf16.mxu1 %v4850_v42  ;;  %4455 = vmatprep.mubr.bf16.mxu0 %v2799_v43  ;;  %v4853_v42 = vld [vmem:[%s7182_s0 + $0x32c] ss:$16 sps:$4 sm:$0xff]   ;;  %v2801_v43 = vpack.c.bf16 %v2756_v14, %v2755_v55  ;;  %v2759_v55 = vld [vmem:[%s5810_s17 + $0x140] sm:$0xff] }
 0x155   : > { %v6021_v1 = vpop.f32.mrf.mxu0  ;;  %v6023_v39 = vpop.f32.mrf.mxu1  ;;  %v2758_v0 = vld [vmem:[%s5810_s17 + $0x138] sm:$0xff]  ;;  %v2760_v14 = vld [vmem:[%s5810_s17 + $0x148] sm:$0xff] }
 0x156   : > { %7219 = vst [vmem:[#allocation35_spill] sm:$0xff] %v6023_v39 }
 0x157   : > { %v6027_v15 = vpop.f32.mrf.mxu0  ;;  %v6029_v47 = vpop.f32.mrf.mxu1 }
 0x158   : > { %7220 = vst [vmem:[#allocation36_spill] sm:$0xff] %v6029_v47 }
 0x159   : > { %v6037_v7 = vpop.f32.mrf.mxu0  ;;  %v6039_v23 = vpop.f32.mrf.mxu1 }
 0x15a   : > { %7221 = vst [vmem:[#allocation37_spill] sm:$0xff] %v6039_v23 }
 0x15b   : > { %v6041_v11 = vpop.f32.mrf.mxu0  ;;  %v2141_v29 = vpop.f32.mrf.mxu1  ;;  %2380 = vmatmul.mubr.bf16.gmra.mxu1 %v4848_v32  ;;  %4456 = vmatmul.mubr.bf16.gmra.mxu0 %v2800_v33  ;;  %v4856_v33 = vld [vmem:[%s7182_s0 + $0x34c] ss:$16 sps:$4 sm:$0xff]  }
 0x15c   : > { %v6044_v47 = vadd.f32 %v2141_v29, %v5833_v52  ;;  %2389 = vmatprep.mubr.bf16.mxu1 %v4853_v42  ;;  %4459 = vmatprep.mubr.bf16.mxu0 %v2801_v43  ;;  %v4851_v52 = vld [vmem:[%s7182_s0 + $0x328] ss:$16 sps:$4 sm:$0xff]   ;;  %v2802_v29 = vpack.c.bf16 %v2758_v0, %v2757_v27 }
 0x15d   : > { %v6048_v39 = vpop.f32.mrf.mxu0  ;;  %v2143_v45 = vpop.f32.mrf.mxu1  ;;  %v2762_v27 = vld [vmem:[%s5810_s17 + $0x158] sm:$0xff] }
 0x15e   : > { %v6053_v17 = vadd.f32 %v2143_v45, %v5839_v56  ;;  %v2803_v56 = vpack.c.bf16 %v2760_v14, %v2759_v55  ;;  %v2763_v14 = vld [vmem:[%s5810_s17 + $0x160] sm:$0xff] }
 0x15f   : > { %v6055_v23 = vpop.f32.mrf.mxu0  ;;  %v2145_v21 = vpop.f32.mrf.mxu1 }
 0x160   : > { %v6061_v32 = vadd.f32 %v2145_v21, %v5845_v60  ;;  %v2761_v21 = vld [vmem:[%s5810_s17 + $0x150] sm:$0xff]  ;;  %4872 = vrcp.f32 %v6053_v17 }
 0x161   : > { %v6066_v45 = vpop.f32.mrf.mxu0  ;;  %v2147_v42 = vpop.f32.mrf.mxu1 }
 0x162   : > { %v6069_v43 = vadd.f32 %v2147_v42, %v5855_v2 }
 0x163   : > { %v6071_v49 = vpop.f32.mrf.mxu0  ;;  %v2151_v37 = vpop.f32.mrf.mxu1  ;;  %2390 = vmatmul.mubr.bf16.gmra.mxu1 %v4851_v52  ;;  %4460 = vmatmul.mubr.bf16.gmra.mxu0 %v2802_v29  ;;  %v4859_v29 = vld [vmem:[%s7182_s0 + $0x36c] ss:$16 sps:$4 sm:$0xff]  }
 0x164   : > { %v6074_v60 = vadd.f32 %v2151_v37, %v5859_v4  ;;  %2399 = vmatprep.mubr.bf16.mxu1 %v4856_v33  ;;  %4463 = vmatprep.mubr.bf16.mxu0 %v2803_v56  ;;  %v4854_v4 = vld [vmem:[%s7182_s0 + $0x348] ss:$16 sps:$4 sm:$0xff]   ;;  %v2804_v37 = vpack.c.bf16 %v2762_v27, %v2761_v21  ;;  %4874 = vrcp.f32 %v6069_v43 }
 0x165   : > { %v6078_v0 = vpop.f32.mrf.mxu0  ;;  %v2153_v55 = vpop.f32.mrf.mxu1  ;;  %v2766_v21 = vld [vmem:[%s5810_s17 + $0x178] sm:$0xff] }
 0x166   : > { %v6083_v2 = vadd.f32 %v2153_v55, %v5865_v8  ;;  %v2805_v8 = vpack.c.bf16 %v2764_v63, %v2763_v14  ;;  %v2767_v14 = vld [vmem:[%s5810_s17 + $0x180] sm:$0xff] }
 0x167   : > { %v6085_v42 = vpop.f32.mrf.mxu0  ;;  %v2155_v61 = vpop.f32.mrf.mxu1 }
 0x168   : > { %v6091_v52 = vadd.f32 %v2155_v61, %v5871_v12  ;;  %v2765_v12 = vld [vmem:[%s5810_s17 + $0x170] sm:$0xff]  ;;  %4876 = vrcp.f32 %v6083_v2 }
 0x169   : > { %v6096_v33 = vpop.f32.mrf.mxu0  ;;  %v2157_v56 = vpop.f32.mrf.mxu1 }
 0x16a   : > { %v6099_v55 = vadd.f32 %v2157_v56, %v5881_v18 }
 0x16b   : > { %v6101_v31 = vpop.f32.mrf.mxu0  ;;  %v2161_v13 = vpop.f32.mrf.mxu1  ;;  %2400 = vmatmul.mubr.bf16.gmra.mxu1 %v4854_v4  ;;  %4464 = vmatmul.mubr.bf16.gmra.mxu0 %v2804_v37  ;;  %v4862_v37 = vld [vmem:[%s7182_s0 + $0x38c] ss:$16 sps:$4 sm:$0xff]  }
 0x16c   : > { %v6104_v61 = vadd.f32 %v2161_v13, %v5885_v20  ;;  %2409 = vmatprep.mubr.bf16.mxu1 %v4859_v29  ;;  %4467 = vmatprep.mubr.bf16.mxu0 %v2805_v8  ;;  %v4857_v13 = vld [vmem:[%s7182_s0 + $0x368] ss:$16 sps:$4 sm:$0xff]   ;;  %v2806_v20 = vpack.c.bf16 %v2766_v21, %v2765_v12  ;;  %4878 = vrcp.f32 %v6099_v55 }
 0x16d   : > { %v6108_v63 = vpop.f32.mrf.mxu0  ;;  %v2163_v27 = vpop.f32.mrf.mxu1  ;;  %v2770_v12 = vld [vmem:[%s5810_s17 + $0x198] sm:$0xff] }
 0x16e   : > { %7222 = vst [vmem:[#allocation38_spill] sm:$0xff] %v6104_v61  ;;  %v6113_v18 = vadd.f32 %v2163_v27, %v5891_v24  ;;  %v2807_v24 = vpack.c.bf16 %v2768_v53, %v2767_v14  ;;  %v2771_v14 = vld [vmem:[%s5810_s17 + $0x1a0] sm:$0xff] }
 0x16f   : > { %v6115_v56 = vpop.f32.mrf.mxu0  ;;  %v2165_v51 = vpop.f32.mrf.mxu1 }
 0x170   : > { %v6121_v4 = vadd.f32 %v2165_v51, %v5897_v28  ;;  %v2769_v51 = vld [vmem:[%s5810_s17 + $0x190] sm:$0xff]  ;;  %4880 = vrcp.f32 %v6113_v18 }
 0x171   : > { %v6126_v29 = vpop.f32.mrf.mxu0  ;;  %v2167_v8 = vpop.f32.mrf.mxu1 }
 0x172   : > { %7223 = vst [vmem:[#allocation39_spill] sm:$0xff] %v6121_v4  ;;  %v6129_v27 = vadd.f32 %v2167_v8, %v5907_v34 }
 0x173   : > { %v6131_v5 = vpop.f32.mrf.mxu0  ;;  %v2171_v41 = vpop.f32.mrf.mxu1  ;;  %2410 = vmatmul.mubr.bf16.gmra.mxu1 %v4857_v13  ;;  %4468 = vmatmul.mubr.bf16.gmra.mxu0 %v2806_v20  ;;  %v4865_v20 = vld [vmem:[%s7182_s0 + $0x3ac] ss:$16 sps:$4 sm:$0xff]  }
 0x174   : > { %v6134_v28 = vadd.f32 %v2171_v41, %v5911_v36  ;;  %2419 = vmatprep.mubr.bf16.mxu1 %v4862_v37  ;;  %4471 = vmatprep.mubr.bf16.mxu0 %v2807_v24  ;;  %v4860_v36 = vld [vmem:[%s7182_s0 + $0x388] ss:$16 sps:$4 sm:$0xff]   ;;  %v2808_v41 = vpack.c.bf16 %v2770_v12, %v2769_v51  ;;  %4882 = vrcp.f32 %v6129_v27 }
 0x175   : > { %v6138_v53 = vpop.f32.mrf.mxu0  ;;  %v2173_v21 = vpop.f32.mrf.mxu1  ;;  %v2774_v51 = vld [vmem:[%s5810_s17 + $0x1b8] sm:$0xff] }
 0x176   : > { %v6143_v34 = vadd.f32 %v2173_v21, %v5917_v40  ;;  %v2809_v40 = vpack.c.bf16 %v2772_v35, %v2771_v14  ;;  %v2775_v14 = vld [vmem:[%s5810_s17 + $0x1c0] sm:$0xff] }
 0x177   : > { %v6145_v8 = vpop.f32.mrf.mxu0  ;;  %v2175_v25 = vpop.f32.mrf.mxu1 }
 0x178   : > { %v6151_v13 = vadd.f32 %v2175_v25, %v5923_v44  ;;  %v2773_v44 = vld [vmem:[%s5810_s17 + $0x1b0] sm:$0xff]  ;;  %4884 = vrcp.f32 %v6143_v34 }
 0x179   : > { %v6156_v37 = vpop.f32.mrf.mxu0  ;;  %v2177_v24 = vpop.f32.mrf.mxu1 }
 0x17a   : > { %7224 = vst [vmem:[#allocation40_spill] sm:$0xff] %v6151_v13  ;;  %v6159_v21 = vadd.f32 %v2177_v24, %v5933_v50 }
 0x17b   : > { %v6161_v19 = vpop.f32.mrf.mxu0  ;;  %v2181_v9 = vpop.f32.mrf.mxu1  ;;  %2420 = vmatmul.mubr.bf16.gmra.mxu1 %v4860_v36  ;;  %4472 = vmatmul.mubr.bf16.gmra.mxu0 %v2808_v41  ;;  %v4868_v41 = vld [vmem:[%s7182_s0 + $0x3cc] ss:$16 sps:$4 sm:$0xff]  }
 0x17c   : > { %v6164_v25 = vadd.f32 %v2181_v9, %v5937_v54  ;;  %2429 = vmatprep.mubr.bf16.mxu1 %v4865_v20  ;;  %4475 = vmatprep.mubr.bf16.mxu0 %v2809_v40  ;;  %v4863_v9 = vld [vmem:[%s7182_s0 + $0x3a8] ss:$16 sps:$4 sm:$0xff]   ;;  %v2810_v54 = vpack.c.bf16 %v2774_v51, %v2773_v44  ;;  %4886 = vrcp.f32 %v6159_v21 }
 0x17d   : > { %v6168_v35 = vpop.f32.mrf.mxu0  ;;  %v2183_v12 = vpop.f32.mrf.mxu1  ;;  %v2778_v44 = vld [vmem:[%s5810_s17 + $0x1d8] sm:$0xff] }
 0x17e   : > { %7225 = vst [vmem:[#allocation41_spill] sm:$0xff] %v6164_v25  ;;  %v6173_v50 = vadd.f32 %v2183_v12, %v5943_v62  ;;  %v2811_v62 = vpack.c.bf16 %v2776_v3, %v2775_v14  ;;  %v2779_v14 = vld [vmem:[%s5810_s17 + $0x1e0] sm:$0xff] }
 0x17f   : > { %v6175_v24 = vpop.f32.mrf.mxu0  ;;  %v2185_v57 = vpop.f32.mrf.mxu1 }
 0x180   : > { %v6181_v36 = vadd.f32 %v2185_v57, %v5949_v6  ;;  %v2777_v6 = vld [vmem:[%s5810_s17 + $0x1d0] sm:$0xff]  ;;  %4888 = vrcp.f32 %v6173_v50  ;;  %v6425_v50 = vpop.eup %4872 }
 0x181   : > { %v6186_v20 = vpop.f32.mrf.mxu0  ;;  %v2187_v40 = vpop.f32.mrf.mxu1 }
 0x182   : > { %7226 = vst [vmem:[#allocation42_spill] sm:$0xff] %v6181_v36  ;;  %v6189_v12 = vadd.f32 %v2187_v40, %v5959_v16  ;;  %v2780_v36 = vld [vmem:[%s5810_s17 + $0x1e8] sm:$0xff] }
 0x183   : > { %v6191_v25 = vpop.f32.mrf.mxu0  ;;  %v2191_v4 = vpop.f32.mrf.mxu1  ;;  %2430 = vmatmul.mubr.bf16.gmra.mxu1 %v4863_v9  ;;  %4476 = vmatmul.mubr.bf16.gmra.mxu0 %v2810_v54  ;;  %v4871_v54 = vld [vmem:[%s7182_s0 + $0x3ec] ss:$16 sps:$4 sm:$0xff]  }
 0x184   : > { %v6194_v57 = vadd.f32 %v2191_v4, %v5963_v22  ;;  %2439 = vmatprep.mubr.bf16.mxu1 %v4868_v41  ;;  %4479 = vmatprep.mubr.bf16.mxu0 %v2811_v62  ;;  %v4866_v22 = vld [vmem:[%s7182_s0 + $0x3c8] ss:$16 sps:$4 sm:$0xff]   ;;  %v2812_v4 = vpack.c.bf16 %v2778_v44, %v2777_v6  ;;  %v2813_v41 = vpack.c.bf16 %v2780_v36, %v2779_v14  ;;  %4890 = vrcp.f32 %v6189_v12 }
 0x185   : > { %v6198_v3 = vpop.f32.mrf.mxu0  ;;  %v2193_v51 = vpop.f32.mrf.mxu1 }
 0x186   : > { %7227 = vst [vmem:[#allocation43_spill] sm:$0xff] %v6194_v57  ;;  %v6203_v16 = vadd.f32 %v2193_v51, %v5969_v30 }
 0x187   : > { %v6205_v40 = vpop.f32.mrf.mxu0  ;;  %v2195_v13 = vpop.f32.mrf.mxu1 }
 0x188   : > { %v6211_v9 = vadd.f32 %v2195_v13, %v5975_v38  ;;  %v2781_v38 = vld [vmem:[%s5810_s17 + $0x1f0] sm:$0xff]  ;;  %v2782_v13 = vld [vmem:[%s5810_s17 + $0x1f8] sm:$0xff]  ;;  %4892 = vrcp.f32 %v6203_v16  ;;  %s5263_s17 = scalar_lea.vmem %s5262_s13, 16384 }
 0x189   : > { %v6216_v30 = vpop.f32.mrf.mxu0  ;;  %v2197_v62 = vpop.f32.mrf.mxu1  ;;  %p5265_p2 = scmp.lt.s32.totalorder %s5263_s17, %s5257_s10 }
 0x18a   : > { %7228 = vst [vmem:[#allocation44_spill] sm:$0xff] %v6211_v9  ;;  %v6219_v51 = vadd.f32 %v2197_v62, %v5985_v48 }
 0x18b   : > { %v6221_v57 = vpop.f32.mrf.mxu0  ;;  %v2201_v61 = vpop.f32.mrf.mxu1  ;;  %2440 = vmatmul.mubr.bf16.gmra.mxu1 %v4866_v22  ;;  %4480 = vmatmul.mubr.bf16.gmra.mxu0 %v2812_v4  ;;  %v4869_v22 = vld [vmem:[%s7182_s0 + $0x3e8] ss:$16 sps:$4 sm:$0xff]   ;;  %v2814_v4 = vpack.c.bf16 %v2782_v13, %v2781_v38  ;;  %p5266_p3 = por %p5265_p2, %p5264_p1 }
 0x18c   : > { %v6224_v6 = vadd.f32 %v2201_v61, %v5989_v58  ;;  %2449 = vmatprep.mubr.bf16.mxu1 %v4871_v54  ;;  %4483 = vmatprep.mubr.bf16.mxu0 %v2813_v41  ;;  %4894 = vrcp.f32 %v6219_v51  ;;  %v6438_v51 = vld [vmem:[%s7186_s4] ss:$0 sm:$0xff] }
 0x18d   : > { %v6228_v44 = vpop.f32.mrf.mxu0  ;;  %v2203_v36 = vpop.f32.mrf.mxu1  ;;  %p5267_p5 = pnand %p5266_p3, %p5260_p0 }
 0x18e   : > { %7229 = vst [vmem:[#allocation45_spill] sm:$0xff] %v6224_v6  ;;  %v6231_v14 = vadd.f32 %v2203_v36, %v5995_v10 }
 0x18f   : > { %v6233_v48 = vpop.f32.mrf.mxu0  ;;  %v2205_v62 = vpop.f32.mrf.mxu1 }
 0x190   : > { %v6239_v58 = vadd.f32 %v2205_v62, %v6001_v26  ;;  %4896 = vrcp.f32 %v6231_v14 }
 0x191   : > { %v6241_v61 = vpop.f32.mrf.mxu0  ;;  %v2207_v54 = vpop.f32.mrf.mxu1 }
 0x192   : > { %7230 = vst [vmem:[#allocation46_spill] sm:$0xff] %v6239_v58  ;;  %v6244_v41 = vadd.f32 %v2207_v54, %v6011_v46 }
 0x193   : > { %v6246_v6 = vpop.f32.mrf.mxu0  ;;  %v2211_v10 = vpop.f32.mrf.mxu1  ;;  %2450 = vmatmul.mubr.bf16.gmra.mxu1 %v4869_v22  ;;  %4484 = vmatmul.mubr.bf16.gmra.mxu0 %v2814_v4 }
 0x194   : > { %7231 = vst [vmem:[#allocation47_spill] sm:$0xff] %v6246_v6  ;;  %v6249_v36 = vadd.f32 %v2211_v10, %v6015_v59  ;;  %4898 = vrcp.f32 %v6244_v41 }
 0x195   : > { %v6251_v9 = vpop.f32.mrf.mxu0  ;;  %v2213_v38 = vpop.f32.mrf.mxu1 }
 0x196   : > { %7232 = vst [vmem:[#allocation48_spill] sm:$0xff] %v6249_v36  ;;  %v6254_v26 = vadd.f32 %v2213_v38, %v6021_v1 }
 0x197   : > { %v6256_v13 = vpop.f32.mrf.mxu0  ;;  %v2215_v62 = vpop.f32.mrf.mxu1 }
 0x198   : > { %7233 = vst [vmem:[#allocation49_spill] sm:$0xff] %v6256_v13  ;;  %v6259_v46 = vadd.f32 %v2215_v62, %v6027_v15  ;;  %4900 = vrcp.f32 %v6254_v26 }
 0x199   : > { %v6261_v54 = vpop.f32.mrf.mxu0  ;;  %v2217_v6 = vpop.f32.mrf.mxu1 }
 0x19a   : > { %7234 = vst [vmem:[#allocation50_spill] sm:$0xff] %v6259_v46  ;;  %v6264_v22 = vadd.f32 %v2217_v6, %v6037_v7 }
 0x19b   : > { %v6266_v59 = vpop.f32.mrf.mxu0  ;;  %v2221_v4 = vpop.f32.mrf.mxu1 }
 0x19c   : > { %v6269_v10 = vadd.f32 %v2221_v4, %v6041_v11  ;;  %4902 = vrcp.f32 %v6264_v22 }
 0x19d   : > { %v6271_v1 = vpop.f32.mrf.mxu0  ;;  %v2223_v38 = vpop.f32.mrf.mxu1 }
 0x19e   : > { %7235 = vst [vmem:[#allocation51_spill] sm:$0xff] %v6269_v10  ;;  %v6274_v13 = vadd.f32 %v2223_v38, %v6048_v39 }
 0x19f   : > { %v6276_v15 = vpop.f32.mrf.mxu0  ;;  %v2225_v62 = vpop.f32.mrf.mxu1 }
 0x1a0   : > { %v6279_v58 = vadd.f32 %v2225_v62, %v6055_v23  ;;  %4904 = vrcp.f32 %v6274_v13 }
 0x1a1   : > { %v6281_v7 = vpop.f32.mrf.mxu0  ;;  %v2227_v6 = vpop.f32.mrf.mxu1 }
 0x1a2   : > { %7236 = vst [vmem:[#allocation52_spill] sm:$0xff] %v6279_v58  ;;  %v6284_v46 = vadd.f32 %v2227_v6, %v6066_v45 }
 0x1a3   : > { %v6286_v11 = vpop.f32.mrf.mxu0  ;;  %v2231_v4 = vpop.f32.mrf.mxu1 }
 0x1a4   : > { %7237 = vst [vmem:[#allocation53_spill] sm:$0xff] %v6286_v11  ;;  %v6289_v10 = vadd.f32 %v2231_v4, %v6071_v49 }
 0x1a5   : > { %v6291_v39 = vpop.f32.mrf.mxu0  ;;  %v2233_v38 = vpop.f32.mrf.mxu1 }
 0x1a6   : > { %7238 = vst [vmem:[#allocation54_spill] sm:$0xff] %v6289_v10  ;;  %v6294_v36 = vadd.f32 %v2233_v38, %v6078_v0 }
 0x1a7   : > { %v6296_v23 = vpop.f32.mrf.mxu0  ;;  %v2235_v62 = vpop.f32.mrf.mxu1 }
 0x1a8   : > { %7239 = vst [vmem:[#allocation55_spill] sm:$0xff] %v6296_v23  ;;  %v6299_v58 = vadd.f32 %v2235_v62, %v6085_v42 }
 0x1a9   : > { %v6301_v45 = vpop.f32.mrf.mxu0  ;;  %v2237_v6 = vpop.f32.mrf.mxu1 }
 0x1aa   : > { %7240 = vst [vmem:[#allocation56_spill] sm:$0xff] %v6299_v58  ;;  %v6304_v11 = vadd.f32 %v2237_v6, %v6096_v33 }
 0x1ab   : > { %v6306_v49 = vpop.f32.mrf.mxu0  ;;  %v2241_v4 = vpop.f32.mrf.mxu1 }
 0x1ac   : > { %7241 = vst [vmem:[#allocation57_spill] sm:$0xff] %v6306_v49  ;;  %v6309_v10 = vadd.f32 %v2241_v4, %v6101_v31 }
 0x1ad   : > { %v6311_v0 = vpop.f32.mrf.mxu0  ;;  %v2243_v38 = vpop.f32.mrf.mxu1 }
 0x1ae   : > { %7242 = vst [vmem:[#allocation58_spill] sm:$0xff] %v6309_v10  ;;  %v6314_v23 = vadd.f32 %v2243_v38, %v6108_v63 }
 0x1af   : > { %v6316_v42 = vpop.f32.mrf.mxu0  ;;  %v2245_v62 = vpop.f32.mrf.mxu1 }
 0x1b0   : > { %7243 = vst [vmem:[#allocation59_spill] sm:$0xff] %v6316_v42  ;;  %v6319_v58 = vadd.f32 %v2245_v62, %v6115_v56 }
 0x1b1   : > { %v6321_v33 = vpop.f32.mrf.mxu0  ;;  %v2247_v6 = vpop.f32.mrf.mxu1 }
 0x1b2   : > { %7244 = vst [vmem:[#allocation60_spill] sm:$0xff] %v6319_v58  ;;  %v6324_v49 = vadd.f32 %v2247_v6, %v6126_v29 }
 0x1b3   : > { %v6326_v31 = vpop.f32.mrf.mxu0  ;;  %v2251_v4 = vpop.f32.mrf.mxu1 }
 0x1b4   : > { %7245 = vst [vmem:[#allocation61_spill] sm:$0xff] %v6326_v31  ;;  %v6329_v10 = vadd.f32 %v2251_v4, %v6131_v5 }
 0x1b5   : > { %v6331_v63 = vpop.f32.mrf.mxu0  ;;  %v6333_v38 = vpop.f32.mrf.mxu1 }
 0x1b6   : > { %7246 = vst [vmem:[#allocation62_spill] sm:$0xff] %v6329_v10  ;;  %7247 = vst [vmem:[#allocation63_spill] sm:$0xff] %v6331_v63 }
 0x1b7   : > { %v6335_v42 = vpop.f32.mrf.mxu0  ;;  %v2255_v56 = vpop.f32.mrf.mxu1 }
 0x1b8   : > { %7248 = vst [vmem:[#allocation64_spill] sm:$0xff] %v6335_v42  ;;  %v6338_v62 = vadd.f32 %v2255_v56, %v6145_v8 }
 0x1b9   : > { %v6340_v58 = vpop.f32.mrf.mxu0  ;;  %v6342_v29 = vpop.f32.mrf.mxu1 }
 0x1ba   : > { %7249 = vst [vmem:[#allocation65_spill] sm:$0xff] %v6338_v62  ;;  %7250 = vst [vmem:[#allocation66_spill] sm:$0xff] %v6340_v58 }
 0x1bb   : > { %v6344_v6 = vpop.f32.mrf.mxu0  ;;  %v2261_v31 = vpop.f32.mrf.mxu1 }
 0x1bc   : > { %7251 = vst [vmem:[#allocation67_spill] sm:$0xff] %v6344_v6  ;;  %v6347_v5 = vadd.f32 %v2261_v31, %v6161_v19 }
 0x1bd   : > { %v6349_v4 = vpop.f32.mrf.mxu0  ;;  %v2263_v10 = vpop.f32.mrf.mxu1 }
 0x1be   : > { %7252 = vst [vmem:[#allocation68_spill] sm:$0xff] %v6347_v5  ;;  %v6352_v63 = vadd.f32 %v2263_v10, %v6168_v35 }
 0x1bf   : > { %v6354_v42 = vpop.f32.mrf.mxu0  ;;  %v2265_v8 = vpop.f32.mrf.mxu1 }
 0x1c0   : > { %7253 = vst [vmem:[#allocation69_spill] sm:$0xff] %v6354_v42  ;;  %v6357_v56 = vadd.f32 %v2265_v8, %v6175_v24 }
 0x1c1   : > { %v6359_v62 = vpop.f32.mrf.mxu0  ;;  %v2267_v58 = vpop.f32.mrf.mxu1 }
 0x1c2   : > { %7254 = vst [vmem:[#allocation70_spill] sm:$0xff] %v6357_v56  ;;  %v6362_v6 = vadd.f32 %v2267_v58, %v6186_v20 }
 0x1c3   : > { %v6364_v19 = vpop.f32.mrf.mxu0  ;;  %v2271_v31 = vpop.f32.mrf.mxu1 }
 0x1c4   : > { %7255 = vst [vmem:[#allocation71_spill] sm:$0xff] %v6364_v19  ;;  %v6367_v5 = vadd.f32 %v2271_v31, %v6191_v25 }
 0x1c5   : > { %v6369_v35 = vpop.f32.mrf.mxu0  ;;  %v6371_v10 = vpop.f32.mrf.mxu1 }
 0x1c6   : > { %7256 = vst [vmem:[#allocation72_spill] sm:$0xff] %v6367_v5 }
 0x1c7   : > { %v6373_v42 = vpop.f32.mrf.mxu0  ;;  %v2275_v24 = vpop.f32.mrf.mxu1 }
 0x1c8   : > { %7257 = vst [vmem:[#allocation73_spill] sm:$0xff] %v6373_v42  ;;  %v6376_v8 = vadd.f32 %v2275_v24, %v6205_v40 }
 0x1c9   : > { %v6378_v56 = vpop.f32.mrf.mxu0  ;;  %v6380_v20 = vpop.f32.mrf.mxu1 }
 0x1ca   : > { %7258 = vst [vmem:[#allocation74_spill] sm:$0xff] %v6376_v8  ;;  %7259 = vst [vmem:[#allocation75_spill] sm:$0xff] %v6378_v56 }
 0x1cb   : > { %v6383_v58 = vpop.f32.mrf.mxu0  ;;  %v2281_v25 = vpop.f32.mrf.mxu1 }
 0x1cc   : > { %7260 = vst [vmem:[#allocation76_spill] sm:$0xff] %v6383_v58  ;;  %v6387_v31 = vadd.f32 %v2281_v25, %v6221_v57  ;;  %v6428_v25 = vpop.eup %4874  ;;  %4906 = vrcp.f32 %v6284_v46 }
 0x1cd   : > { %v6390_v42 = vpop.f32.mrf.mxu0  ;;  %v6392_v40 = vpop.f32.mrf.mxu1 }
 0x1ce   : > { %7261 = vst [vmem:[#allocation77_spill] sm:$0xff] %v6387_v31  ;;  %7262 = vst [vmem:[#allocation78_spill] sm:$0xff] %v6390_v42  ;;  %v6440_v14 = vpop.eup %4876  ;;  %4908 = vrcp.f32 %v6294_v36 }
 0x1cf   : > { %v6396_v24 = vpop.f32.mrf.mxu0  ;;  %v2285_v17 = vpop.f32.mrf.mxu1 }
 0x1d0   : > { %7263 = vst [vmem:[#allocation79_spill] sm:$0xff] %v6396_v24  ;;  %v6400_v43 = vadd.f32 %v2285_v17, %v6233_v48  ;;  %v6443_v17 = vpop.eup %4878  ;;  %4910 = vrcp.f32 %v6304_v11 }
 0x1d1   : > { %v6403_v57 = vpop.f32.mrf.mxu0  ;;  %v6405_v2 = vpop.f32.mrf.mxu1 }
 0x1d2   : > { %7264 = vst [vmem:[#allocation80_spill] sm:$0xff] %v6400_v43  ;;  %7265 = vst [vmem:[#allocation81_spill] sm:$0xff] %v6403_v57  ;;  %v6446_v26 = vpop.eup %4880  ;;  %4912 = vrcp.f32 %v6314_v23  ;;  %v2258_v23 = vadd.f32 %v6342_v29, %v6156_v37 }
 0x1d3   : > { %v6409_v55 = vpop.f32.mrf.mxu0  ;;  %v6411_v18 = vpop.f32.mrf.mxu1 }
 0x1d4   : > { %7266 = vst [vmem:[#allocation82_spill] sm:$0xff] %v6409_v55  ;;  %7267 = vst [vmem:[#allocation83_spill] sm:$0xff] %v6411_v18  ;;  %v6453_v55 = vpop.eup %4882 }
 0x1d5   : > { %v6415_v27 = vpop.f32.mrf.mxu0  ;;  %v6417_v48 = vpop.f32.mrf.mxu1 }
 0x1d6   : > { %7268 = vst [vmem:[#allocation84_spill] sm:$0xff] %v6415_v27  ;;  %v6458_v43 = vpop.eup %4884 }
 0x1d7   : > { %v6421_v34 = vpop.f32.mrf.mxu0  ;;  %v6423_v21 = vpop.f32.mrf.mxu1 }
 0x1d8   : > { %7269 = vst [vmem:[#allocation85_spill] sm:$0xff] %v6421_v34  ;;  %7270 = vst [vmem:[#allocation86_spill] sm:$0xff] %v6423_v21  ;;  %v6462_v46 = vpop.eup %4886 }
 0x1d9   : > { %v6431_v12 = vpop.f32.mrf.mxu0  ;;  %v6433_v16 = vpop.f32.mrf.mxu1 }
 0x1da   : > { %7271 = vst [vmem:[#allocation87_spill] sm:$0xff] %v6431_v12  ;;  %v6467_v36 = vpop.eup %4888 }
 0x1db   : > { %v2301_v41 = vpop.f32.mrf.mxu1  ;;  %v4425_v24 = vpop.f32.mrf.mxu0 }
 0x1dc   : > { %v6450_v34 = vadd.f32 %v2301_v41, %v6266_v59  ;;  %v2929_v58 = vadd.f32 %v4425_v24, %v6438_v51  ;;  %v2254_v59 = vadd.f32 %v6333_v38, %v6138_v53 }
 0x1dd   : > { %v6456_v22 = vpop.f32.mrf.mxu1  ;;  %v2920_v19 = vpop.f32.mrf.mxu0 }
 0x1de   : > { %7272 = vst [vmem:[#allocation88_spill] sm:$0xff] %v6450_v34  ;;  %v4297_v13 = vmul.f32 -1.442695, %v2929_v58  ;;  %v2921_v12 = vadd.f32 %v6438_v51, %v2920_v19  ;;  %v6473_v58 = vpop.eup %4890 }
 0x1df   : > { %v2305_v24 = vpop.f32.mrf.mxu1  ;;  %v4426_v41 = vpop.f32.mrf.mxu0 }
 0x1e0   : > { %4914 = vpow2.f32 %v4297_v13  ;;  %v4295_v34 = vmul.f32 -1.442695, %v2921_v12  ;;  %v6470_v31 = vadd.f32 %v2305_v24, %v6276_v15  ;;  %v2932_v11 = vadd.f32 %v4426_v41, %v6438_v51  ;;  %v6480_v38 = vpop.eup %4892 }
 0x1e1   : > { %4916 = vrcp.f32 %v6324_v49  ;;  %v6478_v19 = vpop.f32.mrf.mxu1  ;;  %v2923_v53 = vpop.f32.mrf.mxu0 }
 0x1e2   : > { %7273 = vst [vmem:[#allocation89_spill] sm:$0xff] %v6470_v31  ;;  %4918 = vpow2.f32 %v4295_v34  ;;  %v4298_v13 = vmul.f32 -1.442695, %v2932_v11  ;;  %v2924_v12 = vadd.f32 %v6438_v51, %v2923_v53  ;;  %v6483_v15 = vpop.eup %4894 }
 0x1e3   : > { %4920 = vrcp.f32 %v2254_v59  ;;  %v6485_v24 = vpop.f32.mrf.mxu1  ;;  %v4429_v41 = vpop.f32.mrf.mxu0 }
 0x1e4   : > { %7274 = vst [vmem:[#allocation90_spill] sm:$0xff] %v6485_v24  ;;  %v6487_v31 = vpop.eup %4896  ;;  %4922 = vpow2.f32 %v4298_v13  ;;  %v4296_v49 = vmul.f32 -1.442695, %v2924_v12  ;;  %v2945_v37 = vadd.f32 %v4429_v41, %v6438_v51  ;;  %v2274_v13 = vadd.f32 %v6371_v10, %v6198_v3 }
 0x1e5   : > { %v6490_v29 = vpop.eup %4898  ;;  %4924 = vrcp.f32 %v2258_v23  ;;  %v6492_v27 = vpop.f32.mrf.mxu1 }
 0x1e6   : > { %v2936_v34 = vpop.f32.mrf.mxu0  ;;  %v6494_v11 = vpop.eup %4900  ;;  %4926 = vpow2.f32 %v4296_v49  ;;  %v4301_v53 = vmul.f32 -1.442695, %v2945_v37  ;;  %v2278_v37 = vadd.f32 %v6380_v20, %v6216_v30 }
 0x1e7   : > { %v2937_v59 = vadd.f32 %v6438_v51, %v2936_v34  ;;  %v6497_v24 = vpop.eup %4902  ;;  %4928 = vrcp.f32 %v6352_v63  ;;  %v6502_v12 = vpop.f32.mrf.mxu1 }
 0x1e8   : > { %7275 = vst [vmem:[#allocation91_spill] sm:$0xff] %v6502_v12  ;;  %v4430_v41 = vpop.f32.mrf.mxu0  ;;  %v6504_v23 = vpop.eup %4904  ;;  %4930 = vpow2.f32 %v4301_v53 }
 0x1e9   : > { %v4299_v21 = vmul.f32 -1.442695, %v2937_v59  ;;  %v2948_v57 = vadd.f32 %v4430_v41, %v6438_v51  ;;  %v6507_v49 = vpop.eup %4906  ;;  %4932 = vrcp.f32 %v6362_v6  ;;  %v6512_v63 = vpop.f32.mrf.mxu1  ;;  %v2284_v59 = vadd.f32 %v6392_v40, %v6228_v44 }
 0x1ea   : > { %v2939_v34 = vpop.f32.mrf.mxu0  ;;  %v6514_v3 = vpop.eup %4908  ;;  %v2288_v40 = vadd.f32 %v6405_v2, %v6241_v61 }
 0x1eb   : > { %4934 = vpow2.f32 %v4299_v21  ;;  %v4302_v10 = vmul.f32 -1.442695, %v2948_v57  ;;  %v2940_v12 = vadd.f32 %v6438_v51, %v2939_v34  ;;  %v6517_v53 = vpop.eup %4910  ;;  %v6521_v41 = vpop.f32.mrf.mxu1 }
 0x1ec   : > { %4936 = vrcp.f32 %v2274_v13  ;;  %7276 = vst [vmem:[#allocation92_spill] sm:$0xff] %v6521_v41  ;;  %v4433_v6 = vpop.f32.mrf.mxu0  ;;  %v6523_v18 = vpop.eup %4912 }
 0x1ed   : > { %7277 = vst [vmem:[#allocation93_spill] sm:$0xff] %v6523_v18  ;;  %4938 = vpow2.f32 %v4302_v10  ;;  %v4300_v30 = vmul.f32 -1.442695, %v2940_v12  ;;  %v2961_v20 = vadd.f32 %v4433_v6, %v6438_v51  ;;  %v4915_v8 = vpop.eup %4914  ;;  %v6526_v57 = vpop.f32.mrf.mxu1 }
 0x1ee   : > { %4940 = vrcp.f32 %v2278_v37  ;;  %v2952_v21 = vpop.f32.mrf.mxu0  ;;  %v6528_v34 = vpop.eup %4916  ;;  %v3369_v13 = vadd.f32 1.0, %v4915_v8 }
 0x1ef   : > { %7278 = vst [vmem:[#allocation94_spill] sm:$0xff] %v6528_v34  ;;  %4942 = vpow2.f32 %v4300_v30  ;;  %v4305_v42 = vmul.f32 -1.442695, %v2961_v20  ;;  %v4919_v44 = vpop.eup %4918  ;;  %v2953_v10 = vadd.f32 %v6438_v51, %v2952_v21  ;;  %v6533_v12 = vpop.f32.mrf.mxu1 }
 0x1f0   : > { %4944 = vrcp.f32 %v2284_v59  ;;  %7279 = vst [vmem:[#allocation95_spill] sm:$0xff] %v6533_v12  ;;  %v4434_v6 = vpop.f32.mrf.mxu0  ;;  %v6535_v41 = vpop.eup %4920  ;;  %v3367_v37 = vadd.f32 1.0, %v4919_v44 }
 0x1f1   : > { %4946 = vrcp.f32 %v3369_v13  ;;  %v2964_v5 = vadd.f32 %v4434_v6, %v6438_v51  ;;  %v4923_v34 = vpop.eup %4922  ;;  %v4303_v8 = vmul.f32 -1.442695, %v2953_v10  ;;  %v6538_v30 = vpop.f32.mrf.mxu1  ;;  %v2294_v6 = vadd.f32 %v6417_v48, %v6251_v9 }
 0x1f2   : > { %4948 = vpow2.f32 %v4305_v42  ;;  %v2955_v59 = vpop.f32.mrf.mxu0  ;;  %v6540_v20 = vpop.eup %4924  ;;  %v3370_v61 = vadd.f32 1.0, %v4923_v34 }
 0x1f3   : > { %7280 = vst [vmem:[#allocation96_spill] sm:$0xff] %v6540_v20  ;;  %4950 = vrcp.f32 %v3367_v37  ;;  %v4927_v2 = vpop.eup %4926  ;;  %v4306_v21 = vmul.f32 -1.442695, %v2964_v5  ;;  %v2956_v12 = vadd.f32 %v6438_v51, %v2955_v59  ;;  %v6543_v56 = vpop.f32.mrf.mxu1 }
 0x1f4   : > { %4952 = vrcp.f32 %v2288_v40  ;;  %7281 = vst [vmem:[#allocation97_spill] sm:$0xff] %v6543_v56  ;;  %v4437_v13 = vpop.f32.mrf.mxu0  ;;  %v6545_v44 = vpop.eup %4928  ;;  %v3368_v42 = vadd.f32 1.0, %v4927_v2 }
 0x1f5   : > { %7282 = vst [vmem:[#allocation98_spill] sm:$0xff] %v6545_v44  ;;  %4954 = vrcp.f32 %v3370_v61  ;;  %v4931_v10 = vpop.eup %4930  ;;  %v2977_v37 = vadd.f32 %v4437_v13, %v6438_v51  ;;  %v6550_v34 = vpop.f32.mrf.mxu1  ;;  %v4304_v44 = vmul.f32 -1.442695, %v2956_v12 }
 0x1f6   : > { %4956 = vpow2.f32 %v4303_v8  ;;  %v2968_v5 = vpop.f32.mrf.mxu0  ;;  %v6552_v40 = vpop.eup %4932  ;;  %v3373_v59 = vadd.f32 1.0, %v4931_v10 }
 0x1f7   : > { %7283 = vst [vmem:[#allocation99_spill] sm:$0xff] %v6552_v40  ;;  %4958 = vrcp.f32 %v3368_v42  ;;  %v6554_v61 = vpop.f32.mrf.mxu1  ;;  %v2969_v48 = vadd.f32 %v6438_v51, %v2968_v5  ;;  %v4309_v13 = vmul.f32 -1.442695, %v2977_v37 }
 0x1f8   : > { %v4935_v56 = vpop.eup %4934  ;;  %4960 = vpow2.f32 %v4306_v21  ;;  %7284 = vst [vmem:[#allocation100_spill] sm:$0xff] %v6554_v61  ;;  %v4438_v2 = vpop.f32.mrf.mxu0 }
 0x1f9   : > { %v6556_v20 = vpop.eup %4936  ;;  %4962 = vrcp.f32 %v3373_v59  ;;  %v3371_v9 = vadd.f32 1.0, %v4935_v56  ;;  %v6560_v40 = vpop.f32.mrf.mxu1  ;;  %v2980_v21 = vadd.f32 %v4438_v2, %v6438_v51  ;;  %v2298_v56 = vadd.f32 %v6433_v16, %v6261_v54 }
 0x1fa   : > { %7285 = vst [vmem:[#allocation101_spill] sm:$0xff] %v6556_v20  ;;  %v4939_v8 = vpop.eup %4938  ;;  %4964 = vrcp.f32 %v2294_v6  ;;  %v2971_v42 = vpop.f32.mrf.mxu0 }
 0x1fb   : > { %v6562_v10 = vpop.eup %4940  ;;  %4966 = vrcp.f32 %v3371_v9  ;;  %v3374_v12 = vadd.f32 1.0, %v4939_v8  ;;  %v6567_v5 = vpop.f32.mrf.mxu1  ;;  %v2972_v9 = vadd.f32 %v6438_v51, %v2971_v42 }
 0x1fc   : > { %7286 = vst [vmem:[#allocation102_spill] sm:$0xff] %v6562_v10  ;;  %v4943_v61 = vpop.eup %4942  ;;  %4968 = vpow2.f32 %v4304_v44  ;;  %7287 = vst [vmem:[#allocation103_spill] sm:$0xff] %v6567_v5  ;;  %v4441_v59 = vpop.f32.mrf.mxu0  ;;  %v4307_v10 = vmul.f32 -1.442695, %v2969_v48  ;;  %v4310_v44 = vmul.f32 -1.442695, %v2980_v21 }
 0x1fd   : > { %v6569_v6 = vpop.eup %4944  ;;  %4970 = vrcp.f32 %v3374_v12  ;;  %v3372_v37 = vadd.f32 1.0, %v4943_v61  ;;  %v6576_v2 = vpop.f32.mrf.mxu1  ;;  %v2993_v5 = vadd.f32 %v4441_v59, %v6438_v51  ;;  %v2304_v61 = vadd.f32 %v6456_v22, %v6271_v1 }
 0x1fe   : > { %7288 = vst [vmem:[#allocation104_spill] sm:$0xff] %v6569_v6  ;;  %v4947_v8 = vpop.eup %4946  ;;  %4972 = vpow2.f32 %v4309_v13  ;;  %v2984_v20 = vpop.f32.mrf.mxu0  ;;  %v4308_v21 = vmul.f32 -1.442695, %v2972_v9 }
 0x1ff   : > { %v4949_v54 = vpop.eup %4948  ;;  %v3689_v16 = vmul.f32 %v4947_v8, %v6074_v60  ;;  %4974 = vrcp.f32 %v3372_v37  ;;  %v6582_v42 = vpop.f32.mrf.mxu1 }
 0x200   : > { %v4951_v6 = vpop.eup %4950  ;;  %4976 = vrcp.f32 %v2298_v56  ;;  %v3377_v48 = vadd.f32 1.0, %v4949_v54  ;;  %v4442_v13 = vpop.f32.mrf.mxu0  ;;  %v2985_v56 = vadd.f32 %v6438_v51, %v2984_v20 }
 0x201   : > { %v6584_v12 = vpop.eup %4952  ;;  %v3817_v18 = vmul.f32 %v6440_v14, %v3689_v16  ;;  %v3687_v60 = vmul.f32 %v4951_v6, %v6044_v47  ;;  %4978 = vpow2.f32 %v4307_v10  ;;  %v2996_v59 = vadd.f32 %v4442_v13, %v6438_v51  ;;  %v6590_v1 = vpop.f32.mrf.mxu1 }
 0x202   : > { %v4955_v37 = vpop.eup %4954  ;;  %4980 = vrcp.f32 %v3377_v48  ;;  %v2987_v22 = vpop.f32.mrf.mxu0  ;;  %v4313_v10 = vmul.f32 -1.442695, %v2993_v5 }
 0x203   : > { %v4957_v8 = vpop.eup %4956  ;;  %3881 = vst [vmem:[%s6593_s25 + $0x10] sm:$0xff] %v3817_v18  ;;  %v3815_v14 = vmul.f32 %v6425_v50, %v3687_v60  ;;  %v3690_v47 = vmul.f32 %v4955_v37, %v6091_v52  ;;  %4982 = vpow2.f32 %v4310_v44  ;;  %v6598_v9 = vpop.f32.mrf.mxu1  ;;  %v2308_v18 = vadd.f32 %v6478_v19, %v6281_v7 }
 0x204   : > { %v4959_v6 = vpop.eup %4958  ;;  %4984 = vrcp.f32 %v2304_v61  ;;  %v3375_v20 = vadd.f32 1.0, %v4957_v8  ;;  %v4445_v54 = vpop.f32.mrf.mxu0  ;;  %v4311_v44 = vmul.f32 -1.442695, %v2985_v56  ;;  %v4314_v61 = vmul.f32 -1.442695, %v2996_v59 }
 0x205   : > { %v4961_v16 = vpop.eup %4960  ;;  %3879 = vst [vmem:[%s6593_s25] sm:$0xff] %v3815_v14  ;;  %v3818_v48 = vmul.f32 %v6443_v17, %v3690_v47  ;;  %v3688_v50 = vmul.f32 %v4959_v6, %v6061_v32  ;;  %4986 = vpow2.f32 %v4308_v21  ;;  %v6605_v13 = vpop.f32.mrf.mxu1  ;;  %v2988_v32 = vadd.f32 %v6438_v51, %v2987_v22 }
 0x206   : > { %v4963_v52 = vpop.eup %4962  ;;  %4988 = vrcp.f32 %v3375_v20  ;;  %v3378_v5 = vadd.f32 1.0, %v4961_v16  ;;  %v3000_v60 = vpop.f32.mrf.mxu0  ;;  %v3009_v19 = vadd.f32 %v4445_v54, %v6438_v51 }
 0x207   : > { %v6607_v37 = vpop.eup %4964  ;;  %3882 = vst [vmem:[%s6593_s25 + $0x18] sm:$0xff] %v3818_v48  ;;  %v3816_v17 = vmul.f32 %v6428_v25, %v3688_v50  ;;  %v3693_v8 = vmul.f32 %v4963_v52, %v6134_v28  ;;  %4990 = vpow2.f32 %v4313_v10  ;;  %v6614_v21 = vpop.f32.mrf.mxu1  ;;  %v2314_v25 = vadd.f32 %v6492_v27, %v6291_v39  ;;  %v7289_v28 = vld [vmem:[#allocation38_spill] sm:$0xff]  ;;  %v7290_v48 = vld [vmem:[#allocation40_spill] sm:$0xff] }
 0x208   : > { %v4967_v7 = vpop.eup %4966  ;;  %4992 = vrcp.f32 %v3378_v5  ;;  %v4446_v56 = vpop.f32.mrf.mxu0  ;;  %v4317_v27 = vmul.f32 -1.442695, %v3009_v19  ;;  %v3001_v52 = vadd.f32 %v6438_v51, %v3000_v60 }
 0x209   : > { %v4969_v59 = vpop.eup %4968  ;;  %4994 = vrcp.f32 %v2308_v18  ;;  %3880 = vst [vmem:[%s6593_s25 + $0x8] sm:$0xff] %v3816_v17  ;;  %v3821_v14 = vmul.f32 %v6458_v43, %v3693_v8  ;;  %v3691_v47 = vmul.f32 %v4967_v7, %v7289_v28  ;;  %v6621_v6 = vpop.f32.mrf.mxu1  ;;  %v4312_v43 = vmul.f32 -1.442695, %v2988_v32  ;;  %v7291_v8 = vld [vmem:[#allocation39_spill] sm:$0xff] }
 0x20a   : > { %v4971_v10 = vpop.eup %4970  ;;  %v3376_v22 = vadd.f32 1.0, %v4969_v59  ;;  %4996 = vpow2.f32 %v4311_v44  ;;  %v3003_v20 = vpop.f32.mrf.mxu0  ;;  %v2318_v32 = vadd.f32 %v6512_v63, %v6301_v45  ;;  %v3012_v19 = vadd.f32 %v4446_v56, %v6438_v51 }
 0x20b   : > { %v4973_v54 = vpop.eup %4972  ;;  %3885 = vst [vmem:[%s6593_s25 + $0x30] sm:$0xff] %v3821_v14  ;;  %v3819_v16 = vmul.f32 %v6446_v26, %v3691_v47  ;;  %v3694_v18 = vmul.f32 %v4971_v10, %v7290_v48  ;;  %4998 = vpow2.f32 %v4314_v61  ;;  %v6627_v5 = vpop.f32.mrf.mxu1  ;;  %v7292_v47 = vld [vmem:[#allocation43_spill] sm:$0xff] }
 0x20c   : > { %v4975_v50 = vpop.eup %4974  ;;  %5000 = vrcp.f32 %v3376_v22  ;;  %v3381_v39 = vadd.f32 1.0, %v4973_v54  ;;  %v4449_v44 = vpop.f32.mrf.mxu0  ;;  %v4315_v22 = vmul.f32 -1.442695, %v3001_v52 }
 0x20d   : > { %v6629_v17 = vpop.eup %4976  ;;  %5002 = vrcp.f32 %v2314_v25  ;;  %3883 = vst [vmem:[%s6593_s25 + $0x20] sm:$0xff] %v3819_v16  ;;  %v3822_v26 = vmul.f32 %v6462_v46, %v3694_v18  ;;  %v3692_v7 = vmul.f32 %v4975_v50, %v7291_v8  ;;  %v6637_v60 = vpop.f32.mrf.mxu1  ;;  %v3004_v16 = vadd.f32 %v6438_v51, %v3003_v20  ;;  %v7293_v8 = vld [vmem:[#allocation41_spill] sm:$0xff] }
 0x20e   : > { %v4979_v61 = vpop.eup %4978  ;;  %5004 = vrcp.f32 %v3381_v39  ;;  %v3016_v59 = vpop.f32.mrf.mxu0  ;;  %v4318_v18 = vmul.f32 -1.442695, %v3012_v19  ;;  %v3025_v20 = vadd.f32 %v4449_v44, %v6438_v51 }
 0x20f   : > { %v4981_v14 = vpop.eup %4980  ;;  %3886 = vst [vmem:[%s6593_s25 + $0x38] sm:$0xff] %v3822_v26  ;;  %v3820_v25 = vmul.f32 %v6453_v55, %v3692_v7  ;;  %v3379_v28 = vadd.f32 1.0, %v4979_v61  ;;  %5006 = vpow2.f32 %v4312_v43  ;;  %v6642_v54 = vpop.f32.mrf.mxu1  ;;  %v2324_v26 = vadd.f32 %v6526_v57, %v6311_v0 }
 0x210   : > { %v4983_v46 = vpop.eup %4982  ;;  %v3697_v10 = vmul.f32 %v4981_v14, %v7292_v47  ;;  %5008 = vpow2.f32 %v4317_v27  ;;  %v4450_v45 = vpop.f32.mrf.mxu0  ;;  %v4316_v14 = vmul.f32 -1.442695, %v3004_v16  ;;  %v3017_v0 = vadd.f32 %v6438_v51, %v3016_v59 }
 0x211   : > { %v6644_v63 = vpop.eup %4984  ;;  %3884 = vst [vmem:[%s6593_s25 + $0x28] sm:$0xff] %v3820_v25  ;;  %5010 = vrcp.f32 %v3379_v28  ;;  %v3382_v56 = vadd.f32 1.0, %v4983_v46  ;;  %v6649_v43 = vpop.f32.mrf.mxu1  ;;  %v7294_v46 = vld [vmem:[#allocation44_spill] sm:$0xff]  ;;  %v2328_v59 = vadd.f32 %v6538_v30, %v6321_v33 }
 0x212   : > { %v4987_v48 = vpop.eup %4986  ;;  %5012 = vrcp.f32 %v2318_v32  ;;  %v3825_v55 = vmul.f32 %v6480_v38, %v3697_v10  ;;  %v3019_v50 = vpop.f32.mrf.mxu0 }
 0x213   : > { %v4989_v39 = vpop.eup %4988  ;;  %5014 = vrcp.f32 %v3382_v56  ;;  %v3380_v27 = vadd.f32 1.0, %v4987_v48  ;;  %v6656_v61 = vpop.f32.mrf.mxu1  ;;  %v4321_v48 = vmul.f32 -1.442695, %v3025_v20 }
 0x214   : > { %v4991_v52 = vpop.eup %4990  ;;  %3889 = vst [vmem:[%s6593_s25 + $0x50] sm:$0xff] %v3825_v55  ;;  %v3695_v7 = vmul.f32 %v4989_v39, %v7293_v8  ;;  %5016 = vpow2.f32 %v4315_v22  ;;  %v4453_v38 = vpop.f32.mrf.mxu0 }
 0x215   : > { %v4993_v32 = vpop.eup %4992  ;;  %5018 = vrcp.f32 %v3380_v27  ;;  %v3385_v19 = vadd.f32 1.0, %v4991_v52  ;;  %v6663_v57 = vpop.f32.mrf.mxu1  ;;  %v3028_v27 = vadd.f32 %v4450_v45, %v6438_v51 }
 0x216   : > { %v6658_v25 = vpop.eup %4994  ;;  %v3823_v28 = vmul.f32 %v6467_v36, %v3695_v7  ;;  %v3698_v47 = vmul.f32 %v4993_v32, %v7294_v46  ;;  %5020 = vpow2.f32 %v4318_v18  ;;  %v3032_v44 = vpop.f32.mrf.mxu0 }
 0x217   : > { %v4997_v10 = vpop.eup %4996  ;;  %5022 = vrcp.f32 %v3385_v19  ;;  %v6667_v55 = vpop.f32.mrf.mxu1  ;;  %v3020_v19 = vadd.f32 %v6438_v51, %v3019_v50 }
 0x218   : > { %v4999_v22 = vpop.eup %4998  ;;  %5024 = vrcp.f32 %v2324_v26  ;;  %3887 = vst [vmem:[%s6593_s25 + $0x40] sm:$0xff] %v3823_v28  ;;  %v3826_v56 = vmul.f32 %v6483_v15, %v3698_v47  ;;  %v3383_v16 = vadd.f32 1.0, %v4997_v10  ;;  %v4454_v36 = vpop.f32.mrf.mxu0  ;;  %v7295_v26 = vld [vmem:[#allocation42_spill] sm:$0xff]  ;;  %v4319_v15 = vmul.f32 -1.442695, %v3017_v0 }
 0x219   : > { %v5001_v39 = vpop.eup %5000  ;;  %v3386_v18 = vadd.f32 1.0, %v4999_v22  ;;  %5026 = vpow2.f32 %v4316_v14  ;;  %v6676_v7 = vpop.f32.mrf.mxu1  ;;  %v7296_v14 = vld [vmem:[#allocation48_spill] sm:$0xff]  ;;  %v4322_v10 = vmul.f32 -1.442695, %v3028_v27  ;;  %v3041_v22 = vadd.f32 %v4453_v38, %v6438_v51 }
 0x21a   : > { %v6672_v52 = vpop.eup %5002  ;;  %3890 = vst [vmem:[%s6593_s25 + $0x58] sm:$0xff] %v3826_v56  ;;  %v3696_v8 = vmul.f32 %v5001_v39, %v7295_v26  ;;  %5028 = vrcp.f32 %v3383_v16  ;;  %v3035_v20 = vpop.f32.mrf.mxu0  ;;  %v7297_v16 = vld [vmem:[#allocation63_spill] sm:$0xff]  ;;  %v4320_v27 = vmul.f32 -1.442695, %v3020_v19 }
 0x21b   : > { %v5005_v32 = vpop.eup %5004  ;;  %5030 = vrcp.f32 %v3386_v18  ;;  %v6681_v28 = vpop.f32.mrf.mxu1 }
 0x21c   : > { %v5007_v33 = vpop.eup %5006  ;;  %v3824_v30 = vmul.f32 %v6473_v58, %v3696_v8  ;;  %v3701_v45 = vmul.f32 %v5005_v32, %v7296_v14  ;;  %5032 = vpow2.f32 %v4321_v48  ;;  %v6683_v46 = vpop.f32.mrf.mxu0  ;;  %v2334_v58 = vadd.f32 %v6550_v34, %v7297_v16 }
 0x21d   : > { %v5009_v47 = vpop.eup %5008  ;;  %5034 = vrcp.f32 %v2328_v59  ;;  %v3384_v0 = vadd.f32 1.0, %v5007_v33  ;;  %v6690_v48 = vpop.f32.mrf.mxu1  ;;  %v7298_v59 = vld [vmem:[#allocation45_spill] sm:$0xff] }
 0x21e   : > { %v5011_v56 = vpop.eup %5010  ;;  %3888 = vst [vmem:[%s6593_s25 + $0x48] sm:$0xff] %v3824_v30  ;;  %v3829_v50 = vmul.f32 %v6494_v11, %v3701_v45  ;;  %v3389_v39 = vadd.f32 1.0, %v5009_v47  ;;  %5036 = vpow2.f32 %v4319_v15  ;;  %v6692_v18 = vpop.f32.mrf.mxu0  ;;  %v3033_v11 = vadd.f32 %v6438_v51, %v3032_v44  ;;  %v7300_v30 = vld [vmem:[#allocation50_spill] sm:$0xff] }
 0x21f   : > { %v6694_v26 = vpop.eup %5012  ;;  %v3699_v8 = vmul.f32 %v5011_v56, %v7298_v59  ;;  %5038 = vrcp.f32 %v3384_v0  ;;  %v6699_v32 = vpop.f32.mrf.mxu1  ;;  %v4325_v45 = vmul.f32 -1.442695, %v3041_v22  ;;  %v3044_v0 = vadd.f32 %v4454_v36, %v6438_v51  ;;  %v7302_v59 = vld [vmem:[#allocation46_spill] sm:$0xff] }
 0x220   : > { %v5015_v38 = vpop.eup %5014  ;;  %3893 = vst [vmem:[%s6593_s25 + $0x70] sm:$0xff] %v3829_v50  ;;  %5040 = vrcp.f32 %v3389_v39  ;;  %7299 = vst [vmem:[#allocation38_spill] sm:$0xff] %v6699_v32  ;;  %v6701_v34 = vpop.f32.mrf.mxu0  ;;  %v7301_v39 = vld [vmem:[#allocation66_spill] sm:$0xff]  ;;  %v7327_v32 = vld [vmem:[#allocation81_spill] sm:$0xff] }
 0x221   : > { %v5017_v15 = vpop.eup %5016  ;;  %v3827_v33 = vmul.f32 %v6487_v31, %v3699_v8  ;;  %v3702_v14 = vmul.f32 %v5015_v38, %v7300_v30  ;;  %5042 = vpow2.f32 %v4322_v10  ;;  %v6706_v56 = vpop.f32.mrf.mxu1  ;;  %v2338_v31 = vadd.f32 %v6560_v40, %v7301_v39  ;;  %v7304_v39 = vld [vmem:[#allocation51_spill] sm:$0xff] }
 0x222   : > { %v5019_v47 = vpop.eup %5018  ;;  %5044 = vrcp.f32 %v2334_v58  ;;  %v3387_v19 = vadd.f32 1.0, %v5017_v15  ;;  %v6708_v44 = vpop.f32.mrf.mxu0  ;;  %v4323_v8 = vmul.f32 -1.442695, %v3033_v11  ;;  %v3036_v40 = vadd.f32 %v6438_v51, %v3035_v20 }
 0x223   : > { %v5021_v50 = vpop.eup %5020  ;;  %3891 = vst [vmem:[%s6593_s25 + $0x60] sm:$0xff] %v3827_v33  ;;  %v3830_v16 = vmul.f32 %v6497_v24, %v3702_v14  ;;  %v3700_v10 = vmul.f32 %v5019_v47, %v7302_v59  ;;  %5046 = vpow2.f32 %v4320_v27  ;;  %v6715_v36 = vpop.f32.mrf.mxu1  ;;  %v7303_v33 = vld [vmem:[#allocation54_spill] sm:$0xff]  ;;  %v2344_v14 = vadd.f32 %v6576_v2, %v6349_v4 }
 0x224   : > { %v5023_v22 = vpop.eup %5022  ;;  %5048 = vrcp.f32 %v3387_v19  ;;  %v3390_v58 = vadd.f32 1.0, %v5021_v50  ;;  %v6717_v38 = vpop.f32.mrf.mxu0  ;;  %v4326_v11 = vmul.f32 -1.442695, %v3044_v0  ;;  %v3057_v20 = vadd.f32 %v6683_v46, %v6438_v51 }
 0x225   : > { %v6719_v15 = vpop.eup %5024  ;;  %3894 = vst [vmem:[%s6593_s25 + $0x78] sm:$0xff] %v3830_v16  ;;  %v3828_v24 = vmul.f32 %v6490_v29, %v3700_v10  ;;  %v3705_v30 = vmul.f32 %v5023_v22, %v7303_v33  ;;  %5050 = vpow2.f32 %v4325_v45  ;;  %v6727_v47 = vpop.f32.mrf.mxu1  ;;  %v7305_v10 = vld [vmem:[#allocation56_spill] sm:$0xff]  ;;  %v4324_v22 = vmul.f32 -1.442695, %v3036_v40 }
 0x226   : > { %v5027_v27 = vpop.eup %5026  ;;  %5052 = vrcp.f32 %v3390_v58  ;;  %v6729_v19 = vpop.f32.mrf.mxu0 }
 0x227   : > { %v5029_v50 = vpop.eup %5028  ;;  %5054 = vrcp.f32 %v2338_v31  ;;  %3892 = vst [vmem:[%s6593_s25 + $0x68] sm:$0xff] %v3828_v24  ;;  %v3833_v29 = vmul.f32 %v6514_v3, %v3705_v30  ;;  %v3388_v16 = vadd.f32 1.0, %v5027_v27  ;;  %v6736_v4 = vpop.f32.mrf.mxu1 }
 0x228   : > { %v5031_v45 = vpop.eup %5030  ;;  %v3703_v59 = vmul.f32 %v5029_v50, %v7304_v39  ;;  %5056 = vpow2.f32 %v4323_v8  ;;  %v6738_v2 = vpop.f32.mrf.mxu0  ;;  %v3049_v8 = vadd.f32 %v6438_v51, %v6692_v18  ;;  %v4329_v50 = vmul.f32 -1.442695, %v3057_v20  ;;  %v7308_v20 = vld [vmem:[#allocation62_spill] sm:$0xff] }
 0x229   : > { %v5033_v0 = vpop.eup %5032  ;;  %3897 = vst [vmem:[%s6593_s25 + $0x90] sm:$0xff] %v3833_v29  ;;  %v3706_v31 = vmul.f32 %v5031_v45, %v7305_v10  ;;  %5058 = vrcp.f32 %v3388_v16  ;;  %v6747_v24 = vpop.f32.mrf.mxu1  ;;  %v3060_v18 = vadd.f32 %v6701_v34, %v6438_v51 }
 0x22a   : > { %v6742_v3 = vpop.eup %5034  ;;  %v3831_v58 = vmul.f32 %v6504_v23, %v3703_v59  ;;  %v3393_v46 = vadd.f32 1.0, %v5033_v0  ;;  %5060 = vpow2.f32 %v4326_v11  ;;  %v6749_v33 = vpop.f32.mrf.mxu0  ;;  %v2348_v23 = vadd.f32 %v6590_v1, %v6359_v62 }
 0x22b   : > { %v5037_v30 = vpop.eup %5036  ;;  %5062 = vrcp.f32 %v2344_v14  ;;  %v3834_v27 = vmul.f32 %v6517_v53, %v3706_v31  ;;  %v6757_v29 = vpop.f32.mrf.mxu1  ;;  %v7307_v14 = vld [vmem:[#allocation52_spill] sm:$0xff]  ;;  %v4327_v62 = vmul.f32 -1.442695, %v3049_v8 }
 0x22c   : > { %v5039_v40 = vpop.eup %5038  ;;  %3895 = vst [vmem:[%s6593_s25 + $0x80] sm:$0xff] %v3831_v58  ;;  %5064 = vrcp.f32 %v3393_v46  ;;  %v3391_v11 = vadd.f32 1.0, %v5037_v30  ;;  %7306 = vst [vmem:[#allocation40_spill] sm:$0xff] %v6757_v29  ;;  %v6759_v16 = vpop.f32.mrf.mxu0  ;;  %v4330_v30 = vmul.f32 -1.442695, %v3060_v18  ;;  %v7326_v29 = vld [vmem:[#allocation102_spill] sm:$0xff] }
 0x22d   : > { %v5041_v45 = vpop.eup %5040  ;;  %3898 = vst [vmem:[%s6593_s25 + $0x98] sm:$0xff] %v3834_v27  ;;  %v3704_v39 = vmul.f32 %v5039_v40, %v7307_v14  ;;  %5066 = vpow2.f32 %v4324_v22  ;;  %v6764_v1 = vpop.f32.mrf.mxu1  ;;  %v3052_v22 = vadd.f32 %v6438_v51, %v6708_v44  ;;  %v2354_v44 = vadd.f32 %v6605_v13, %v6369_v35 }
 0x22e   : > { %v5043_v53 = vpop.eup %5042  ;;  %v3709_v59 = vmul.f32 %v5041_v45, %v7308_v20  ;;  %5068 = vrcp.f32 %v3391_v11  ;;  %v6766_v0 = vpop.f32.mrf.mxu0  ;;  %v3065_v35 = vadd.f32 %v6438_v51, %v6729_v19 }
 0x22f   : > { %v6768_v34 = vpop.eup %5044  ;;  %v3832_v10 = vmul.f32 %v6507_v49, %v3704_v39  ;;  %v3394_v31 = vadd.f32 1.0, %v5043_v53  ;;  %5070 = vpow2.f32 %v4329_v50  ;;  %v3073_v49 = vadd.f32 %v6717_v38, %v6438_v51  ;;  %v6779_v11 = vpop.f32.mrf.mxu1  ;;  %v7311_v38 = vld [vmem:[#allocation93_spill] sm:$0xff] }
 0x230   : > { %v5047_v58 = vpop.eup %5046  ;;  %5072 = vrcp.f32 %v2348_v23  ;;  %v3837_v46 = vmul.f32 %v6535_v41, %v3709_v59  ;;  %v6774_v8 = vpop.f32.mrf.mxu0  ;;  %7309 = vst [vmem:[#allocation39_spill] sm:$0xff] %v6779_v11  ;;  %v7310_v23 = vld [vmem:[#allocation58_spill] sm:$0xff]  ;;  %v4328_v39 = vmul.f32 -1.442695, %v3052_v22  ;;  %v7312_v59 = vld [vmem:[#allocation65_spill] sm:$0xff]  ;;  %v7313_v22 = vld [vmem:[#allocation96_spill] sm:$0xff] }
 0x231   : > { %v5049_v27 = vpop.eup %5048  ;;  %3896 = vst [vmem:[%s6593_s25 + $0x88] sm:$0xff] %v3832_v10  ;;  %5074 = vrcp.f32 %v3394_v31  ;;  %v3392_v40 = vadd.f32 1.0, %v5047_v58  ;;  %v4333_v31 = vmul.f32 -1.442695, %v3073_v49  ;;  %v6795_v58 = vpop.f32.mrf.mxu1  ;;  %v7321_v11 = vld [vmem:[#allocation68_spill] sm:$0xff] }
 0x232   : > { %v5051_v50 = vpop.eup %5050  ;;  %3901 = vst [vmem:[%s6593_s25 + $0xb0] sm:$0xff] %v3837_v46  ;;  %v3707_v45 = vmul.f32 %v5049_v27, %v7310_v23  ;;  %5076 = vpow2.f32 %v4327_v62  ;;  %v6785_v41 = vpop.f32.mrf.mxu0  ;;  %v7314_v23 = vld [vmem:[#allocation75_spill] sm:$0xff] }
 0x233   : > { %v5053_v18 = vpop.eup %5052  ;;  %5078 = vrcp.f32 %v3392_v40  ;;  %v3397_v14 = vadd.f32 1.0, %v5051_v50 }
 0x234   : > { %v6787_v53 = vpop.eup %5054  ;;  %v3835_v20 = vmul.f32 %v7311_v38, %v3707_v45  ;;  %v3710_v10 = vmul.f32 %v5053_v18, %v7312_v59  ;;  %5080 = vpow2.f32 %v4330_v30  ;;  %v6793_v13 = vpop.f32.mrf.mxu0  ;;  %v3076_v30 = vadd.f32 %v6738_v2, %v6438_v51  ;;  %v7315_v18 = vld [vmem:[#allocation60_spill] sm:$0xff]  ;;  %v7316_v2 = vld [vmem:[#allocation94_spill] sm:$0xff] }
 0x235   : > { %v5057_v62 = vpop.eup %5056  ;;  %5082 = vrcp.f32 %v3397_v14  ;;  %v2358_v45 = vadd.f32 %v6621_v6, %v7314_v23  ;;  %v4331_v38 = vmul.f32 -1.442695, %v3065_v35  ;;  %v6814_v6 = vpop.f32.mrf.mxu1 }
 0x236   : > { %v5059_v46 = vpop.eup %5058  ;;  %5084 = vrcp.f32 %v2354_v44  ;;  %3899 = vst [vmem:[%s6593_s25 + $0xa0] sm:$0xff] %v3835_v20  ;;  %v3838_v27 = vmul.f32 %v7313_v22, %v3710_v10  ;;  %v3395_v40 = vadd.f32 1.0, %v5057_v62  ;;  %v6801_v50 = vpop.f32.mrf.mxu0  ;;  %v3068_v62 = vadd.f32 %v6438_v51, %v6749_v33  ;;  %7317 = vst [vmem:[#allocation43_spill] sm:$0xff] %v6814_v6 }
 0x237   : > { %v5061_v19 = vpop.eup %5060  ;;  %v3708_v14 = vmul.f32 %v5059_v46, %v7315_v18  ;;  %5086 = vpow2.f32 %v4328_v39  ;;  %v7318_v39 = vld [vmem:[#allocation72_spill] sm:$0xff]  ;;  %v7319_v18 = vld [vmem:[#allocation101_spill] sm:$0xff] }
 0x238   : > { %v6806_v49 = vpop.eup %5062  ;;  %3902 = vst [vmem:[%s6593_s25 + $0xb8] sm:$0xff] %v3838_v27  ;;  %5088 = vrcp.f32 %v3395_v40  ;;  %v3398_v44 = vadd.f32 1.0, %v5061_v19  ;;  %v6809_v20 = vpop.f32.mrf.mxu0  ;;  %v4334_v27 = vmul.f32 -1.442695, %v3076_v30 }
 0x239   : > { %v5065_v59 = vpop.eup %5064  ;;  %v3836_v10 = vmul.f32 %v7316_v2, %v3708_v14  ;;  %5090 = vpow2.f32 %v4333_v31  ;;  %v3089_v31 = vadd.f32 %v6759_v16, %v6438_v51  ;;  %v7320_v14 = vld [vmem:[#allocation78_spill] sm:$0xff] }
 0x23a   : > { %v5067_v46 = vpop.eup %5066  ;;  %v3713_v22 = vmul.f32 %v5065_v59, %v7318_v39  ;;  %5092 = vrcp.f32 %v3398_v44  ;;  %v6817_v40 = vpop.f32.mrf.mxu0  ;;  %v2364_v2 = vadd.f32 %v6637_v60, %v7320_v14  ;;  %v7322_v16 = vld [vmem:[#allocation98_spill] sm:$0xff] }
 0x23b   : > { %v5069_v19 = vpop.eup %5068  ;;  %5094 = vrcp.f32 %v2358_v45  ;;  %3900 = vst [vmem:[%s6593_s25 + $0xa8] sm:$0xff] %v3836_v10  ;;  %v3396_v35 = vadd.f32 1.0, %v5067_v46  ;;  %v4332_v10 = vmul.f32 -1.442695, %v3068_v62  ;;  %v6830_v46 = vpop.f32.mrf.mxu1  ;;  %v6837_v60 = vld [vmem:[%s7186_s4] ss:$0 sm:$0xff] }
 0x23c   : > { %v5071_v23 = vpop.eup %5070  ;;  %v3841_v33 = vmul.f32 %v7319_v18, %v3713_v22  ;;  %v3711_v59 = vmul.f32 %v5069_v19, %v7321_v11  ;;  %5096 = vpow2.f32 %v4331_v38  ;;  %v6826_v30 = vpop.f32.mrf.mxu0  ;;  %v3081_v11 = vadd.f32 %v6837_v60, %v6766_v0  ;;  %v7323_v62 = vld [vmem:[#allocation74_spill] sm:$0xff]  ;;  %v7324_v18 = vld [vmem:[#allocation47_spill] sm:$0xff] }
 0x23d   : > { %v6828_v44 = vpop.eup %5072  ;;  %5098 = vrcp.f32 %v3396_v35  ;;  %v3401_v45 = vadd.f32 1.0, %v5071_v23  ;;  %v4337_v35 = vmul.f32 -1.442695, %v3089_v31  ;;  %v7328_v31 = vld [vmem:[#allocation70_spill] sm:$0xff] }
 0x23e   : > { %v5075_v51 = vpop.eup %5074  ;;  %3905 = vst [vmem:[%s6593_s25 + $0xd0] sm:$0xff] %v3841_v33  ;;  %v3839_v39 = vmul.f32 %v7322_v16, %v3711_v59  ;;  %5100 = vpow2.f32 %v4334_v27  ;;  %v6841_v38 = vpop.f32.mrf.mxu0  ;;  %v7325_v33 = vld [vmem:[#allocation83_spill] sm:$0xff]  ;;  %v3092_v59 = vadd.f32 %v6837_v60, %v6774_v8 }
 0x23f   : > { %v5077_v22 = vpop.eup %5076  ;;  %v3714_v19 = vmul.f32 %v5075_v51, %v7323_v62  ;;  %5102 = vrcp.f32 %v3401_v45  ;;  %v2292_v14 = vadd.f32 %v7325_v33, %v7324_v18  ;;  %v2368_v45 = vadd.f32 %v6649_v43, %v7327_v32  ;;  %v6855_v62 = vpop.f32.mrf.mxu1  ;;  %v7330_v33 = vld [vmem:[#allocation99_spill] sm:$0xff] }
 0x240   : > { %v5079_v23 = vpop.eup %5078  ;;  %5104 = vrcp.f32 %v2364_v2  ;;  %3903 = vst [vmem:[%s6593_s25 + $0xc0] sm:$0xff] %v3839_v39  ;;  %v3399_v27 = vadd.f32 1.0, %v5077_v22  ;;  %v6849_v16 = vpop.f32.mrf.mxu0  ;;  %7329 = vst [vmem:[#allocation41_spill] sm:$0xff] %v6855_v62  ;;  %v4335_v22 = vmul.f32 -1.442695, %v3081_v11  ;;  %v3084_v43 = vadd.f32 %v6837_v60, %v6785_v41  ;;  %v7333_v41 = vld [vmem:[#allocation84_spill] sm:$0xff] }
 0x241   : > { %v5081_v0 = vpop.eup %5080  ;;  %v3842_v6 = vmul.f32 %v7326_v29, %v3714_v19  ;;  %v3712_v51 = vmul.f32 %v5079_v23, %v7328_v31  ;;  %5106 = vpow2.f32 %v4332_v10  ;;  %v4338_v10 = vmul.f32 -1.442695, %v3092_v59  ;;  %v7332_v31 = vld [vmem:[#allocation86_spill] sm:$0xff] }
 0x242   : > { %v5083_v2 = vpop.eup %5082  ;;  %5108 = vrcp.f32 %v3399_v27  ;;  %v3402_v39 = vadd.f32 1.0, %v5081_v0  ;;  %v6857_v18 = vpop.f32.mrf.mxu0 }
 0x243   : > { %v6859_v8 = vpop.eup %5084  ;;  %3906 = vst [vmem:[%s6593_s25 + $0xd8] sm:$0xff] %v3842_v6  ;;  %v3840_v29 = vmul.f32 %v7330_v33, %v3712_v51  ;;  %v3717_v19 = vmul.f32 %v5083_v2, %v2292_v14  ;;  %5110 = vpow2.f32 %v4337_v35  ;;  %v3105_v6 = vadd.f32 %v6837_v60, %v6793_v13  ;;  %v6869_v0 = vpop.f32.mrf.mxu1  ;;  %v7331_v35 = vld [vmem:[#allocation49_spill] sm:$0xff] }
 0x244   : > { %v5087_v32 = vpop.eup %5086  ;;  %5112 = vrcp.f32 %v3402_v39  ;;  %v2296_v51 = vadd.f32 %v7332_v31, %v7331_v35  ;;  %v2374_v2 = vadd.f32 %v6663_v57, %v7333_v41  ;;  %v7334_v39 = vld [vmem:[#allocation77_spill] sm:$0xff]  ;;  %v4336_v13 = vmul.f32 -1.442695, %v3084_v43 }
 0x245   : > { %v5089_v23 = vpop.eup %5088  ;;  %5114 = vrcp.f32 %v2368_v45  ;;  %3904 = vst [vmem:[%s6593_s25 + $0xc8] sm:$0xff] %v3840_v29  ;;  %v3845_v11 = vmul.f32 %v6607_v37, %v3717_v19  ;;  %v3400_v27 = vadd.f32 1.0, %v5087_v32  ;;  %v6876_v45 = vpop.f32.mrf.mxu0  ;;  %v7335_v19 = vld [vmem:[#allocation104_spill] sm:$0xff]  ;;  %v3097_v57 = vadd.f32 %v6837_v60, %v6801_v50  ;;  %v7337_v50 = vld [vmem:[#allocation90_spill] sm:$0xff] }
 0x246   : > { %v5091_v14 = vpop.eup %5090  ;;  %v3715_v59 = vmul.f32 %v5089_v23, %v7334_v39  ;;  %5116 = vpow2.f32 %v4335_v22  ;;  %v4341_v22 = vmul.f32 -1.442695, %v3105_v6  ;;  %v6884_v23 = vpop.f32.mrf.mxu1  ;;  %v7338_v39 = vld [vmem:[#allocation87_spill] sm:$0xff] }
 0x247   : > { %v5093_v33 = vpop.eup %5092  ;;  %3909 = vst [vmem:[%s6593_s25 + $0xf0] sm:$0xff] %v3845_v11  ;;  %5118 = vrcp.f32 %v3400_v27  ;;  %v3405_v37 = vadd.f32 1.0, %v5091_v14  ;;  %v3108_v27 = vadd.f32 %v6837_v60, %v6809_v20  ;;  %v6890_v14 = vpop.f32.mrf.mxu0  ;;  %v2378_v6 = vadd.f32 %v6676_v7, %v7338_v39  ;;  %v7343_v39 = vld [vmem:[#allocation88_spill] sm:$0xff] }
 0x248   : > { %v6879_v29 = vpop.eup %5094  ;;  %v3843_v32 = vmul.f32 %v7335_v19, %v3715_v59  ;;  %v3718_v62 = vmul.f32 %v5093_v33, %v2296_v51  ;;  %5120 = vpow2.f32 %v4338_v10  ;;  %v7336_v51 = vld [vmem:[#allocation53_spill] sm:$0xff]  ;;  %v7339_v59 = vld [vmem:[#allocation80_spill] sm:$0xff] }
 0x249   : > { %v5097_v35 = vpop.eup %5096  ;;  %5122 = vrcp.f32 %v3405_v37  ;;  %v2312_v41 = vadd.f32 %v7337_v50, %v7336_v51  ;;  %v7342_v50 = vld [vmem:[#allocation7_spill] sm:$0xff] }
 0x24a   : > { %v5099_v31 = vpop.eup %5098  ;;  %5124 = vrcp.f32 %v2374_v2  ;;  %3907 = vst [vmem:[%s6593_s25 + $0xe0] sm:$0xff] %v3843_v32  ;;  %v3846_v43 = vmul.f32 %v6629_v17, %v3718_v62  ;;  %v3403_v11 = vadd.f32 1.0, %v5097_v35  ;;  %v4339_v62 = vmul.f32 -1.442695, %v3097_v57  ;;  %v6903_v35 = vpop.f32.mrf.mxu1 }
 0x24b   : > { %v5101_v10 = vpop.eup %5100  ;;  %v3716_v33 = vmul.f32 %v5099_v31, %v7339_v59  ;;  %5126 = vpow2.f32 %v4336_v13  ;;  %v3100_v32 = vadd.f32 %v6837_v60, %v6817_v40  ;;  %v4342_v13 = vmul.f32 -1.442695, %v3108_v27  ;;  %v6905_v31 = vpop.f32.mrf.mxu0  ;;  %v7341_v40 = vld [vmem:[#allocation91_spill] sm:$0xff] }
 0x24c   : > { %v5103_v2 = vpop.eup %5102  ;;  %3910 = vst [vmem:[%s6593_s25 + $0xf8] sm:$0xff] %v3846_v43  ;;  %5128 = vrcp.f32 %v3403_v11  ;;  %v3406_v17 = vadd.f32 1.0, %v5101_v10  ;;  %v7340_v10 = vld [vmem:[#allocation55_spill] sm:$0xff] }
 0x24d   : > { %v6898_v37 = vpop.eup %5104  ;;  %v3844_v20 = vmul.f32 %v6584_v12, %v3716_v33  ;;  %v3721_v19 = vmul.f32 %v5103_v2, %v2312_v41  ;;  %5130 = vpow2.f32 %v4341_v22  ;;  %v3121_v12 = vadd.f32 %v6837_v60, %v6826_v30  ;;  %v6917_v33 = vpop.f32.mrf.mxu1 }
 0x24e   : > { %v5107_v7 = vpop.eup %5106  ;;  %5132 = vrcp.f32 %v3406_v17  ;;  %v2316_v51 = vadd.f32 %v7341_v40, %v7340_v10  ;;  %v2384_v41 = vadd.f32 %v6690_v48, %v7342_v50  ;;  %v3113_v48 = vadd.f32 %v6837_v60, %v6841_v38  ;;  %v7346_v38 = vld [vmem:[#allocation9_spill] sm:$0xff] }
 0x24f   : > { %v5109_v43 = vpop.eup %5108  ;;  %5134 = vrcp.f32 %v2378_v6  ;;  %3908 = vst [vmem:[%s6593_s25 + $0xe8] sm:$0xff] %v3844_v20  ;;  %v3849_v57 = vmul.f32 %v6672_v52, %v3721_v19  ;;  %v3404_v11 = vadd.f32 1.0, %v5107_v7  ;;  %v4340_v52 = vmul.f32 -1.442695, %v3100_v32  ;;  %v6924_v20 = vpop.f32.mrf.mxu0  ;;  %v7347_v40 = vld [vmem:[#allocation89_spill] sm:$0xff] }
 0x250   : > { %v5111_v22 = vpop.eup %5110  ;;  %v3719_v27 = vmul.f32 %v5109_v43, %v7343_v39  ;;  %5136 = vpow2.f32 %v4339_v62  ;;  %v4345_v19 = vmul.f32 -1.442695, %v3121_v12  ;;  %v2388_v10 = vadd.f32 %v6706_v56, %v7346_v38  ;;  %v6935_v12 = vpop.f32.mrf.mxu1 }
 0x251   : > { %v5113_v59 = vpop.eup %5112  ;;  %3913 = vst [vmem:[%s6593_s25 + $0x110] sm:$0xff] %v3849_v57  ;;  %5138 = vrcp.f32 %v3404_v11  ;;  %v3409_v6 = vadd.f32 1.0, %v5111_v22  ;;  %v7345_v11 = vld [vmem:[#allocation97_spill] sm:$0xff]  ;;  %v6938_v39 = vpop.f32.mrf.mxu0  ;;  %v3116_v56 = vadd.f32 %v6837_v60, %v6857_v18  ;;  %v7350_v18 = vld [vmem:[#allocation64_spill] sm:$0xff] }
 0x252   : > { %v6919_v2 = vpop.eup %5114  ;;  %v3847_v30 = vmul.f32 %v6644_v63, %v3719_v27  ;;  %v3722_v17 = vmul.f32 %v5113_v59, %v2316_v51  ;;  %5140 = vpow2.f32 %v4342_v13  ;;  %v3124_v63 = vadd.f32 %v6837_v60, %v6849_v16  ;;  %v7344_v13 = vld [vmem:[#allocation61_spill] sm:$0xff] }
 0x253   : > { %v5117_v62 = vpop.eup %5116  ;;  %5142 = vrcp.f32 %v3409_v6  ;;  %v2332_v22 = vadd.f32 %v7345_v11, %v7344_v13  ;;  %v7352_v11 = vld [vmem:[#allocation11_spill] sm:$0xff] }
 0x254   : > { %v5119_v7 = vpop.eup %5118  ;;  %5144 = vrcp.f32 %v2384_v41  ;;  %3911 = vst [vmem:[%s6593_s25 + $0x100] sm:$0xff] %v3847_v30  ;;  %v3850_v32 = vmul.f32 %v6694_v26, %v3722_v17  ;;  %v3407_v43 = vadd.f32 1.0, %v5117_v62  ;;  %v4343_v41 = vmul.f32 -1.442695, %v3113_v48  ;;  %v7349_v30 = vld [vmem:[#allocation92_spill] sm:$0xff] }
 0x255   : > { %v5121_v57 = vpop.eup %5120  ;;  %v3720_v51 = vmul.f32 %v5119_v7, %v7347_v40  ;;  %5146 = vpow2.f32 %v4340_v52  ;;  %v7348_v52 = vld [vmem:[#allocation57_spill] sm:$0xff]  ;;  %v4346_v62 = vmul.f32 -1.442695, %v3124_v63  ;;  %v6957_v63 = vpop.f32.mrf.mxu0  ;;  %v4344_v40 = vmul.f32 -1.442695, %v3116_v56 }
 0x256   : > { %v5123_v50 = vpop.eup %5122  ;;  %3914 = vst [vmem:[%s6593_s25 + $0x118] sm:$0xff] %v3850_v32  ;;  %5148 = vrcp.f32 %v3407_v43  ;;  %v3410_v26 = vadd.f32 1.0, %v5121_v57  ;;  %v2322_v17 = vadd.f32 %v7349_v30, %v7348_v52  ;;  %v6949_v43 = vpop.f32.mrf.mxu1  ;;  %v7351_v57 = vld [vmem:[#allocation100_spill] sm:$0xff] }
 0x257   : > { %v6940_v16 = vpop.eup %5124  ;;  %v3848_v27 = vmul.f32 %v6658_v25, %v3720_v51  ;;  %v3725_v59 = vmul.f32 %v5123_v50, %v2332_v22  ;;  %5150 = vpow2.f32 %v4345_v19  ;;  %v3137_v25 = vadd.f32 %v6837_v60, %v6876_v45 }
 0x258   : > { %v5127_v6 = vpop.eup %5126  ;;  %5152 = vrcp.f32 %v3410_v26  ;;  %v2336_v13 = vadd.f32 %v7351_v57, %v7350_v18  ;;  %v2394_v22 = vadd.f32 %v6727_v47, %v7352_v11  ;;  %v3129_v26 = vadd.f32 %v6837_v60, %v6890_v14  ;;  %v6967_v52 = vpop.f32.mrf.mxu1 }
 0x259   : > { %v5129_v7 = vpop.eup %5128  ;;  %5154 = vrcp.f32 %v2388_v10  ;;  %3912 = vst [vmem:[%s6593_s25 + $0x108] sm:$0xff] %v3848_v27  ;;  %v3853_v48 = vmul.f32 %v6768_v34, %v3725_v59  ;;  %v3408_v32 = vadd.f32 1.0, %v5127_v6  ;;  %v7353_v27 = vld [vmem:[#allocation59_spill] sm:$0xff]  ;;  %v4349_v6 = vmul.f32 -1.442695, %v3137_v25 }
 0x25a   : > { %v5131_v19 = vpop.eup %5130  ;;  %v3723_v38 = vmul.f32 %v5129_v7, %v2322_v17  ;;  %5156 = vpow2.f32 %v4343_v41  ;;  %v7354_v41 = vld [vmem:[#allocation95_spill] sm:$0xff]  ;;  %v3140_v17 = vadd.f32 %v6837_v60, %v6905_v31 }
 0x25b   : > { %v5133_v10 = vpop.eup %5132  ;;  %3917 = vst [vmem:[%s6593_s25 + $0x130] sm:$0xff] %v3853_v48  ;;  %5158 = vrcp.f32 %v3408_v32  ;;  %v3413_v34 = vadd.f32 1.0, %v5131_v19  ;;  %v2326_v59 = vadd.f32 %v7354_v41, %v7353_v27  ;;  %v7355_v7 = vld [vmem:[#allocation71_spill] sm:$0xff]  ;;  %v7356_v32 = vld [vmem:[#allocation13_spill] sm:$0xff] }
 0x25c   : > { %v6960_v51 = vpop.eup %5134  ;;  %v3851_v45 = vmul.f32 %v6719_v15, %v3723_v38  ;;  %v3726_v50 = vmul.f32 %v5133_v10, %v2336_v13  ;;  %5160 = vpow2.f32 %v4346_v62  ;;  %v4482_v62 = vpop.f32.mrf.mxu0  ;;  %v2352_v48 = vadd.f32 %v6598_v9, %v7355_v7  ;;  %v7357_v38 = vld [vmem:[#allocation67_spill] sm:$0xff]  ;;  %v7359_v41 = vld [vmem:[#allocation73_spill] sm:$0xff] }
 0x25d   : > { %v5137_v47 = vpop.eup %5136  ;;  %5162 = vrcp.f32 %v3413_v34  ;;  %v2398_v19 = vadd.f32 %v6747_v24, %v7356_v32  ;;  %v3132_v9 = vadd.f32 %v6837_v60, %v6924_v20  ;;  %v7358_v10 = vld [vmem:[#allocation103_spill] sm:$0xff]  ;;  %v2356_v20 = vadd.f32 %v6614_v21, %v7359_v41  ;;  %v7361_v32 = vld [vmem:[#allocation69_spill] sm:$0xff] }
 0x25e   : > { %v5139_v30 = vpop.eup %5138  ;;  %5164 = vrcp.f32 %v2394_v22  ;;  %3915 = vst [vmem:[%s6593_s25 + $0x120] sm:$0xff] %v3851_v45  ;;  %v3854_v56 = vmul.f32 %v6787_v53, %v3726_v50  ;;  %v3411_v15 = vadd.f32 1.0, %v5137_v47  ;;  %v4347_v53 = vmul.f32 -1.442695, %v3129_v26  ;;  %v6981_v22 = vpop.f32.mrf.mxu1 }
 0x25f   : > { %v5141_v14 = vpop.eup %5140  ;;  %v3724_v25 = vmul.f32 %v5139_v30, %v2326_v59  ;;  %5166 = vpow2.f32 %v4344_v40  ;;  %v2342_v34 = vadd.f32 %v7358_v10, %v7357_v38  ;;  %v4350_v40 = vmul.f32 -1.442695, %v3140_v17  ;;  %v3147_v45 = vpop.f32.mrf.mxu0  ;;  %v7360_v59 = vld [vmem:[#allocation15_spill] sm:$0xff] }
 0x260   : > { %v5143_v18 = vpop.eup %5142  ;;  %3918 = vst [vmem:[%s6593_s25 + $0x138] sm:$0xff] %v3854_v56  ;;  %5168 = vrcp.f32 %v3411_v15  ;;  %v3414_v57 = vadd.f32 1.0, %v5141_v14  ;;  %v3153_v47 = vadd.f32 %v6837_v60, %v6938_v39  ;;  %v6996_v17 = vpop.f32.mrf.mxu1  ;;  %v3145_v21 = vadd.f32 %v6837_v60, %v6957_v63 }
 0x261   : > { %v6978_v13 = vpop.eup %5144  ;;  %v3852_v31 = vmul.f32 %v6742_v3, %v3724_v25  ;;  %v3729_v11 = vmul.f32 %v5143_v18, %v2352_v48  ;;  %5170 = vpow2.f32 %v4349_v6  ;;  %v2404_v6 = vadd.f32 %v6764_v1, %v7360_v59  ;;  %v4485_v1 = vpop.f32.mrf.mxu0 }
 0x262   : > { %v5147_v24 = vpop.eup %5146  ;;  %5172 = vrcp.f32 %v3414_v57  ;;  %v4353_v25 = vmul.f32 -1.442695, %v3153_v47 }
 0x263   : > { %v5149_v50 = vpop.eup %5148  ;;  %5174 = vrcp.f32 %v2398_v19  ;;  %3916 = vst [vmem:[%s6593_s25 + $0x128] sm:$0xff] %v3852_v31  ;;  %v3857_v3 = vmul.f32 %v6859_v8, %v3729_v11  ;;  %v3412_v26 = vadd.f32 1.0, %v5147_v24  ;;  %v4348_v8 = vmul.f32 -1.442695, %v3132_v9  ;;  %v7362_v11 = vld [vmem:[#allocation82_spill] sm:$0xff]  ;;  %v7363_v9 = vld [vmem:[#allocation17_spill] sm:$0xff] }
 0x264   : > { %v5151_v27 = vpop.eup %5150  ;;  %v3727_v30 = vmul.f32 %v5149_v50, %v2342_v34  ;;  %5176 = vpow2.f32 %v4347_v53  ;;  %v2346_v19 = vadd.f32 %v6582_v42, %v7361_v32  ;;  %v2372_v63 = vadd.f32 %v6656_v61, %v7362_v11  ;;  %v7012_v42 = vpop.f32.mrf.mxu1 }
 0x265   : > { %v5153_v56 = vpop.eup %5152  ;;  %3921 = vst [vmem:[%s6593_s25 + $0x150] sm:$0xff] %v3857_v3  ;;  %5178 = vrcp.f32 %v3412_v26  ;;  %v3417_v15 = vadd.f32 1.0, %v5151_v27  ;;  %v2408_v24 = vadd.f32 %v6795_v58, %v7363_v9  ;;  %v3148_v61 = vadd.f32 %v6837_v60, %v3147_v45  ;;  %v7364_v26 = vld [vmem:[#allocation76_spill] sm:$0xff]  ;;  %v7368_v9 = vld [vmem:[#allocation10_spill] sm:$0xff] }
 0x266   : > { %v6998_v14 = vpop.eup %5154  ;;  %v3855_v39 = vmul.f32 %v6806_v49, %v3727_v30  ;;  %v3730_v7 = vmul.f32 %v5153_v56, %v2356_v20  ;;  %5180 = vpow2.f32 %v4350_v40  ;;  %v3156_v49 = vadd.f32 %v6837_v60, %v4482_v62  ;;  %v3160_v40 = vpop.f32.mrf.mxu0  ;;  %v7365_v56 = vld [vmem:[#allocation85_spill] sm:$0xff] }
 0x267   : > { %v5157_v48 = vpop.eup %5156  ;;  %5182 = vrcp.f32 %v3417_v15  ;;  %v2362_v47 = vadd.f32 %v6627_v5, %v7364_v26  ;;  %v2376_v45 = vadd.f32 %v6667_v55, %v7365_v56  ;;  %v7366_v15 = vld [vmem:[#allocation19_spill] sm:$0xff]  ;;  %v3161_v55 = vadd.f32 %v6837_v60, %v3160_v40 }
 0x268   : > { %v5159_v18 = vpop.eup %5158  ;;  %5184 = vrcp.f32 %v2404_v6  ;;  %3919 = vst [vmem:[%s6593_s25 + $0x140] sm:$0xff] %v3855_v39  ;;  %v3858_v57 = vmul.f32 %v6879_v29, %v3730_v7  ;;  %v3415_v53 = vadd.f32 1.0, %v5157_v48  ;;  %v4351_v29 = vmul.f32 -1.442695, %v3145_v21  ;;  %v7023_v6 = vpop.f32.mrf.mxu1  ;;  %v7372_v56 = vld [vmem:[#allocation27_spill] sm:$0xff] }
 0x269   : > { %v5161_v31 = vpop.eup %5160  ;;  %v3728_v38 = vmul.f32 %v5159_v18, %v2346_v19  ;;  %5186 = vpow2.f32 %v4348_v8  ;;  %v4354_v27 = vmul.f32 -1.442695, %v3156_v49  ;;  %v2414_v5 = vadd.f32 %v6830_v46, %v7366_v15  ;;  %v4486_v39 = vpop.f32.mrf.mxu0 }
 0x26a   : > { %v5163_v10 = vpop.eup %5162  ;;  %3922 = vst [vmem:[%s6593_s25 + $0x158] sm:$0xff] %v3858_v57  ;;  %5188 = vrcp.f32 %v3415_v53  ;;  %v3418_v34 = vadd.f32 1.0, %v5161_v31  ;;  %v4352_v21 = vmul.f32 -1.442695, %v3148_v61  ;;  %v7037_v18 = vpop.f32.mrf.mxu1  ;;  %v4355_v40 = vmul.f32 -1.442695, %v3161_v55 }
 0x26b   : > { %v7015_v50 = vpop.eup %5164  ;;  %v3856_v62 = vmul.f32 %v6828_v44, %v3728_v38  ;;  %v3733_v3 = vmul.f32 %v5163_v10, %v2372_v63  ;;  %5190 = vpow2.f32 %v4353_v25  ;;  %v3169_v44 = vadd.f32 %v6837_v60, %v4485_v1  ;;  %v7367_v25 = vld [vmem:[#allocation79_spill] sm:$0xff]  ;;  %v3163_v11 = vpop.f32.mrf.mxu0  ;;  %v7369_v38 = vld [vmem:[#allocation21_spill] sm:$0xff] }
 0x26c   : > { %v5167_v58 = vpop.eup %5166  ;;  %5192 = vrcp.f32 %v3418_v34  ;;  %v2366_v46 = vadd.f32 %v6642_v54, %v7367_v25  ;;  %v2418_v54 = vadd.f32 %v6869_v0, %v7369_v38  ;;  %v7050_v61 = vpop.f32.mrf.mxu1  ;;  %v7379_v38 = vld [vmem:[#allocation14_spill] sm:$0xff] }
 0x26d   : > { %v5169_v41 = vpop.eup %5168  ;;  %5194 = vrcp.f32 %v2408_v24  ;;  %3920 = vst [vmem:[%s6593_s25 + $0x148] sm:$0xff] %v3856_v62  ;;  %v3861_v20 = vmul.f32 %v6940_v16, %v3733_v3  ;;  %v3416_v59 = vadd.f32 1.0, %v5167_v58  ;;  %v4357_v57 = vmul.f32 -1.442695, %v3169_v44  ;;  %v7370_v58 = vld [vmem:[#allocation6_spill] sm:$0xff] }
 0x26e   : > { %v5171_v30 = vpop.eup %5170  ;;  %v3731_v8 = vmul.f32 %v5169_v41, %v2362_v47  ;;  %5196 = vpow2.f32 %v4351_v29  ;;  %v2392_v24 = vadd.f32 %v6715_v36, %v7368_v9  ;;  %v3164_v36 = vadd.f32 %v6837_v60, %v3163_v11  ;;  %v7062_v15 = vpop.f32.mrf.mxu1 }
 0x26f   : > { %v5173_v7 = vpop.eup %5172  ;;  %3925 = vst [vmem:[%s6593_s25 + $0x170] sm:$0xff] %v3861_v20  ;;  %5198 = vrcp.f32 %v3416_v59  ;;  %v3421_v16 = vadd.f32 1.0, %v5171_v30  ;;  %v2382_v26 = vadd.f32 %v6681_v28, %v7370_v58  ;;  %v7371_v59 = vld [vmem:[#allocation12_spill] sm:$0xff]  ;;  %v7383_v58 = vld [vmem:[#allocation41_spill] sm:$0xff] }
 0x270   : > { %v7031_v48 = vpop.eup %5174  ;;  %v3859_v1 = vmul.f32 %v6898_v37, %v3731_v8  ;;  %v3734_v32 = vmul.f32 %v5173_v7, %v2376_v45  ;;  %5200 = vpow2.f32 %v4354_v27  ;;  %v3172_v37 = vadd.f32 %v6837_v60, %v4486_v39  ;;  %v7373_v7 = vld [vmem:[#allocation8_spill] sm:$0xff] }
 0x271   : > { %v5177_v19 = vpop.eup %5176  ;;  %5202 = vrcp.f32 %v3421_v16  ;;  %v2396_v44 = vadd.f32 %v6736_v4, %v7371_v59  ;;  %v2434_v60 = vadd.f32 %v6967_v52, %v7372_v56  ;;  %v7374_v16 = vld [vmem:[#allocation38_spill] sm:$0xff]  ;;  %v7386_v56 = vld [vmem:[#allocation39_spill] sm:$0xff] }
 0x272   : > { %v5179_v53 = vpop.eup %5178  ;;  %5204 = vrcp.f32 %v2414_v5  ;;  %3923 = vst [vmem:[%s6593_s25 + $0x160] sm:$0xff] %v3859_v1  ;;  %v3862_v49 = vmul.f32 %v6960_v51, %v3734_v32  ;;  %v3419_v31 = vadd.f32 1.0, %v5177_v19  ;;  %v4358_v47 = vmul.f32 -1.442695, %v3172_v37  ;;  %v7378_v37 = vld [vmem:[#allocation29_spill] sm:$0xff] }
 0x273   : > { %v5181_v63 = vpop.eup %5180  ;;  %v3732_v10 = vmul.f32 %v5179_v53, %v2366_v46  ;;  %5206 = vpow2.f32 %v4352_v21  ;;  %v4356_v5 = vmul.f32 -1.442695, %v3164_v36  ;;  %v2386_v52 = vadd.f32 %v7374_v16, %v7373_v7  ;;  %v7375_v21 = vld [vmem:[#allocation23_spill] sm:$0xff]  ;;  %v7376_v46 = vld [vmem:[#allocation18_spill] sm:$0xff] }
 0x274   : > { %v5183_v34 = vpop.eup %5182  ;;  %3926 = vst [vmem:[%s6593_s25 + $0x178] sm:$0xff] %v3862_v49  ;;  %5208 = vrcp.f32 %v3419_v31  ;;  %v3422_v29 = vadd.f32 1.0, %v5181_v63  ;;  %v2424_v1 = vadd.f32 %v6903_v35, %v7375_v21  ;;  %v2453_v49 = vpop.f32.mrf.mxu1  ;;  %v2438_v35 = vadd.f32 %v6996_v17, %v7378_v37  ;;  %v7388_v16 = vld [vmem:[#allocation26_spill] sm:$0xff] }
 0x275   : > { %v7047_v51 = vpop.eup %5184  ;;  %v3860_v62 = vmul.f32 %v6919_v2, %v3732_v10  ;;  %v3737_v3 = vmul.f32 %v5183_v34, %v2392_v24  ;;  %5210 = vpow2.f32 %v4357_v57  ;;  %v7381_v34 = vld [vmem:[#allocation25_spill] sm:$0xff] }
 0x276   : > { %v5187_v0 = vpop.eup %5186  ;;  %5212 = vrcp.f32 %v3422_v29  ;;  %v2428_v29 = vadd.f32 %v6935_v12, %v7381_v34 }
 0x277   : > { %v5189_v27 = vpop.eup %5188  ;;  %5214 = vrcp.f32 %v2418_v54  ;;  %3924 = vst [vmem:[%s6593_s25 + $0x168] sm:$0xff] %v3860_v62  ;;  %v3865_v41 = vmul.f32 %v7015_v50, %v3737_v3  ;;  %v3420_v20 = vadd.f32 1.0, %v5187_v0  ;;  %v7380_v54 = vld [vmem:[#allocation40_spill] sm:$0xff]  ;;  %v7084_v3 = vpop.f32.mrf.mxu1 }
 0x278   : > { %v5191_v2 = vpop.eup %5190  ;;  %v3735_v30 = vmul.f32 %v5189_v27, %v2382_v26  ;;  %5216 = vpow2.f32 %v4355_v40  ;;  %v2402_v10 = vadd.f32 %v7380_v54, %v7379_v38  ;;  %v7382_v0 = vld [vmem:[#allocation20_spill] sm:$0xff] }
 0x279   : > { %v5193_v45 = vpop.eup %5192  ;;  %3929 = vst [vmem:[%s6593_s25 + $0x190] sm:$0xff] %v3865_v41  ;;  %5218 = vrcp.f32 %v3420_v20  ;;  %v3425_v28 = vadd.f32 1.0, %v5191_v2  ;;  %v7384_v41 = vld [vmem:[#allocation35_spill] sm:$0xff]  ;;  %v7393_v38 = vld [vmem:[#allocation24_spill] sm:$0xff] }
 0x27a   : > { %v7064_v8 = vpop.eup %5194  ;;  %v3863_v50 = vmul.f32 %v6978_v13, %v3735_v30  ;;  %v3738_v39 = vmul.f32 %v5193_v45, %v2396_v44  ;;  %5220 = vpow2.f32 %v4358_v47  ;;  %v7377_v13 = vld [vmem:[#allocation43_spill] sm:$0xff]  ;;  %v2454_v12 = vadd.f32 %v2453_v49, %v7384_v41  ;;  %v7385_v30 = vld [vmem:[#allocation16_spill] sm:$0xff]  ;;  %v7391_v49 = vld [vmem:[#allocation33_spill] sm:$0xff] }
 0x27b   : > { %v5197_v4 = vpop.eup %5196  ;;  %5222 = vrcp.f32 %v3425_v28  ;;  %v2412_v57 = vadd.f32 %v7377_v13, %v7376_v46  ;;  %v7387_v45 = vld [vmem:[#allocation31_spill] sm:$0xff]  ;;  %v7390_v13 = vld [vmem:[#allocation22_spill] sm:$0xff]  ;;  %v2426_v54 = vadd.f32 %v6917_v33, %v7393_v38  ;;  %v7396_v41 = vld [vmem:[#allocation36_spill] sm:$0xff] }
 0x27c   : > { %v5199_v32 = vpop.eup %5198  ;;  %3927 = vst [vmem:[%s6593_s25 + $0x180] sm:$0xff] %v3863_v50  ;;  %v3866_v55 = vmul.f32 %v7031_v48, %v3738_v39  ;;  %5224 = vrcp.f32 %v2434_v60  ;;  %v3423_v19 = vadd.f32 1.0, %v5197_v4  ;;  %v2406_v60 = vadd.f32 %v7386_v56, %v7385_v30 }
 0x27d   : > { %v5201_v25 = vpop.eup %5200  ;;  %v3736_v53 = vmul.f32 %v5199_v32, %v2386_v52  ;;  %5226 = vpow2.f32 %v4356_v5  ;;  %v2444_v28 = vadd.f32 %v7023_v6, %v7387_v45  ;;  %v2457_v5 = vpop.f32.mrf.mxu1  ;;  %v2432_v52 = vadd.f32 %v6949_v43, %v7388_v16  ;;  %v7389_v32 = vld [vmem:[#allocation37_spill] sm:$0xff] }
 0x27e   : > { %v5203_v31 = vpop.eup %5202  ;;  %3930 = vst [vmem:[%s6593_s25 + $0x198] sm:$0xff] %v3866_v55  ;;  %5228 = vrcp.f32 %v3423_v19  ;;  %v3426_v11 = vadd.f32 1.0, %v5201_v25  ;;  %v2458_v55 = vadd.f32 %v2457_v5, %v7389_v32 }
 0x27f   : > { %v5205_v63 = vpop.eup %5204  ;;  %5230 = vrcp.f32 %v2424_v1  ;;  %v3864_v48 = vmul.f32 %v6998_v14, %v3736_v53  ;;  %v3741_v9 = vmul.f32 %v5203_v31, %v2412_v57  ;;  %v2416_v14 = vadd.f32 %v7383_v58, %v7382_v0  ;;  %v7395_v58 = vld [vmem:[#allocation30_spill] sm:$0xff] }
 0x280   : > { %v5207_v24 = vpop.eup %5206  ;;  %5232 = vrcp.f32 %v3426_v11  ;;  %v2422_v57 = vadd.f32 %v6884_v23, %v7390_v13  ;;  %v2448_v31 = vadd.f32 %v7050_v61, %v7391_v49  ;;  %v7392_v11 = vld [vmem:[#allocation28_spill] sm:$0xff]  ;;  %v2442_v33 = vadd.f32 %v7012_v42, %v7395_v58 }
 0x281   : > { %v5209_v40 = vpop.eup %5208  ;;  %3928 = vst [vmem:[%s6593_s25 + $0x188] sm:$0xff] %v3864_v48  ;;  %v3869_v62 = vmul.f32 %v5205_v63, %v3741_v9  ;;  %v3424_v17 = vadd.f32 1.0, %v5207_v24  ;;  %5234 = vrcp.f32 %v2438_v35 }
 0x282   : > { %v5211_v36 = vpop.eup %5210  ;;  %v3739_v26 = vmul.f32 %v5209_v40, %v2402_v10 }
 0x283   : > { %v5213_v47 = vpop.eup %5212  ;;  %3933 = vst [vmem:[%s6593_s25 + $0x1b0] sm:$0xff] %v3869_v62  ;;  %5236 = vrcp.f32 %v3424_v17  ;;  %v3429_v27 = vadd.f32 1.0, %v5211_v36 }
 0x284   : > { %v5215_v20 = vpop.eup %5214  ;;  %5238 = vrcp.f32 %v2428_v29  ;;  %v3867_v2 = vmul.f32 %v7047_v51, %v3739_v26  ;;  %v3742_v59 = vmul.f32 %v5213_v47, %v2416_v14  ;;  %v7394_v29 = vld [vmem:[#allocation34_spill] sm:$0xff] }
 0x285   : > { %v5217_v44 = vpop.eup %5216  ;;  %5240 = vrcp.f32 %v3429_v27  ;;  %v2452_v40 = vadd.f32 %v7062_v15, %v7394_v29  ;;  %v2456_v15 = vadd.f32 %v7084_v3, %v7396_v41 }
 0x286   : > { %v5219_v50 = vpop.eup %5218  ;;  %3931 = vst [vmem:[%s6593_s25 + $0x1a0] sm:$0xff] %v3867_v2  ;;  %v3870_v39 = vmul.f32 %v5215_v20, %v3742_v59  ;;  %v3427_v4 = vadd.f32 1.0, %v5217_v44  ;;  %5242 = vrcp.f32 %v2454_v12  ;;  %v7397_v44 = vld [vmem:[#allocation32_spill] sm:$0xff] }
 0x287   : > { %v5221_v7 = vpop.eup %5220  ;;  %v3740_v51 = vmul.f32 %v5219_v50, %v2406_v60  ;;  %v2446_v42 = vadd.f32 %v7037_v18, %v7397_v44 }
 0x288   : > { %v5223_v21 = vpop.eup %5222  ;;  %3934 = vst [vmem:[%s6593_s25 + $0x1b8] sm:$0xff] %v3870_v39  ;;  %5244 = vrcp.f32 %v3427_v4  ;;  %v3430_v1 = vadd.f32 1.0, %v5221_v7 }
 0x289   : > { %v5225_v6 = vpop.eup %5224  ;;  %v3868_v19 = vmul.f32 %v7064_v8, %v3740_v51  ;;  %v3745_v25 = vmul.f32 %v5223_v21, %v2432_v52  ;;  %5246 = vrcp.f32 %v2444_v28  ;;  %v2436_v8 = vadd.f32 %v6981_v22, %v7392_v11 }
 0x28a   : > { %v5227_v46 = vpop.eup %5226  ;;  %5248 = vrcp.f32 %v3430_v1 }
 0x28b   : > { %v5229_v43 = vpop.eup %5228  ;;  %3932 = vst [vmem:[%s6593_s25 + $0x1a8] sm:$0xff] %v3868_v19  ;;  %v3873_v53 = vmul.f32 %v5225_v6, %v3745_v25  ;;  %v3428_v37 = vadd.f32 1.0, %v5227_v46  ;;  %5250 = vrcp.f32 %v2458_v55 }
 0x28c   : > { %v5231_v35 = vpop.eup %5230  ;;  %v3743_v63 = vmul.f32 %v5229_v43, %v2422_v57 }
 0x28d   : > { %v5233_v48 = vpop.eup %5232  ;;  %3937 = vst [vmem:[%s6593_s25 + $0x1d0] sm:$0xff] %v3873_v53  ;;  %5252 = vrcp.f32 %v3428_v37 }
 0x28e   : > { %v3871_v23 = vmul.f32 %v5231_v35, %v3743_v63  ;;  %v3746_v9 = vmul.f32 %v5233_v48, %v2436_v8  ;;  %v5235_v24 = vpop.eup %5234  ;;  %5254 = vrcp.f32 %v2448_v31 }
 0x290   : > { %v5237_v61 = vpop.eup %5236  ;;  %3935 = vst [vmem:[%s6593_s25 + $0x1c0] sm:$0xff] %v3871_v23  ;;  %v3874_v10 = vmul.f32 %v5235_v24, %v3746_v9 }
 0x291   : > { %v5239_v34 = vpop.eup %5238  ;;  %v3744_v22 = vmul.f32 %v5237_v61, %v2426_v54 }
 0x292   : > { %v5241_v62 = vpop.eup %5240  ;;  %3938 = vst [vmem:[%s6593_s25 + $0x1d8] sm:$0xff] %v3874_v10 }
 0x293   : > { %v3872_v17 = vmul.f32 %v5239_v34, %v3744_v22  ;;  %v3749_v36 = vmul.f32 %v5241_v62, %v2452_v40  ;;  %v5243_v0 = vpop.eup %5242 }
 0x295   : > { %v5245_v14 = vpop.eup %5244  ;;  %3936 = vst [vmem:[%s6593_s25 + $0x1c8] sm:$0xff] %v3872_v17  ;;  %v3877_v26 = vmul.f32 %v5243_v0, %v3749_v36 }
 0x296   : > { %v5247_v47 = vpop.eup %5246  ;;  %v3747_v27 = vmul.f32 %v5245_v14, %v2442_v33 }
 0x297   : > { %v5249_v12 = vpop.eup %5248  ;;  %3941 = vst [vmem:[%s6593_s25 + $0x1f0] sm:$0xff] %v3877_v26 }
 0x298   : > { %v3875_v20 = vmul.f32 %v5247_v47, %v3747_v27  ;;  %v3750_v2 = vmul.f32 %v5249_v12, %v2456_v15  ;;  %v5251_v59 = vpop.eup %5250 }
 0x29a   : > { %v5253_v30 = vpop.eup %5252  ;;  %3939 = vst [vmem:[%s6593_s25 + $0x1e0] sm:$0xff] %v3875_v20  ;;  %v3878_v56 = vmul.f32 %v5251_v59, %v3750_v2 }
 0x29b   : > { %v3748_v60 = vmul.f32 %v5253_v30, %v2446_v42  ;;  %v5255_v45 = vpop.eup %5254 }
 0x29c   : > { %3942 = vst [vmem:[%s6593_s25 + $0x1f8] sm:$0xff] %v3878_v56 }
 0x29d   : > { %v3876_v18 = vmul.f32 %v5255_v45, %v3748_v60 }
 0x29f   : > { %3940 = vst [vmem:[%s6593_s25 + $0x1e8] sm:$0xff] %v3876_v18 }
 0x2a0   : > { %5270 = shalt.err (!%p5267_p5)
}
 0x2a1   : > { %s5271_s14 = scalar_lea.hbm %s7130_s8, 8192  ;;  %s5275_s25 = scalar_lea.hbm %s7187_s5, 16384 }
 0x2a2   : > { %p5272_p6 = scmp.ne.s32.totalorder %s7130_s8, %s5271_s14  ;;  %p5276_p10 = scmp.lt.s32.totalorder %s7130_s8, %s7187_s5 }
 0x2a3   : > { %p5277_p11 = scmp.lt.s32.totalorder %s5275_s25, %s5271_s14 }
 0x2a4   : > { %p5273_p7 = pnand %p5272_p6, %p5408_p4 }
 0x2a5   : > { %p5278_p12 = por %p5277_p11, %p5276_p10 }
 0x2a6   : > { %p5274_p9 = pneg %p5273_p7 }
 0x2a8   : > { %p5279_p13 = pnand %p5278_p12, %p5274_p9 }
 0x2aa   : > { %5282 = shalt.err (!%p5279_p13)
}
 0x2ab   : > { %s5336_s12 = smov 128   ;;  %s5337_s29 = smov 8  }
 0x2ac   : > { %4519 = dma.vmem_to_hbm [thread:$0]  (%p5408_p4), %s7132_s27, 8192, %s7130_s8, %s7137_s21, %s5336_s12, %s5336_s12, %s5337_s29  }
 0x2ad PF: > { %p4525_p0 = scmp.ge.s32.totalorder %s5333_s23, 2  ;;  %s3974_s7 = sand.u32 1, %s5313_s18  }
 0x2ae   : > { %s3975_s10 = scalar_lea.sflag [#allocation4], %s3974_s7 }
 0x2af   : > { %p4522_p1 = pnand %p4525_p0, %p5415_p8 }
 0x2b1   : > { %p4523_p2 = pneg %p4522_p1 }
 0x2b3   : > { %5308 = dma.done.wait (%p4523_p2), %s3975_s10, 8192  }
 0x2b4   : > { %5310 = vsyncadd (%p4523_p2), %s3975_s10, 4294959104  ;;  %s18_s23 = sadd.s32 1, %s5333_s23   ;;  %s7398_s18 = smov %s5317_s19 }
 0x2b5   : > { %p15_p3 = scmp.ge.s32.totalorder %s18_s23, 4   ;;  %s7399_s19 = smov %s5321_s20 }
 0x2b6   : > { %s7400_s20 = smov %s5421_s6  ;;  %s7401_s21 = smov %s5329_s22 }
 0x2b7   : > { %s7402_s22 = smov %s7404_s26  ;;  %17 = sbr.rel (!%p15_p3) target bundleno = 4 (0x4), region = 89 }
 0x2bc   :  { %3980 = vsyncpa [#allocation4], 1 }
 0x2bd   :  { %3982 = vsyncpa [#allocation4 + $0x1], 1 }

</bundles_post_ra>
